<compile_context>
chip_gen: v7x
topology: tpu7x:2x2x1
jax: 0.10.0
libtpu: 0.0.40
codegen_flags: <defaults>
</compile_context>

<pallas_src>
import functools

import jax
import jax.numpy as jnp
from jax.experimental import pallas as pl
from jax.experimental.pallas import tpu as pltpu

LANE = 128  # TPU lane width: channel / N dims are zero-padded to this


# ------------------------------ small helpers --------------------------------

def _round_up(x, m):
    return (x + m - 1) // m * m


def _pad_axis(x, axis, target):
    pad = target - x.shape[axis]
    if pad <= 0:
        return x
    widths = [(0, 0)] * x.ndim
    widths[axis] = (0, pad)
    return jnp.pad(x, widths)


def _pick_tm(mp):
    # Prefer >= 2 blocks along M so both v7x TensorCores get work; otherwise the
    # largest tile (down to 64) dividing the padded M.
    for t in (512, 256, 128, 64):
        if mp % t == 0 and mp // t >= 2:
            return t
    for t in (512, 256, 128, 64):
        if mp % t == 0:
            return t
    return 64


# ----------------------------- Pallas kernels --------------------------------

def _matmul_fused_kernel(*refs, relu, has_res):
    # Single-pass matmul: the whole K is resident in VMEM, so no accumulator
    # scratch / pl.when phases are needed.  Epilogue (bias [+res] [+relu]) in f32.
    if has_res:
        x_ref, w_ref, b_ref, r_ref, o_ref = refs
    else:
        x_ref, w_ref, b_ref, o_ref = refs
        r_ref = None
    acc = jnp.dot(x_ref[...], w_ref[...], preferred_element_type=jnp.float32)
    acc = acc + b_ref[...]
    if r_ref is not None:
        acc = acc + r_ref[...].astype(jnp.float32)
    if relu:
        acc = jnp.maximum(acc, 0.0)
    o_ref[...] = acc.astype(o_ref.dtype)


def matmul_fused(x, w, b, residual=None, relu=False, out_dtype=jnp.bfloat16):
    """(M,K)@(K,N) + b [+ residual] [-> relu]; bf16 MXU inputs, f32 accumulate."""
    M, K = x.shape
    K2, N = w.shape
    assert K == K2 and K % LANE == 0 and N % LANE == 0
    Mp = _round_up(max(M, 64), 64)
    tm = _pick_tm(Mp)
    tn = LANE

    xp = _pad_axis(x.astype(jnp.bfloat16), 0, Mp)
    w = w.astype(jnp.bfloat16)
    b2 = b.astype(jnp.float32).reshape(1, N)

    args = [xp, w, b2]
    in_specs = [
        pl.BlockSpec((tm, K), lambda i, j: (i, 0)),
        pl.BlockSpec((K, tn), lambda i, j: (0, j)),
        pl.BlockSpec((1, tn), lambda i, j: (0, j)),
    ]
    if residual is not None:
        r = _pad_axis(residual.astype(jnp.bfloat16), 0, Mp)
        args.append(r)
        in_specs.append(pl.BlockSpec((tm, tn), lambda i, j: (i, j)))

    grid = (Mp // tm, N // tn)
    kernel = functools.partial(_matmul_fused_kernel, relu=relu,
                               has_res=residual is not None)

    out_bytes = jnp.dtype(out_dtype).itemsize
    # Double-buffered bf16 input tiles + out tiles (+ residual) + bias.
    footprint = 2 * 2 * (tm * K + K * tn) + 2 * out_bytes * tm * tn + 4 * tn
    if residual is not None:
        footprint += 2 * 2 * tm * tn
    vmem_limit = int(min(48 * 1024 * 1024, max(16 * 1024 * 1024, 4 * footprint)))

    flops = 2 * Mp * K * N
    bytes_accessed = int(2 * (Mp * K + K * N) + out_bytes * Mp * N + 4 * N
                         + (2 * Mp * N if residual is not None else 0))

    out = pl.pallas_call(
        kernel,
        grid=grid,
        in_specs=in_specs,
        out_specs=pl.BlockSpec((tm, tn), lambda i, j: (i, j)),
        out_shape=jax.ShapeDtypeStruct((Mp, N), out_dtype),
        compiler_params=pltpu.CompilerParams(
            dimension_semantics=("parallel", "parallel"),
            vmem_limit_bytes=vmem_limit),
        cost_estimate=pl.CostEstimate(flops=flops, transcendentals=0,
                                      bytes_accessed=bytes_accessed),
    )(*args)
    return out[:M] if Mp != M else out


def _gap_relu_kernel(x_ref, o_ref, acc_ref, *, inv_hw):
    # x block: (B, ts, 128).  Spatial axis is the (last) reduction grid axis;
    # partial sums accumulate in an f32 scratch, finalize = mean + ReLU.
    s = pl.program_id(1)

    @pl.when(s == 0)
    def _():
        acc_ref[...] = jnp.zeros_like(acc_ref)

    acc_ref[...] += jnp.sum(x_ref[...].astype(jnp.float32), axis=1)

    @pl.when(s == pl.num_programs(1) - 1)
    def _():
        o_ref[...] = jnp.maximum(acc_ref[...] * inv_hw, 0.0).astype(o_ref.dtype)


def gap_relu(x):
    """F.relu(adaptive_avg_pool2d(x, 1).view(B, -1)) with spatially tiled blocks."""
    B, H, W, C = x.shape
    assert C % LANE == 0
    S = H * W
    xr = x.reshape(B, S, C)
    if S <= 1024:
        ts, Sp = S, S
    else:
        ts = 512
        Sp = _round_up(S, ts)
        xr = _pad_axis(xr, 1, Sp)          # zero pad: does not change the sum
    n_s = Sp // ts
    kernel = functools.partial(_gap_relu_kernel, inv_hw=1.0 / float(S))
    out = pl.pallas_call(
        kernel,
        grid=(C // LANE, n_s),
        in_specs=[pl.BlockSpec((B, ts, LANE), lambda c, s: (0, s, c))],
        out_specs=pl.BlockSpec((B, LANE), lambda c, s: (0, c)),
        out_shape=jax.ShapeDtypeStruct((B, C), jnp.bfloat16),
        scratch_shapes=[pltpu.VMEM((B, LANE), jnp.float32)],
        compiler_params=pltpu.CompilerParams(
            dimension_semantics=("parallel", "arbitrary")),
    )(xr)
    return out


# ----------------- conv / pool wrappers (im2col glue in JAX) -----------------

def _im2col(x, k, stride, pad):
    B, H, W, C = x.shape
    xp = jnp.pad(x, ((0, 0), (pad, pad), (pad, pad), (0, 0)))
    Hp, Wp = H + 2 * pad, W + 2 * pad
    oh = (Hp - k) // stride + 1
    ow = (Wp - k) // stride + 1
    cols = []
    for i in range(k):
        for j in range(k):
            cols.append(xp[:, i:i + (oh - 1) * stride + 1:stride,
                            j:j + (ow - 1) * stride + 1:stride, :])
    patches = jnp.concatenate(cols, axis=-1)          # (B, oh, ow, k*k*Cin) bf16
    return patches.reshape(B * oh * ow, k * k * C), oh, ow


def conv2d_bn(x, p, stride, pad, relu, residual=None):
    """BN-folded conv as im2col + one fused Pallas matmul (bias/res/ReLU epilogue)."""
    B = x.shape[0]
    cin, k = p["cin"], p["k"]
    x = x[..., :cin]                                  # drop zero lane-padding
    cols, oh, ow = _im2col(x, k, stride, pad)         # (M, k*k*cin)
    cols = _pad_axis(cols, 1, p["w"].shape[0])        # single pad of K to Kp
    out = matmul_fused(cols, p["w"], p["b"], residual=residual, relu=relu)
    return out.reshape(B, oh, ow, p["w"].shape[1])


def maxpool_3x3_s2_p1(x):
    # Plain XLA chain of strided-slice maxima: fuses, no (9,M,C) materialization.
    B, H, W, C = x.shape
    neg = jnp.finfo(x.dtype).min
    xp = jnp.pad(x, ((0, 0), (1, 1), (1, 1), (0, 0)), constant_values=neg)
    Hp, Wp = H + 2, W + 2
    oh = (Hp - 3) // 2 + 1
    ow = (Wp - 3) // 2 + 1
    out = None
    for i in range(3):
        for j in range(3):
            s = xp[:, i:i + (oh - 1) * 2 + 1:2, j:j + (ow - 1) * 2 + 1:2, :]
            out = s if out is None else jnp.maximum(out, s)
    return out


# ------------------------- deterministic parameters --------------------------

def _fold_bn(key, w, cout, eps=1e-5):
    kg, kb, km = jax.random.split(key, 3)
    gamma = 1.0 + 0.1 * jax.random.normal(kg, (cout,), jnp.float32)
    beta = 0.1 * jax.random.normal(kb, (cout,), jnp.float32)
    mean = 0.1 * jax.random.normal(km, (cout,), jnp.float32)
    var = jnp.ones((cout,), jnp.float32)
    scale = gamma / jnp.sqrt(var + eps)
    return w * scale[:, None, None, None], beta - mean * scale


def init_conv_bn(key, cin, cout, k):
    """BN-folded conv stored as a (Kp, 128) bf16 matmul matrix; Cin kept true."""
    cout_pad = _round_up(cout, LANE)
    kw, kbn = jax.random.split(key)
    w = 0.1 * jax.random.normal(kw, (cout, cin, k, k), jnp.float32)  # torch OIHW
    w_f, b_f = _fold_bn(kbn, w, cout)
    w_hwio = jnp.transpose(w_f, (2, 3, 1, 0))                        # (KH,KW,Cin,Cout)
    K = k * k * cin
    Kp = _round_up(K, LANE)
    w_mat = jnp.zeros((Kp, cout_pad), jnp.float32)
    w_mat = w_mat.at[:K, :cout].set(w_hwio.reshape(K, cout))
    b_pad = jnp.zeros((cout_pad,), jnp.float32).at[:cout].set(b_f)
    return {"w": w_mat.astype(jnp.bfloat16), "b": b_pad, "cin": cin, "k": k}


def init_linear(key, fin, fout):
    fin_pad = _round_up(fin, LANE)
    fout_pad = _round_up(fout, LANE)
    kw, kb = jax.random.split(key)
    w = 0.1 * jax.random.normal(kw, (fout, fin), jnp.float32)        # torch (out, in)
    b = 0.1 * jax.random.normal(kb, (fout,), jnp.float32)
    w_pad = jnp.zeros((fin_pad, fout_pad), jnp.float32)
    w_pad = w_pad.at[:fin, :fout].set(jnp.transpose(w))
    b_pad = jnp.zeros((fout_pad,), jnp.float32).at[:fout].set(b)
    return {"w": w_pad.astype(jnp.bfloat16), "b": b_pad}


def init_dfpnet_params(key, in_ch=3, base=8, num_classes=10,
                       embed_dim=16, embed_reduction=8):
    keys = iter(jax.random.split(key, 64))
    p = {"conv1": init_conv_bn(next(keys), in_ch, base, 7)}
    layers = []
    cin = base
    for cout, stride in [(base, 1), (2 * base, 2), (4 * base, 2), (8 * base, 2)]:
        blocks = []
        for bi in range(2):                       # ResNet18: 2 BasicBlocks/stage
            s = stride if bi == 0 else 1
            blocks.append({
                "conv1": init_conv_bn(next(keys), cin, cout, 3),
                "conv2": init_conv_bn(next(keys), cout, cout, 3),
                "down": (init_conv_bn(next(keys), cin, cout, 1)
                         if (s != 1 or cin != cout) else None),
                "stride": s,
            })
            cin = cout
        layers.append(blocks)
    p["layers"] = layers
    feat_dim = 8 * base
    p["classifier"] = init_linear(next(keys), feat_dim, num_classes)
    intermediate = max(feat_dim, embed_dim, embed_reduction + 1)
    hidden = intermediate // embed_reduction
    p["embed1"] = init_linear(next(keys), feat_dim, hidden)
    p["embed2"] = init_linear(next(keys), hidden, embed_dim)
    return p


# --------------------------------- forward -----------------------------------

def basic_block(x, blk):
    s = blk["stride"]
    out = conv2d_bn(x, blk["conv1"], s, 1, relu=True)
    if blk["down"] is not None:
        sc = conv2d_bn(x, blk["down"], s, 0, relu=False)
    else:
        sc = x
    res = sc.reshape(-1, sc.shape[-1])
    # second conv: BN-folded conv + residual add + ReLU fused in one kernel
    return conv2d_bn(out, blk["conv2"], 1, 1, relu=True, residual=res)


def dfpnet_forward(params, x_nchw, num_classes=10, embed_dim=16):
    x = jnp.transpose(x_nchw, (0, 2, 3, 1)).astype(jnp.bfloat16)   # NCHW -> NHWC
    x = conv2d_bn(x, params["conv1"], 2, 3, relu=True)
    x = maxpool_3x3_s2_p1(x)
    for blocks in params["layers"]:
        for blk in blocks:
            x = basic_block(x, blk)
    gap = gap_relu(x)             # F.relu(adaptive_avg_pool2d(x,1).view(B,-1))

    # Fused head: classifier and embed1 both consume `gap`; concat along N so
    # gap is read once and a single pallas_call produces both (two 128 N-tiles).
    wc, bc = params["classifier"]["w"], params["classifier"]["b"]
    we, be = params["embed1"]["w"], params["embed1"]["b"]
    w_head = jnp.concatenate([wc, we], axis=1)        # (128, 256)
    b_head = jnp.concatenate([bc, be], axis=0)        # (256,)
    head = matmul_fused(gap, w_head, b_head, out_dtype=jnp.float32)

    logits = head[:, :num_classes]                    # classifier: no activation
    h = jnp.maximum(head[:, wc.shape[1]:], 0.0)       # embed1 + ReLU (padded 128)
    embed = matmul_fused(h, params["embed2"]["w"], params["embed2"]["b"],
                         out_dtype=jnp.float32)[:, :embed_dim]
    return logits, embed


if __name__ == "__main__":
    key = jax.random.PRNGKey(0)
    kp, kx = jax.random.split(key)
    params = init_dfpnet_params(kp, in_ch=3, base=8, num_classes=10,
                                embed_dim=16, embed_reduction=8)
    x = jax.random.normal(kx, (2, 3, 16, 16), jnp.float32)   # NCHW like PyTorch

    fwd = jax.jit(lambda xin: dfpnet_forward(params, xin,
                                             num_classes=10, embed_dim=16))
    logits, embed = fwd(x)
    jax.block_until_ready((logits, embed))
    assert logits.shape == (2, 10) and embed.shape == (2, 16)
    assert bool(jnp.all(jnp.isfinite(logits))) and bool(jnp.all(jnp.isfinite(embed)))
    print("KERNEL_OK")
</pallas_src>

<mosaic_0001>
module attributes {stable_mosaic.version = 11 : i64} {
  func.func @_matmul_fused_kernel(%arg0: i32, %arg1: i32, %arg2: memref<64x256xbf16, #tpu.memory_space<vmem>>, %arg3: memref<256x128xbf16, #tpu.memory_space<vmem>>, %arg4: memref<1x128xf32, #tpu.memory_space<vmem>>, %arg5: memref<64x128xbf16, #tpu.memory_space<vmem>>) attributes {dimension_semantics = [#tpu.dimension_semantics<parallel>, #tpu.dimension_semantics<parallel>], iteration_bounds = array<i64: 2, 1>, scalar_prefetch = 0 : i64, scratch_operands = 0 : i64, tpu.core_type = #tpu.core_type<tc>, window_params = [{transform_indices = @transform_0, window_bounds = array<i64: 64, 256>}, {transform_indices = @transform_1, window_bounds = array<i64: 256, 128>}, {transform_indices = @transform_2, window_bounds = array<i64: 1, 128>}, {transform_indices = @transform_3, window_bounds = array<i64: 64, 128>}]} {
    %c0 = arith.constant 0 : index
    %c0_0 = arith.constant 0 : index
    %0 = vector.load %arg2[%c0, %c0_0] : memref<64x256xbf16, #tpu.memory_space<vmem>>, vector<64x256xbf16>
    %c0_1 = arith.constant 0 : index
    %c0_2 = arith.constant 0 : index
    %1 = vector.load %arg3[%c0_1, %c0_2] : memref<256x128xbf16, #tpu.memory_space<vmem>>, vector<256x128xbf16>
    %cst = arith.constant dense<0.000000e+00> : vector<64x128xf32>
    %2 = tpu.matmul %0, %1, %cst {dimension_numbers = #tpu.dot_dimension_numbers<[1], [0], [0], [1], [0, 0, 1, 1], [], []>} : vector<64x256xbf16>, vector<256x128xbf16>, vector<64x128xf32> -> vector<64x128xf32>
    %c0_3 = arith.constant 0 : index
    %c0_4 = arith.constant 0 : index
    %3 = vector.load %arg4[%c0_3, %c0_4] : memref<1x128xf32, #tpu.memory_space<vmem>>, vector<1x128xf32>
    %4 = vector.broadcast %3 : vector<1x128xf32> to vector<64x128xf32>
    %5 = arith.addf %2, %4 : vector<64x128xf32>
    %cst_5 = arith.constant 0.000000e+00 : f32
    %6 = vector.broadcast %cst_5 : f32 to vector<64x128xf32>
    %7 = arith.maximumf %5, %6 : vector<64x128xf32>
    %8 = arith.truncf %7 : vector<64x128xf32> to vector<64x128xbf16>
    %c0_6 = arith.constant 0 : index
    %c0_7 = arith.constant 0 : index
    %9 = vector.load %arg5[%c0_6, %c0_7] : memref<64x128xbf16, #tpu.memory_space<vmem>>, vector<64x128xbf16>
    tpu.vector_store %arg5[%c0_6, %c0_7], %8 {strides = array<i32>} : memref<64x128xbf16, #tpu.memory_space<vmem>>, vector<64x128xbf16>,
    return
  }
  func.func @transform_0(%arg0: i32, %arg1: i32) -> (i32, i32) {
    %c0_i32 = arith.constant 0 : i32
    %c0_i32_0 = arith.constant 0 : i32
    return %arg0, %c0_i32 : i32, i32
  }
  func.func @transform_1(%arg0: i32, %arg1: i32) -> (i32, i32) {
    %c0_i32 = arith.constant 0 : i32
    %c0_i32_0 = arith.constant 0 : i32
    return %c0_i32, %arg1 : i32, i32
  }
  func.func @transform_2(%arg0: i32, %arg1: i32) -> (i32, i32) {
    %c0_i32 = arith.constant 0 : i32
    %c0_i32_0 = arith.constant 0 : i32
    return %c0_i32, %arg1 : i32, i32
  }
  func.func @transform_3(%arg0: i32, %arg1: i32) -> (i32, i32) {
    %c0_i32 = arith.constant 0 : i32
    return %arg0, %arg1 : i32, i32
  }
}

module attributes {stable_mosaic.version = 11 : i64} {
  func.func @_matmul_fused_kernel(%arg0: i32, %arg1: i32, %arg2: memref<64x128xbf16, #tpu.memory_space<vmem>>, %arg3: memref<128x128xbf16, #tpu.memory_space<vmem>>, %arg4: memref<1x128xf32, #tpu.memory_space<vmem>>, %arg5: memref<64x128xbf16, #tpu.memory_space<vmem>>) attributes {dimension_semantics = [#tpu.dimension_semantics<parallel>, #tpu.dimension_semantics<parallel>], iteration_bounds = array<i64: 1, 1>, scalar_prefetch = 0 : i64, scratch_operands = 0 : i64, tpu.core_type = #tpu.core_type<tc>, window_params = [{transform_indices = @transform_0, window_bounds = array<i64: 64, 128>}, {transform_indices = @transform_1, window_bounds = array<i64: 128, 128>}, {transform_indices = @transform_2, window_bounds = array<i64: 1, 128>}, {transform_indices = @transform_3, window_bounds = array<i64: 64, 128>}]} {
    %c0 = arith.constant 0 : index
    %c0_0 = arith.constant 0 : index
    %0 = vector.load %arg2[%c0, %c0_0] : memref<64x128xbf16, #tpu.memory_space<vmem>>, vector<64x128xbf16>
    %c0_1 = arith.constant 0 : index
    %c0_2 = arith.constant 0 : index
    %1 = vector.load %arg3[%c0_1, %c0_2] : memref<128x128xbf16, #tpu.memory_space<vmem>>, vector<128x128xbf16>
    %cst = arith.constant dense<0.000000e+00> : vector<64x128xf32>
    %2 = tpu.matmul %0, %1, %cst {dimension_numbers = #tpu.dot_dimension_numbers<[1], [0], [0], [1], [0, 0, 1, 1], [], []>} : vector<64x128xbf16>, vector<128x128xbf16>, vector<64x128xf32> -> vector<64x128xf32>
    %c0_3 = arith.constant 0 : index
    %c0_4 = arith.constant 0 : index
    %3 = vector.load %arg4[%c0_3, %c0_4] : memref<1x128xf32, #tpu.memory_space<vmem>>, vector<1x128xf32>
    %4 = vector.broadcast %3 : vector<1x128xf32> to vector<64x128xf32>
    %5 = arith.addf %2, %4 : vector<64x128xf32>
    %cst_5 = arith.constant 0.000000e+00 : f32
    %6 = vector.broadcast %cst_5 : f32 to vector<64x128xf32>
    %7 = arith.maximumf %5, %6 : vector<64x128xf32>
    %8 = arith.truncf %7 : vector<64x128xf32> to vector<64x128xbf16>
    %c0_6 = arith.constant 0 : index
    %c0_7 = arith.constant 0 : index
    %9 = vector.load %arg5[%c0_6, %c0_7] : memref<64x128xbf16, #tpu.memory_space<vmem>>, vector<64x128xbf16>
    tpu.vector_store %arg5[%c0_6, %c0_7], %8 {strides = array<i32>} : memref<64x128xbf16, #tpu.memory_space<vmem>>, vector<64x128xbf16>,
    return
  }
  func.func @transform_0(%arg0: i32, %arg1: i32) -> (i32, i32) {
    %c0_i32 = arith.constant 0 : i32
    %c0_i32_0 = arith.constant 0 : i32
    return %arg0, %c0_i32 : i32, i32
  }
  func.func @transform_1(%arg0: i32, %arg1: i32) -> (i32, i32) {
    %c0_i32 = arith.constant 0 : i32
    %c0_i32_0 = arith.constant 0 : i32
    return %c0_i32, %arg1 : i32, i32
  }
  func.func @transform_2(%arg0: i32, %arg1: i32) -> (i32, i32) {
    %c0_i32 = arith.constant 0 : i32
    %c0_i32_0 = arith.constant 0 : i32
    return %c0_i32, %arg1 : i32, i32
  }
  func.func @transform_3(%arg0: i32, %arg1: i32) -> (i32, i32) {
    %c0_i32 = arith.constant 0 : i32
    return %arg0, %arg1 : i32, i32
  }
}

module attributes {stable_mosaic.version = 11 : i64} {
  func.func @_matmul_fused_kernel(%arg0: i32, %arg1: i32, %arg2: memref<64x128xbf16, #tpu.memory_space<vmem>>, %arg3: memref<128x128xbf16, #tpu.memory_space<vmem>>, %arg4: memref<1x128xf32, #tpu.memory_space<vmem>>, %arg5: memref<64x128xbf16, #tpu.memory_space<vmem>>, %arg6: memref<64x128xbf16, #tpu.memory_space<vmem>>) attributes {dimension_semantics = [#tpu.dimension_semantics<parallel>, #tpu.dimension_semantics<parallel>], iteration_bounds = array<i64: 1, 1>, scalar_prefetch = 0 : i64, scratch_operands = 0 : i64, tpu.core_type = #tpu.core_type<tc>, window_params = [{transform_indices = @transform_0, window_bounds = array<i64: 64, 128>}, {transform_indices = @transform_1, window_bounds = array<i64: 128, 128>}, {transform_indices = @transform_2, window_bounds = array<i64: 1, 128>}, {transform_indices = @transform_3, window_bounds = array<i64: 64, 128>}, {transform_indices = @transform_4, window_bounds = array<i64: 64, 128>}]} {
    %c0 = arith.constant 0 : index
    %c0_0 = arith.constant 0 : index
    %0 = vector.load %arg2[%c0, %c0_0] : memref<64x128xbf16, #tpu.memory_space<vmem>>, vector<64x128xbf16>
    %c0_1 = arith.constant 0 : index
    %c0_2 = arith.constant 0 : index
    %1 = vector.load %arg3[%c0_1, %c0_2] : memref<128x128xbf16, #tpu.memory_space<vmem>>, vector<128x128xbf16>
    %cst = arith.constant dense<0.000000e+00> : vector<64x128xf32>
    %2 = tpu.matmul %0, %1, %cst {dimension_numbers = #tpu.dot_dimension_numbers<[1], [0], [0], [1], [0, 0, 1, 1], [], []>} : vector<64x128xbf16>, vector<128x128xbf16>, vector<64x128xf32> -> vector<64x128xf32>
    %c0_3 = arith.constant 0 : index
    %c0_4 = arith.constant 0 : index
    %3 = vector.load %arg4[%c0_3, %c0_4] : memref<1x128xf32, #tpu.memory_space<vmem>>, vector<1x128xf32>
    %4 = vector.broadcast %3 : vector<1x128xf32> to vector<64x128xf32>
    %5 = arith.addf %2, %4 : vector<64x128xf32>
    %c0_5 = arith.constant 0 : index
    %c0_6 = arith.constant 0 : index
    %6 = vector.load %arg5[%c0_5, %c0_6] : memref<64x128xbf16, #tpu.memory_space<vmem>>, vector<64x128xbf16>
    %7 = arith.extf %6 : vector<64x128xbf16> to vector<64x128xf32>
    %8 = arith.addf %5, %7 : vector<64x128xf32>
    %cst_7 = arith.constant 0.000000e+00 : f32
    %9 = vector.broadcast %cst_7 : f32 to vector<64x128xf32>
    %10 = arith.maximumf %8, %9 : vector<64x128xf32>
    %11 = arith.truncf %10 : vector<64x128xf32> to vector<64x128xbf16>
    %c0_8 = arith.constant 0 : index
    %c0_9 = arith.constant 0 : index
    %12 = vector.load %arg6[%c0_8, %c0_9] : memref<64x128xbf16, #tpu.memory_space<vmem>>, vector<64x128xbf16>
    tpu.vector_store %arg6[%c0_8, %c0_9], %11 {strides = array<i32>} : memref<64x128xbf16, #tpu.memory_space<vmem>>, vector<64x128xbf16>,
    return
  }
  func.func @transform_0(%arg0: i32, %arg1: i32) -> (i32, i32) {
    %c0_i32 = arith.constant 0 : i32
    %c0_i32_0 = arith.constant 0 : i32
    return %arg0, %c0_i32 : i32, i32
  }
  func.func @transform_1(%arg0: i32, %arg1: i32) -> (i32, i32) {
    %c0_i32 = arith.constant 0 : i32
    %c0_i32_0 = arith.constant 0 : i32
    return %c0_i32, %arg1 : i32, i32
  }
  func.func @transform_2(%arg0: i32, %arg1: i32) -> (i32, i32) {
    %c0_i32 = arith.constant 0 : i32
    %c0_i32_0 = arith.constant 0 : i32
    return %c0_i32, %arg1 : i32, i32
  }
  func.func @transform_3(%arg0: i32, %arg1: i32) -> (i32, i32) {
    %c0_i32 = arith.constant 0 : i32
    return %arg0, %arg1 : i32, i32
  }
  func.func @transform_4(%arg0: i32, %arg1: i32) -> (i32, i32) {
    %c0_i32 = arith.constant 0 : i32
    return %arg0, %arg1 : i32, i32
  }
}

module attributes {stable_mosaic.version = 11 : i64} {
  func.func @_matmul_fused_kernel(%arg0: i32, %arg1: i32, %arg2: memref<64x128xbf16, #tpu.memory_space<vmem>>, %arg3: memref<128x128xbf16, #tpu.memory_space<vmem>>, %arg4: memref<1x128xf32, #tpu.memory_space<vmem>>, %arg5: memref<64x128xbf16, #tpu.memory_space<vmem>>) attributes {dimension_semantics = [#tpu.dimension_semantics<parallel>, #tpu.dimension_semantics<parallel>], iteration_bounds = array<i64: 1, 1>, scalar_prefetch = 0 : i64, scratch_operands = 0 : i64, tpu.core_type = #tpu.core_type<tc>, window_params = [{transform_indices = @transform_0, window_bounds = array<i64: 64, 128>}, {transform_indices = @transform_1, window_bounds = array<i64: 128, 128>}, {transform_indices = @transform_2, window_bounds = array<i64: 1, 128>}, {transform_indices = @transform_3, window_bounds = array<i64: 64, 128>}]} {
    %c0 = arith.constant 0 : index
    %c0_0 = arith.constant 0 : index
    %0 = vector.load %arg2[%c0, %c0_0] : memref<64x128xbf16, #tpu.memory_space<vmem>>, vector<64x128xbf16>
    %c0_1 = arith.constant 0 : index
    %c0_2 = arith.constant 0 : index
    %1 = vector.load %arg3[%c0_1, %c0_2] : memref<128x128xbf16, #tpu.memory_space<vmem>>, vector<128x128xbf16>
    %cst = arith.constant dense<0.000000e+00> : vector<64x128xf32>
    %2 = tpu.matmul %0, %1, %cst {dimension_numbers = #tpu.dot_dimension_numbers<[1], [0], [0], [1], [0, 0, 1, 1], [], []>} : vector<64x128xbf16>, vector<128x128xbf16>, vector<64x128xf32> -> vector<64x128xf32>
    %c0_3 = arith.constant 0 : index
    %c0_4 = arith.constant 0 : index
    %3 = vector.load %arg4[%c0_3, %c0_4] : memref<1x128xf32, #tpu.memory_space<vmem>>, vector<1x128xf32>
    %4 = vector.broadcast %3 : vector<1x128xf32> to vector<64x128xf32>
    %5 = arith.addf %2, %4 : vector<64x128xf32>
    %6 = arith.truncf %5 : vector<64x128xf32> to vector<64x128xbf16>
    %c0_5 = arith.constant 0 : index
    %c0_6 = arith.constant 0 : index
    %7 = vector.load %arg5[%c0_5, %c0_6] : memref<64x128xbf16, #tpu.memory_space<vmem>>, vector<64x128xbf16>
    tpu.vector_store %arg5[%c0_5, %c0_6], %6 {strides = array<i32>} : memref<64x128xbf16, #tpu.memory_space<vmem>>, vector<64x128xbf16>,
    return
  }
  func.func @transform_0(%arg0: i32, %arg1: i32) -> (i32, i32) {
    %c0_i32 = arith.constant 0 : i32
    %c0_i32_0 = arith.constant 0 : i32
    return %arg0, %c0_i32 : i32, i32
  }
  func.func @transform_1(%arg0: i32, %arg1: i32) -> (i32, i32) {
    %c0_i32 = arith.constant 0 : i32
    %c0_i32_0 = arith.constant 0 : i32
    return %c0_i32, %arg1 : i32, i32
  }
  func.func @transform_2(%arg0: i32, %arg1: i32) -> (i32, i32) {
    %c0_i32 = arith.constant 0 : i32
    %c0_i32_0 = arith.constant 0 : i32
    return %c0_i32, %arg1 : i32, i32
  }
  func.func @transform_3(%arg0: i32, %arg1: i32) -> (i32, i32) {
    %c0_i32 = arith.constant 0 : i32
    return %arg0, %arg1 : i32, i32
  }
}

module attributes {stable_mosaic.version = 11 : i64} {
  func.func @_matmul_fused_kernel(%arg0: i32, %arg1: i32, %arg2: memref<64x256xbf16, #tpu.memory_space<vmem>>, %arg3: memref<256x128xbf16, #tpu.memory_space<vmem>>, %arg4: memref<1x128xf32, #tpu.memory_space<vmem>>, %arg5: memref<64x128xbf16, #tpu.memory_space<vmem>>) attributes {dimension_semantics = [#tpu.dimension_semantics<parallel>, #tpu.dimension_semantics<parallel>], iteration_bounds = array<i64: 1, 1>, scalar_prefetch = 0 : i64, scratch_operands = 0 : i64, tpu.core_type = #tpu.core_type<tc>, window_params = [{transform_indices = @transform_0, window_bounds = array<i64: 64, 256>}, {transform_indices = @transform_1, window_bounds = array<i64: 256, 128>}, {transform_indices = @transform_2, window_bounds = array<i64: 1, 128>}, {transform_indices = @transform_3, window_bounds = array<i64: 64, 128>}]} {
    %c0 = arith.constant 0 : index
    %c0_0 = arith.constant 0 : index
    %0 = vector.load %arg2[%c0, %c0_0] : memref<64x256xbf16, #tpu.memory_space<vmem>>, vector<64x256xbf16>
    %c0_1 = arith.constant 0 : index
    %c0_2 = arith.constant 0 : index
    %1 = vector.load %arg3[%c0_1, %c0_2] : memref<256x128xbf16, #tpu.memory_space<vmem>>, vector<256x128xbf16>
    %cst = arith.constant dense<0.000000e+00> : vector<64x128xf32>
    %2 = tpu.matmul %0, %1, %cst {dimension_numbers = #tpu.dot_dimension_numbers<[1], [0], [0], [1], [0, 0, 1, 1], [], []>} : vector<64x256xbf16>, vector<256x128xbf16>, vector<64x128xf32> -> vector<64x128xf32>
    %c0_3 = arith.constant 0 : index
    %c0_4 = arith.constant 0 : index
    %3 = vector.load %arg4[%c0_3, %c0_4] : memref<1x128xf32, #tpu.memory_space<vmem>>, vector<1x128xf32>
    %4 = vector.broadcast %3 : vector<1x128xf32> to vector<64x128xf32>
    %5 = arith.addf %2, %4 : vector<64x128xf32>
    %cst_5 = arith.constant 0.000000e+00 : f32
    %6 = vector.broadcast %cst_5 : f32 to vector<64x128xf32>
    %7 = arith.maximumf %5, %6 : vector<64x128xf32>
    %8 = arith.truncf %7 : vector<64x128xf32> to vector<64x128xbf16>
    %c0_6 = arith.constant 0 : index
    %c0_7 = arith.constant 0 : index
    %9 = vector.load %arg5[%c0_6, %c0_7] : memref<64x128xbf16, #tpu.memory_space<vmem>>, vector<64x128xbf16>
    tpu.vector_store %arg5[%c0_6, %c0_7], %8 {strides = array<i32>} : memref<64x128xbf16, #tpu.memory_space<vmem>>, vector<64x128xbf16>,
    return
  }
  func.func @transform_0(%arg0: i32, %arg1: i32) -> (i32, i32) {
    %c0_i32 = arith.constant 0 : i32
    %c0_i32_0 = arith.constant 0 : i32
    return %arg0, %c0_i32 : i32, i32
  }
  func.func @transform_1(%arg0: i32, %arg1: i32) -> (i32, i32) {
    %c0_i32 = arith.constant 0 : i32
    %c0_i32_0 = arith.constant 0 : i32
    return %c0_i32, %arg1 : i32, i32
  }
  func.func @transform_2(%arg0: i32, %arg1: i32) -> (i32, i32) {
    %c0_i32 = arith.constant 0 : i32
    %c0_i32_0 = arith.constant 0 : i32
    return %c0_i32, %arg1 : i32, i32
  }
  func.func @transform_3(%arg0: i32, %arg1: i32) -> (i32, i32) {
    %c0_i32 = arith.constant 0 : i32
    return %arg0, %arg1 : i32, i32
  }
}

module attributes {stable_mosaic.version = 11 : i64} {
  func.func @_matmul_fused_kernel(%arg0: i32, %arg1: i32, %arg2: memref<64x256xbf16, #tpu.memory_space<vmem>>, %arg3: memref<256x128xbf16, #tpu.memory_space<vmem>>, %arg4: memref<1x128xf32, #tpu.memory_space<vmem>>, %arg5: memref<64x128xbf16, #tpu.memory_space<vmem>>, %arg6: memref<64x128xbf16, #tpu.memory_space<vmem>>) attributes {dimension_semantics = [#tpu.dimension_semantics<parallel>, #tpu.dimension_semantics<parallel>], iteration_bounds = array<i64: 1, 1>, scalar_prefetch = 0 : i64, scratch_operands = 0 : i64, tpu.core_type = #tpu.core_type<tc>, window_params = [{transform_indices = @transform_0, window_bounds = array<i64: 64, 256>}, {transform_indices = @transform_1, window_bounds = array<i64: 256, 128>}, {transform_indices = @transform_2, window_bounds = array<i64: 1, 128>}, {transform_indices = @transform_3, window_bounds = array<i64: 64, 128>}, {transform_indices = @transform_4, window_bounds = array<i64: 64, 128>}]} {
    %c0 = arith.constant 0 : index
    %c0_0 = arith.constant 0 : index
    %0 = vector.load %arg2[%c0, %c0_0] : memref<64x256xbf16, #tpu.memory_space<vmem>>, vector<64x256xbf16>
    %c0_1 = arith.constant 0 : index
    %c0_2 = arith.constant 0 : index
    %1 = vector.load %arg3[%c0_1, %c0_2] : memref<256x128xbf16, #tpu.memory_space<vmem>>, vector<256x128xbf16>
    %cst = arith.constant dense<0.000000e+00> : vector<64x128xf32>
    %2 = tpu.matmul %0, %1, %cst {dimension_numbers = #tpu.dot_dimension_numbers<[1], [0], [0], [1], [0, 0, 1, 1], [], []>} : vector<64x256xbf16>, vector<256x128xbf16>, vector<64x128xf32> -> vector<64x128xf32>
    %c0_3 = arith.constant 0 : index
    %c0_4 = arith.constant 0 : index
    %3 = vector.load %arg4[%c0_3, %c0_4] : memref<1x128xf32, #tpu.memory_space<vmem>>, vector<1x128xf32>
    %4 = vector.broadcast %3 : vector<1x128xf32> to vector<64x128xf32>
    %5 = arith.addf %2, %4 : vector<64x128xf32>
    %c0_5 = arith.constant 0 : index
    %c0_6 = arith.constant 0 : index
    %6 = vector.load %arg5[%c0_5, %c0_6] : memref<64x128xbf16, #tpu.memory_space<vmem>>, vector<64x128xbf16>
    %7 = arith.extf %6 : vector<64x128xbf16> to vector<64x128xf32>
    %8 = arith.addf %5, %7 : vector<64x128xf32>
    %cst_7 = arith.constant 0.000000e+00 : f32
    %9 = vector.broadcast %cst_7 : f32 to vector<64x128xf32>
    %10 = arith.maximumf %8, %9 : vector<64x128xf32>
    %11 = arith.truncf %10 : vector<64x128xf32> to vector<64x128xbf16>
    %c0_8 = arith.constant 0 : index
    %c0_9 = arith.constant 0 : index
    %12 = vector.load %arg6[%c0_8, %c0_9] : memref<64x128xbf16, #tpu.memory_space<vmem>>, vector<64x128xbf16>
    tpu.vector_store %arg6[%c0_8, %c0_9], %11 {strides = array<i32>} : memref<64x128xbf16, #tpu.memory_space<vmem>>, vector<64x128xbf16>,
    return
  }
  func.func @transform_0(%arg0: i32, %arg1: i32) -> (i32, i32) {
    %c0_i32 = arith.constant 0 : i32
    %c0_i32_0 = arith.constant 0 : i32
    return %arg0, %c0_i32 : i32, i32
  }
  func.func @transform_1(%arg0: i32, %arg1: i32) -> (i32, i32) {
    %c0_i32 = arith.constant 0 : i32
    %c0_i32_0 = arith.constant 0 : i32
    return %c0_i32, %arg1 : i32, i32
  }
  func.func @transform_2(%arg0: i32, %arg1: i32) -> (i32, i32) {
    %c0_i32 = arith.constant 0 : i32
    %c0_i32_0 = arith.constant 0 : i32
    return %c0_i32, %arg1 : i32, i32
  }
  func.func @transform_3(%arg0: i32, %arg1: i32) -> (i32, i32) {
    %c0_i32 = arith.constant 0 : i32
    return %arg0, %arg1 : i32, i32
  }
  func.func @transform_4(%arg0: i32, %arg1: i32) -> (i32, i32) {
    %c0_i32 = arith.constant 0 : i32
    return %arg0, %arg1 : i32, i32
  }
}

module attributes {stable_mosaic.version = 11 : i64} {
  func.func @_matmul_fused_kernel(%arg0: i32, %arg1: i32, %arg2: memref<64x384xbf16, #tpu.memory_space<vmem>>, %arg3: memref<384x128xbf16, #tpu.memory_space<vmem>>, %arg4: memref<1x128xf32, #tpu.memory_space<vmem>>, %arg5: memref<64x128xbf16, #tpu.memory_space<vmem>>) attributes {dimension_semantics = [#tpu.dimension_semantics<parallel>, #tpu.dimension_semantics<parallel>], iteration_bounds = array<i64: 1, 1>, scalar_prefetch = 0 : i64, scratch_operands = 0 : i64, tpu.core_type = #tpu.core_type<tc>, window_params = [{transform_indices = @transform_0, window_bounds = array<i64: 64, 384>}, {transform_indices = @transform_1, window_bounds = array<i64: 384, 128>}, {transform_indices = @transform_2, window_bounds = array<i64: 1, 128>}, {transform_indices = @transform_3, window_bounds = array<i64: 64, 128>}]} {
    %c0 = arith.constant 0 : index
    %c0_0 = arith.constant 0 : index
    %0 = vector.load %arg2[%c0, %c0_0] : memref<64x384xbf16, #tpu.memory_space<vmem>>, vector<64x384xbf16>
    %c0_1 = arith.constant 0 : index
    %c0_2 = arith.constant 0 : index
    %1 = vector.load %arg3[%c0_1, %c0_2] : memref<384x128xbf16, #tpu.memory_space<vmem>>, vector<384x128xbf16>
    %cst = arith.constant dense<0.000000e+00> : vector<64x128xf32>
    %2 = tpu.matmul %0, %1, %cst {dimension_numbers = #tpu.dot_dimension_numbers<[1], [0], [0], [1], [0, 0, 1, 1], [], []>} : vector<64x384xbf16>, vector<384x128xbf16>, vector<64x128xf32> -> vector<64x128xf32>
    %c0_3 = arith.constant 0 : index
    %c0_4 = arith.constant 0 : index
    %3 = vector.load %arg4[%c0_3, %c0_4] : memref<1x128xf32, #tpu.memory_space<vmem>>, vector<1x128xf32>
    %4 = vector.broadcast %3 : vector<1x128xf32> to vector<64x128xf32>
    %5 = arith.addf %2, %4 : vector<64x128xf32>
    %cst_5 = arith.constant 0.000000e+00 : f32
    %6 = vector.broadcast %cst_5 : f32 to vector<64x128xf32>
    %7 = arith.maximumf %5, %6 : vector<64x128xf32>
    %8 = arith.truncf %7 : vector<64x128xf32> to vector<64x128xbf16>
    %c0_6 = arith.constant 0 : index
    %c0_7 = arith.constant 0 : index
    %9 = vector.load %arg5[%c0_6, %c0_7] : memref<64x128xbf16, #tpu.memory_space<vmem>>, vector<64x128xbf16>
    tpu.vector_store %arg5[%c0_6, %c0_7], %8 {strides = array<i32>} : memref<64x128xbf16, #tpu.memory_space<vmem>>, vector<64x128xbf16>,
    return
  }
  func.func @transform_0(%arg0: i32, %arg1: i32) -> (i32, i32) {
    %c0_i32 = arith.constant 0 : i32
    %c0_i32_0 = arith.constant 0 : i32
    return %arg0, %c0_i32 : i32, i32
  }
  func.func @transform_1(%arg0: i32, %arg1: i32) -> (i32, i32) {
    %c0_i32 = arith.constant 0 : i32
    %c0_i32_0 = arith.constant 0 : i32
    return %c0_i32, %arg1 : i32, i32
  }
  func.func @transform_2(%arg0: i32, %arg1: i32) -> (i32, i32) {
    %c0_i32 = arith.constant 0 : i32
    %c0_i32_0 = arith.constant 0 : i32
    return %c0_i32, %arg1 : i32, i32
  }
  func.func @transform_3(%arg0: i32, %arg1: i32) -> (i32, i32) {
    %c0_i32 = arith.constant 0 : i32
    return %arg0, %arg1 : i32, i32
  }
}

module attributes {stable_mosaic.version = 11 : i64} {
  func.func @_matmul_fused_kernel(%arg0: i32, %arg1: i32, %arg2: memref<64x384xbf16, #tpu.memory_space<vmem>>, %arg3: memref<384x128xbf16, #tpu.memory_space<vmem>>, %arg4: memref<1x128xf32, #tpu.memory_space<vmem>>, %arg5: memref<64x128xbf16, #tpu.memory_space<vmem>>, %arg6: memref<64x128xbf16, #tpu.memory_space<vmem>>) attributes {dimension_semantics = [#tpu.dimension_semantics<parallel>, #tpu.dimension_semantics<parallel>], iteration_bounds = array<i64: 1, 1>, scalar_prefetch = 0 : i64, scratch_operands = 0 : i64, tpu.core_type = #tpu.core_type<tc>, window_params = [{transform_indices = @transform_0, window_bounds = array<i64: 64, 384>}, {transform_indices = @transform_1, window_bounds = array<i64: 384, 128>}, {transform_indices = @transform_2, window_bounds = array<i64: 1, 128>}, {transform_indices = @transform_3, window_bounds = array<i64: 64, 128>}, {transform_indices = @transform_4, window_bounds = array<i64: 64, 128>}]} {
    %c0 = arith.constant 0 : index
    %c0_0 = arith.constant 0 : index
    %0 = vector.load %arg2[%c0, %c0_0] : memref<64x384xbf16, #tpu.memory_space<vmem>>, vector<64x384xbf16>
    %c0_1 = arith.constant 0 : index
    %c0_2 = arith.constant 0 : index
    %1 = vector.load %arg3[%c0_1, %c0_2] : memref<384x128xbf16, #tpu.memory_space<vmem>>, vector<384x128xbf16>
    %cst = arith.constant dense<0.000000e+00> : vector<64x128xf32>
    %2 = tpu.matmul %0, %1, %cst {dimension_numbers = #tpu.dot_dimension_numbers<[1], [0], [0], [1], [0, 0, 1, 1], [], []>} : vector<64x384xbf16>, vector<384x128xbf16>, vector<64x128xf32> -> vector<64x128xf32>
    %c0_3 = arith.constant 0 : index
    %c0_4 = arith.constant 0 : index
    %3 = vector.load %arg4[%c0_3, %c0_4] : memref<1x128xf32, #tpu.memory_space<vmem>>, vector<1x128xf32>
    %4 = vector.broadcast %3 : vector<1x128xf32> to vector<64x128xf32>
    %5 = arith.addf %2, %4 : vector<64x128xf32>
    %c0_5 = arith.constant 0 : index
    %c0_6 = arith.constant 0 : index
    %6 = vector.load %arg5[%c0_5, %c0_6] : memref<64x128xbf16, #tpu.memory_space<vmem>>, vector<64x128xbf16>
    %7 = arith.extf %6 : vector<64x128xbf16> to vector<64x128xf32>
    %8 = arith.addf %5, %7 : vector<64x128xf32>
    %cst_7 = arith.constant 0.000000e+00 : f32
    %9 = vector.broadcast %cst_7 : f32 to vector<64x128xf32>
    %10 = arith.maximumf %8, %9 : vector<64x128xf32>
    %11 = arith.truncf %10 : vector<64x128xf32> to vector<64x128xbf16>
    %c0_8 = arith.constant 0 : index
    %c0_9 = arith.constant 0 : index
    %12 = vector.load %arg6[%c0_8, %c0_9] : memref<64x128xbf16, #tpu.memory_space<vmem>>, vector<64x128xbf16>
    tpu.vector_store %arg6[%c0_8, %c0_9], %11 {strides = array<i32>} : memref<64x128xbf16, #tpu.memory_space<vmem>>, vector<64x128xbf16>,
    return
  }
  func.func @transform_0(%arg0: i32, %arg1: i32) -> (i32, i32) {
    %c0_i32 = arith.constant 0 : i32
    %c0_i32_0 = arith.constant 0 : i32
    return %arg0, %c0_i32 : i32, i32
  }
  func.func @transform_1(%arg0: i32, %arg1: i32) -> (i32, i32) {
    %c0_i32 = arith.constant 0 : i32
    %c0_i32_0 = arith.constant 0 : i32
    return %c0_i32, %arg1 : i32, i32
  }
  func.func @transform_2(%arg0: i32, %arg1: i32) -> (i32, i32) {
    %c0_i32 = arith.constant 0 : i32
    %c0_i32_0 = arith.constant 0 : i32
    return %c0_i32, %arg1 : i32, i32
  }
  func.func @transform_3(%arg0: i32, %arg1: i32) -> (i32, i32) {
    %c0_i32 = arith.constant 0 : i32
    return %arg0, %arg1 : i32, i32
  }
  func.func @transform_4(%arg0: i32, %arg1: i32) -> (i32, i32) {
    %c0_i32 = arith.constant 0 : i32
    return %arg0, %arg1 : i32, i32
  }
}

module attributes {stable_mosaic.version = 11 : i64} {
  func.func @_matmul_fused_kernel(%arg0: i32, %arg1: i32, %arg2: memref<64x640xbf16, #tpu.memory_space<vmem>>, %arg3: memref<640x128xbf16, #tpu.memory_space<vmem>>, %arg4: memref<1x128xf32, #tpu.memory_space<vmem>>, %arg5: memref<64x128xbf16, #tpu.memory_space<vmem>>, %arg6: memref<64x128xbf16, #tpu.memory_space<vmem>>) attributes {dimension_semantics = [#tpu.dimension_semantics<parallel>, #tpu.dimension_semantics<parallel>], iteration_bounds = array<i64: 1, 1>, scalar_prefetch = 0 : i64, scratch_operands = 0 : i64, tpu.core_type = #tpu.core_type<tc>, window_params = [{transform_indices = @transform_0, window_bounds = array<i64: 64, 640>}, {transform_indices = @transform_1, window_bounds = array<i64: 640, 128>}, {transform_indices = @transform_2, window_bounds = array<i64: 1, 128>}, {transform_indices = @transform_3, window_bounds = array<i64: 64, 128>}, {transform_indices = @transform_4, window_bounds = array<i64: 64, 128>}]} {
    %c0 = arith.constant 0 : index
    %c0_0 = arith.constant 0 : index
    %0 = vector.load %arg2[%c0, %c0_0] : memref<64x640xbf16, #tpu.memory_space<vmem>>, vector<64x640xbf16>
    %c0_1 = arith.constant 0 : index
    %c0_2 = arith.constant 0 : index
    %1 = vector.load %arg3[%c0_1, %c0_2] : memref<640x128xbf16, #tpu.memory_space<vmem>>, vector<640x128xbf16>
    %cst = arith.constant dense<0.000000e+00> : vector<64x128xf32>
    %2 = tpu.matmul %0, %1, %cst {dimension_numbers = #tpu.dot_dimension_numbers<[1], [0], [0], [1], [0, 0, 1, 1], [], []>} : vector<64x640xbf16>, vector<640x128xbf16>, vector<64x128xf32> -> vector<64x128xf32>
    %c0_3 = arith.constant 0 : index
    %c0_4 = arith.constant 0 : index
    %3 = vector.load %arg4[%c0_3, %c0_4] : memref<1x128xf32, #tpu.memory_space<vmem>>, vector<1x128xf32>
    %4 = vector.broadcast %3 : vector<1x128xf32> to vector<64x128xf32>
    %5 = arith.addf %2, %4 : vector<64x128xf32>
    %c0_5 = arith.constant 0 : index
    %c0_6 = arith.constant 0 : index
    %6 = vector.load %arg5[%c0_5, %c0_6] : memref<64x128xbf16, #tpu.memory_space<vmem>>, vector<64x128xbf16>
    %7 = arith.extf %6 : vector<64x128xbf16> to vector<64x128xf32>
    %8 = arith.addf %5, %7 : vector<64x128xf32>
    %cst_7 = arith.constant 0.000000e+00 : f32
    %9 = vector.broadcast %cst_7 : f32 to vector<64x128xf32>
    %10 = arith.maximumf %8, %9 : vector<64x128xf32>
    %11 = arith.truncf %10 : vector<64x128xf32> to vector<64x128xbf16>
    %c0_8 = arith.constant 0 : index
    %c0_9 = arith.constant 0 : index
    %12 = vector.load %arg6[%c0_8, %c0_9] : memref<64x128xbf16, #tpu.memory_space<vmem>>, vector<64x128xbf16>
    tpu.vector_store %arg6[%c0_8, %c0_9], %11 {strides = array<i32>} : memref<64x128xbf16, #tpu.memory_space<vmem>>, vector<64x128xbf16>,
    return
  }
  func.func @transform_0(%arg0: i32, %arg1: i32) -> (i32, i32) {
    %c0_i32 = arith.constant 0 : i32
    %c0_i32_0 = arith.constant 0 : i32
    return %arg0, %c0_i32 : i32, i32
  }
  func.func @transform_1(%arg0: i32, %arg1: i32) -> (i32, i32) {
    %c0_i32 = arith.constant 0 : i32
    %c0_i32_0 = arith.constant 0 : i32
    return %c0_i32, %arg1 : i32, i32
  }
  func.func @transform_2(%arg0: i32, %arg1: i32) -> (i32, i32) {
    %c0_i32 = arith.constant 0 : i32
    %c0_i32_0 = arith.constant 0 : i32
    return %c0_i32, %arg1 : i32, i32
  }
  func.func @transform_3(%arg0: i32, %arg1: i32) -> (i32, i32) {
    %c0_i32 = arith.constant 0 : i32
    return %arg0, %arg1 : i32, i32
  }
  func.func @transform_4(%arg0: i32, %arg1: i32) -> (i32, i32) {
    %c0_i32 = arith.constant 0 : i32
    return %arg0, %arg1 : i32, i32
  }
}

module attributes {stable_mosaic.version = 11 : i64} {
  func.func @_matmul_fused_kernel(%arg0: i32, %arg1: i32, %arg2: memref<64x640xbf16, #tpu.memory_space<vmem>>, %arg3: memref<640x128xbf16, #tpu.memory_space<vmem>>, %arg4: memref<1x128xf32, #tpu.memory_space<vmem>>, %arg5: memref<64x128xbf16, #tpu.memory_space<vmem>>) attributes {dimension_semantics = [#tpu.dimension_semantics<parallel>, #tpu.dimension_semantics<parallel>], iteration_bounds = array<i64: 1, 1>, scalar_prefetch = 0 : i64, scratch_operands = 0 : i64, tpu.core_type = #tpu.core_type<tc>, window_params = [{transform_indices = @transform_0, window_bounds = array<i64: 64, 640>}, {transform_indices = @transform_1, window_bounds = array<i64: 640, 128>}, {transform_indices = @transform_2, window_bounds = array<i64: 1, 128>}, {transform_indices = @transform_3, window_bounds = array<i64: 64, 128>}]} {
    %c0 = arith.constant 0 : index
    %c0_0 = arith.constant 0 : index
    %0 = vector.load %arg2[%c0, %c0_0] : memref<64x640xbf16, #tpu.memory_space<vmem>>, vector<64x640xbf16>
    %c0_1 = arith.constant 0 : index
    %c0_2 = arith.constant 0 : index
    %1 = vector.load %arg3[%c0_1, %c0_2] : memref<640x128xbf16, #tpu.memory_space<vmem>>, vector<640x128xbf16>
    %cst = arith.constant dense<0.000000e+00> : vector<64x128xf32>
    %2 = tpu.matmul %0, %1, %cst {dimension_numbers = #tpu.dot_dimension_numbers<[1], [0], [0], [1], [0, 0, 1, 1], [], []>} : vector<64x640xbf16>, vector<640x128xbf16>, vector<64x128xf32> -> vector<64x128xf32>
    %c0_3 = arith.constant 0 : index
    %c0_4 = arith.constant 0 : index
    %3 = vector.load %arg4[%c0_3, %c0_4] : memref<1x128xf32, #tpu.memory_space<vmem>>, vector<1x128xf32>
    %4 = vector.broadcast %3 : vector<1x128xf32> to vector<64x128xf32>
    %5 = arith.addf %2, %4 : vector<64x128xf32>
    %cst_5 = arith.constant 0.000000e+00 : f32
    %6 = vector.broadcast %cst_5 : f32 to vector<64x128xf32>
    %7 = arith.maximumf %5, %6 : vector<64x128xf32>
    %8 = arith.truncf %7 : vector<64x128xf32> to vector<64x128xbf16>
    %c0_6 = arith.constant 0 : index
    %c0_7 = arith.constant 0 : index
    %9 = vector.load %arg5[%c0_6, %c0_7] : memref<64x128xbf16, #tpu.memory_space<vmem>>, vector<64x128xbf16>
    tpu.vector_store %arg5[%c0_6, %c0_7], %8 {strides = array<i32>} : memref<64x128xbf16, #tpu.memory_space<vmem>>, vector<64x128xbf16>,
    return
  }
  func.func @transform_0(%arg0: i32, %arg1: i32) -> (i32, i32) {
    %c0_i32 = arith.constant 0 : i32
    %c0_i32_0 = arith.constant 0 : i32
    return %arg0, %c0_i32 : i32, i32
  }
  func.func @transform_1(%arg0: i32, %arg1: i32) -> (i32, i32) {
    %c0_i32 = arith.constant 0 : i32
    %c0_i32_0 = arith.constant 0 : i32
    return %c0_i32, %arg1 : i32, i32
  }
  func.func @transform_2(%arg0: i32, %arg1: i32) -> (i32, i32) {
    %c0_i32 = arith.constant 0 : i32
    %c0_i32_0 = arith.constant 0 : i32
    return %c0_i32, %arg1 : i32, i32
  }
  func.func @transform_3(%arg0: i32, %arg1: i32) -> (i32, i32) {
    %c0_i32 = arith.constant 0 : i32
    return %arg0, %arg1 : i32, i32
  }
}

module attributes {stable_mosaic.version = 11 : i64} {
  func.func @_gap_relu_kernel(%arg0: i32, %arg1: i32, %arg2: memref<2x1x128xbf16, #tpu.memory_space<vmem>>, %arg3: memref<2x128xbf16, #tpu.memory_space<vmem>>, %arg4: memref<2x128xf32, #tpu.memory_space<vmem>>) attributes {dimension_semantics = [#tpu.dimension_semantics<parallel>, #tpu.dimension_semantics<arbitrary>], iteration_bounds = array<i64: 1, 1>, scalar_prefetch = 0 : i64, scratch_operands = 1 : i64, tpu.core_type = #tpu.core_type<tc>, window_params = [{transform_indices = @transform_0, window_bounds = array<i64: 2, 1, 128>}, {transform_indices = @transform_1, window_bounds = array<i64: 2, 128>}]} {
    %c0_i32 = arith.constant 0 : i32
    %0 = arith.cmpi eq, %arg1, %c0_i32 : i32
    %1 = arith.extui %0 : i1 to i32
    %c0_i32_0 = arith.constant 0 : i32
    %2 = arith.cmpi ne, %1, %c0_i32_0 : i32
    scf.if %2 {
      %cst_9 = arith.constant 0.000000e+00 : f32
      %12 = vector.broadcast %cst_9 : f32 to vector<2x128xf32>
      %c0_10 = arith.constant 0 : index
      %c0_11 = arith.constant 0 : index
      %13 = vector.load %arg4[%c0_10, %c0_11] : memref<2x128xf32, #tpu.memory_space<vmem>>, vector<2x128xf32>
      tpu.vector_store %arg4[%c0_10, %c0_11], %12 {strides = array<i32>} : memref<2x128xf32, #tpu.memory_space<vmem>>, vector<2x128xf32>,
    } else {
    }
    %c0 = arith.constant 0 : index
    %c0_1 = arith.constant 0 : index
    %3 = vector.load %arg4[%c0, %c0_1] : memref<2x128xf32, #tpu.memory_space<vmem>>, vector<2x128xf32>
    %c0_2 = arith.constant 0 : index
    %c0_3 = arith.constant 0 : index
    %c0_4 = arith.constant 0 : index
    %4 = vector.load %arg2[%c0_2, %c0_3, %c0_4] : memref<2x1x128xbf16, #tpu.memory_space<vmem>>, vector<2x1x128xbf16>
    %5 = arith.extf %4 : vector<2x1x128xbf16> to vector<2x1x128xf32>
    %cst = arith.constant dense<0.000000e+00> : vector<2x128xf32>
    %6 = vector.multi_reduction <add>, %5, %cst [1] : vector<2x1x128xf32> to vector<2x128xf32>
    %7 = arith.addf %3, %6 : vector<2x128xf32>
    %c0_5 = arith.constant 0 : index
    %c0_6 = arith.constant 0 : index
    %8 = vector.load %arg4[%c0_5, %c0_6] : memref<2x128xf32, #tpu.memory_space<vmem>>, vector<2x128xf32>
    tpu.vector_store %arg4[%c0_5, %c0_6], %7 {strides = array<i32>} : memref<2x128xf32, #tpu.memory_space<vmem>>, vector<2x128xf32>,
    %c0_i32_7 = arith.constant 0 : i32
    %9 = arith.cmpi eq, %arg1, %c0_i32_7 : i32
    %10 = arith.extui %9 : i1 to i32
    %c0_i32_8 = arith.constant 0 : i32
    %11 = arith.cmpi ne, %10, %c0_i32_8 : i32
    scf.if %11 {
      %c0_9 = arith.constant 0 : index
      %c0_10 = arith.constant 0 : index
      %12 = vector.load %arg4[%c0_9, %c0_10] : memref<2x128xf32, #tpu.memory_space<vmem>>, vector<2x128xf32>
      %cst_11 = arith.constant 1.000000e+00 : f32
      %13 = vector.broadcast %cst_11 : f32 to vector<2x128xf32>
      %14 = arith.mulf %12, %13 : vector<2x128xf32>
      %cst_12 = arith.constant 0.000000e+00 : f32
      %15 = vector.broadcast %cst_12 : f32 to vector<2x128xf32>
      %16 = arith.maximumf %14, %15 : vector<2x128xf32>
      %17 = arith.truncf %16 : vector<2x128xf32> to vector<2x128xbf16>
      %c0_13 = arith.constant 0 : index
      %c0_14 = arith.constant 0 : index
      %18 = vector.load %arg3[%c0_13, %c0_14] : memref<2x128xbf16, #tpu.memory_space<vmem>>, vector<2x128xbf16>
      tpu.vector_store %arg3[%c0_13, %c0_14], %17 {strides = array<i32>} : memref<2x128xbf16, #tpu.memory_space<vmem>>, vector<2x128xbf16>,
    } else {
    }
    return
  }
  func.func @transform_0(%arg0: i32, %arg1: i32) -> (i32, i32, i32) {
    %c0_i32 = arith.constant 0 : i32
    %c0_i32_0 = arith.constant 0 : i32
    return %c0_i32, %arg1, %arg0 : i32, i32, i32
  }
  func.func @transform_1(%arg0: i32, %arg1: i32) -> (i32, i32) {
    %c0_i32 = arith.constant 0 : i32
    %c0_i32_0 = arith.constant 0 : i32
    return %c0_i32, %arg0 : i32, i32
  }
}

module attributes {stable_mosaic.version = 11 : i64} {
  func.func @_matmul_fused_kernel(%arg0: i32, %arg1: i32, %arg2: memref<64x128xbf16, #tpu.memory_space<vmem>>, %arg3: memref<128x128xbf16, #tpu.memory_space<vmem>>, %arg4: memref<1x128xf32, #tpu.memory_space<vmem>>, %arg5: memref<64x128xf32, #tpu.memory_space<vmem>>) attributes {dimension_semantics = [#tpu.dimension_semantics<parallel>, #tpu.dimension_semantics<parallel>], iteration_bounds = array<i64: 1, 2>, scalar_prefetch = 0 : i64, scratch_operands = 0 : i64, tpu.core_type = #tpu.core_type<tc>, window_params = [{transform_indices = @transform_0, window_bounds = array<i64: 64, 128>}, {transform_indices = @transform_1, window_bounds = array<i64: 128, 128>}, {transform_indices = @transform_2, window_bounds = array<i64: 1, 128>}, {transform_indices = @transform_3, window_bounds = array<i64: 64, 128>}]} {
    %c0 = arith.constant 0 : index
    %c0_0 = arith.constant 0 : index
    %0 = vector.load %arg2[%c0, %c0_0] : memref<64x128xbf16, #tpu.memory_space<vmem>>, vector<64x128xbf16>
    %c0_1 = arith.constant 0 : index
    %c0_2 = arith.constant 0 : index
    %1 = vector.load %arg3[%c0_1, %c0_2] : memref<128x128xbf16, #tpu.memory_space<vmem>>, vector<128x128xbf16>
    %cst = arith.constant dense<0.000000e+00> : vector<64x128xf32>
    %2 = tpu.matmul %0, %1, %cst {dimension_numbers = #tpu.dot_dimension_numbers<[1], [0], [0], [1], [0, 0, 1, 1], [], []>} : vector<64x128xbf16>, vector<128x128xbf16>, vector<64x128xf32> -> vector<64x128xf32>
    %c0_3 = arith.constant 0 : index
    %c0_4 = arith.constant 0 : index
    %3 = vector.load %arg4[%c0_3, %c0_4] : memref<1x128xf32, #tpu.memory_space<vmem>>, vector<1x128xf32>
    %4 = vector.broadcast %3 : vector<1x128xf32> to vector<64x128xf32>
    %5 = arith.addf %2, %4 : vector<64x128xf32>
    %c0_5 = arith.constant 0 : index
    %c0_6 = arith.constant 0 : index
    %6 = vector.load %arg5[%c0_5, %c0_6] : memref<64x128xf32, #tpu.memory_space<vmem>>, vector<64x128xf32>
    tpu.vector_store %arg5[%c0_5, %c0_6], %5 {strides = array<i32>} : memref<64x128xf32, #tpu.memory_space<vmem>>, vector<64x128xf32>,
    return
  }
  func.func @transform_0(%arg0: i32, %arg1: i32) -> (i32, i32) {
    %c0_i32 = arith.constant 0 : i32
    %c0_i32_0 = arith.constant 0 : i32
    return %arg0, %c0_i32 : i32, i32
  }
  func.func @transform_1(%arg0: i32, %arg1: i32) -> (i32, i32) {
    %c0_i32 = arith.constant 0 : i32
    %c0_i32_0 = arith.constant 0 : i32
    return %c0_i32, %arg1 : i32, i32
  }
  func.func @transform_2(%arg0: i32, %arg1: i32) -> (i32, i32) {
    %c0_i32 = arith.constant 0 : i32
    %c0_i32_0 = arith.constant 0 : i32
    return %c0_i32, %arg1 : i32, i32
  }
  func.func @transform_3(%arg0: i32, %arg1: i32) -> (i32, i32) {
    %c0_i32 = arith.constant 0 : i32
    return %arg0, %arg1 : i32, i32
  }
}

module attributes {stable_mosaic.version = 11 : i64} {
  func.func @_matmul_fused_kernel(%arg0: i32, %arg1: i32, %arg2: memref<64x128xbf16, #tpu.memory_space<vmem>>, %arg3: memref<128x128xbf16, #tpu.memory_space<vmem>>, %arg4: memref<1x128xf32, #tpu.memory_space<vmem>>, %arg5: memref<64x128xf32, #tpu.memory_space<vmem>>) attributes {dimension_semantics = [#tpu.dimension_semantics<parallel>, #tpu.dimension_semantics<parallel>], iteration_bounds = array<i64: 1, 1>, scalar_prefetch = 0 : i64, scratch_operands = 0 : i64, tpu.core_type = #tpu.core_type<tc>, window_params = [{transform_indices = @transform_0, window_bounds = array<i64: 64, 128>}, {transform_indices = @transform_1, window_bounds = array<i64: 128, 128>}, {transform_indices = @transform_2, window_bounds = array<i64: 1, 128>}, {transform_indices = @transform_3, window_bounds = array<i64: 64, 128>}]} {
    %c0 = arith.constant 0 : index
    %c0_0 = arith.constant 0 : index
    %0 = vector.load %arg2[%c0, %c0_0] : memref<64x128xbf16, #tpu.memory_space<vmem>>, vector<64x128xbf16>
    %c0_1 = arith.constant 0 : index
    %c0_2 = arith.constant 0 : index
    %1 = vector.load %arg3[%c0_1, %c0_2] : memref<128x128xbf16, #tpu.memory_space<vmem>>, vector<128x128xbf16>
    %cst = arith.constant dense<0.000000e+00> : vector<64x128xf32>
    %2 = tpu.matmul %0, %1, %cst {dimension_numbers = #tpu.dot_dimension_numbers<[1], [0], [0], [1], [0, 0, 1, 1], [], []>} : vector<64x128xbf16>, vector<128x128xbf16>, vector<64x128xf32> -> vector<64x128xf32>
    %c0_3 = arith.constant 0 : index
    %c0_4 = arith.constant 0 : index
    %3 = vector.load %arg4[%c0_3, %c0_4] : memref<1x128xf32, #tpu.memory_space<vmem>>, vector<1x128xf32>
    %4 = vector.broadcast %3 : vector<1x128xf32> to vector<64x128xf32>
    %5 = arith.addf %2, %4 : vector<64x128xf32>
    %c0_5 = arith.constant 0 : index
    %c0_6 = arith.constant 0 : index
    %6 = vector.load %arg5[%c0_5, %c0_6] : memref<64x128xf32, #tpu.memory_space<vmem>>, vector<64x128xf32>
    tpu.vector_store %arg5[%c0_5, %c0_6], %5 {strides = array<i32>} : memref<64x128xf32, #tpu.memory_space<vmem>>, vector<64x128xf32>,
    return
  }
  func.func @transform_0(%arg0: i32, %arg1: i32) -> (i32, i32) {
    %c0_i32 = arith.constant 0 : i32
    %c0_i32_0 = arith.constant 0 : i32
    return %arg0, %c0_i32 : i32, i32
  }
  func.func @transform_1(%arg0: i32, %arg1: i32) -> (i32, i32) {
    %c0_i32 = arith.constant 0 : i32
    %c0_i32_0 = arith.constant 0 : i32
    return %c0_i32, %arg1 : i32, i32
  }
  func.func @transform_2(%arg0: i32, %arg1: i32) -> (i32, i32) {
    %c0_i32 = arith.constant 0 : i32
    %c0_i32_0 = arith.constant 0 : i32
    return %c0_i32, %arg1 : i32, i32
  }
  func.func @transform_3(%arg0: i32, %arg1: i32) -> (i32, i32) {
    %c0_i32 = arith.constant 0 : i32
    return %arg0, %arg1 : i32, i32
  }
}

</mosaic_0001>

<bundles_post_ra>
// kernel: _lambda_.23
= control target key start
LH: loop header
LB: loop body
LE: loop exit
PB: predicated region body
PF: predicated region fallthrough
CT: control target
= control target key end

     0   :  { %s858_s12 = smov 0   ;;  %s860_s13 = smov 0   ;;  %s956_s0 = inlined_call_operand.vmem [shape: bf16[128,256], index: 0, kind: input, shape index: {}]   ;;  %s957_s1 = inlined_call_operand.vmem [shape: bf16[256,128], index: 1, kind: input, shape index: {}]   ;;  %s958_s2 = inlined_call_operand.vmem [shape: f32[1,128], index: 2, kind: input, shape index: {}]   ;;  %s959_s3 = inlined_call_operand.vmem [shape: bf16[128,128], index: 3, kind: output, shape index: {}]  }
   0x1   :  { %s862_s14 = smov 0  }
   0x2 LB: > { %s25_s15 = sadd.s32 1, %s832_s13  ;;  %p633_p0 = scmp.ge.s32.totalorder %s836_s14, 1  ;;  %s836_s14 = sphi %s862_s14, %s13_s14   ;;  %s832_s13 = sphi %s860_s13, %s961_s13   ;;  %s828_s12 = sphi %s858_s12, %s960_s12  }
   0x3   : > { %p27_p1 = scmp.ge.s32.totalorder %s25_s15, 2  ;;  %p170_p2 = scmp.lt.s32.totalorder %s836_s14, 3 }
   0x5   : > { %s963_s15 = smov (%p27_p1, %s25_s15), 0  ;;  %p171_p3 = pnand %p633_p0, %p170_p2 }
   0x6   : > { %v786_v0 = vld [vmem:[%s957_s1 + $0x40] sm:$0xff] (!%p171_p3)   ;;  %s634_s18 = sshll.u32 (!%p171_p3), %s828_s12, 3  ;;  %v788_v2 = vld [vmem:[%s957_s1 + $0x48] sm:$0xff] (!%p171_p3)   ;;  %v790_v4 = vld [vmem:[%s957_s1 + $0x50] sm:$0xff] (!%p171_p3)  }
   0x7   : > { %174 = sbr.rel (%p171_p3) target bundleno = 272 (0x110), region = 32  ;;  %v787_v1 = vld [vmem:[%s957_s1] sm:$0xff] (!%p171_p3)   ;;  %706 = vmatprep.subr.bf16.mxu0 (!%p171_p3), %v786_v0  ;;  %746 = vmatprep.subr.bf16.mxu1 (!%p171_p3), %v786_v0  ;;  %v789_v3 = vld [vmem:[%s957_s1 + $0x8] sm:$0xff] (!%p171_p3)   ;;  %p206_p4 = scmp.lt.s32.totalorder (!%p171_p3), %s634_s18, 15  ;;  %v791_v5 = vld [vmem:[%s957_s1 + $0x10] sm:$0xff] (!%p171_p3)  }
   0x8   : > { %707 = vmatpush3.bf16.msra.mxu0 (!%p171_p3), %v787_v1  ;;  %754 = vmatpush3.bf16.msra.mxu1 (!%p171_p3), %v787_v1  ;;  %v792_v6 = vld [vmem:[%s957_s1 + $0x58] sm:$0xff] (!%p171_p3)   ;;  %v794_v8 = vld [vmem:[%s957_s1 + $0x60] sm:$0xff] (!%p171_p3)   ;;  %v796_v10 = vld [vmem:[%s957_s1 + $0x68] sm:$0xff] (!%p171_p3)  }
   0x9   : > { %708 = vmatprep.subr.bf16.mxu0 (!%p171_p3), %v788_v2  ;;  %747 = vmatprep.subr.bf16.mxu1 (!%p171_p3), %v788_v2  ;;  %v793_v7 = vld [vmem:[%s957_s1 + $0x18] sm:$0xff] (!%p171_p3)   ;;  %v795_v9 = vld [vmem:[%s957_s1 + $0x20] sm:$0xff] (!%p171_p3)   ;;  %v797_v13 = vld [vmem:[%s957_s1 + $0x28] sm:$0xff] (!%p171_p3)  }
   0xa   : > { %v798_v14 = vld [vmem:[%s957_s1 + $0x70] sm:$0xff] (!%p171_p3)   ;;  %v800_v16 = vld [vmem:[%s957_s1 + $0x78] sm:$0xff] (!%p171_p3)   ;;  %v639_v26 = vld [vmem:[%s958_s2] ss:$0 sm:$0xff] (!%p171_p3) }
   0xb   : > { %v799_v15 = vld [vmem:[%s957_s1 + $0x30] sm:$0xff] (!%p171_p3)   ;;  %v801_v17 = vld [vmem:[%s957_s1 + $0x38] sm:$0xff] (!%p171_p3)  }
   0xc   : > { %709 = vmatpush3.bf16.msra.mxu0 (!%p171_p3), %v789_v3  ;;  %755 = vmatpush3.bf16.msra.mxu1 (!%p171_p3), %v789_v3 }
   0xd   : > { %710 = vmatprep.subr.bf16.mxu0 (!%p171_p3), %v790_v4  ;;  %748 = vmatprep.subr.bf16.mxu1 (!%p171_p3), %v790_v4 }
   0xe   : > { %s965_s18 = smov (!%p206_p4, %s634_s18), 15 }
   0xf   : > { %s674_s6 = sshll.u32 %s965_s18, 3  ;;  %s638_s5 = sshll.u32 %s965_s18, 2 }
  0x10   : > { %711 = vmatpush3.bf16.msra.mxu0 %v791_v5  ;;  %756 = vmatpush3.bf16.msra.mxu1 %v791_v5  ;;  %s909_s11 = scalar_lea.vmem %s956_s0, %s674_s6  ;;  %s226_s8 = scalar_lea.vmem %s959_s3, %s638_s5 }
  0x11   : > { %712 = vmatprep.subr.bf16.mxu0 %v792_v6  ;;  %749 = vmatprep.subr.bf16.mxu1 %v792_v6  ;;  %v804_v11 = vld [vmem:[%s909_s11 + $0x4] ss:$8 sps:$4 sm:$0xff]   ;;  %v802_v18 = vld [vmem:[%s909_s11] ss:$8 sps:$4 sm:$0xff]   ;;  %v808_v20 = vld [vmem:[%s909_s11 + $0x14] ss:$8 sps:$4 sm:$0xff]  }
  0x12   : > { %v807_v12 = vld [vmem:[%s909_s11 + $0x24] ss:$8 sps:$4 sm:$0xff]   ;;  %444 = vmatprep.mubr.bf16.mxu0 %v804_v11  ;;  %v805_v19 = vld [vmem:[%s909_s11 + $0x20] ss:$8 sps:$4 sm:$0xff]   ;;  %v810_v21 = vld [vmem:[%s909_s11 + $0x34] ss:$8 sps:$4 sm:$0xff]  }
  0x13   : > { %460 = vmatprep.mubr.bf16.mxu1 %v807_v12  ;;  %v812_v22 = vld [vmem:[%s909_s11 + $0x10] ss:$8 sps:$4 sm:$0xff]  }
  0x14   : > { %713 = vmatpush3.bf16.msra.mxu0 %v793_v7  ;;  %757 = vmatpush3.bf16.msra.mxu1 %v793_v7  ;;  %v813_v23 = vld [vmem:[%s909_s11 + $0x30] ss:$8 sps:$4 sm:$0xff]  }
  0x15   : > { %714 = vmatprep.subr.bf16.mxu0 %v794_v8  ;;  %750 = vmatprep.subr.bf16.mxu1 %v794_v8 }
  0x18   : > { %715 = vmatpush3.bf16.msra.mxu0 %v795_v9  ;;  %758 = vmatpush3.bf16.msra.mxu1 %v795_v9 }
  0x19   : > { %716 = vmatprep.subr.bf16.mxu0 %v796_v10  ;;  %751 = vmatprep.subr.bf16.mxu1 %v796_v10 }
  0x1c   : > { %717 = vmatpush3.bf16.msra.mxu0 %v797_v13  ;;  %759 = vmatpush3.bf16.msra.mxu1 %v797_v13 }
  0x1d   : > { %718 = vmatprep.subr.bf16.mxu0 %v798_v14  ;;  %752 = vmatprep.subr.bf16.mxu1 %v798_v14 }
  0x20   : > { %719 = vmatpush3.bf16.msra.mxu0 %v799_v15  ;;  %760 = vmatpush3.bf16.msra.mxu1 %v799_v15 }
  0x21   : > { %720 = vmatprep.subr.bf16.mxu0 %v800_v16  ;;  %753 = vmatprep.subr.bf16.mxu1 %v800_v16 }
  0x24   : > { %721 = vmatpush3.bf16.msra.mxu0 %v801_v17  ;;  %761 = vmatpush3.bf16.msra.mxu1 %v801_v17 }
  0x27   : > { %445 = vmatmul.mubr.bf16.vlgmr.msra.gmra.mrb[0].mxu0 %v802_v18  ;;  %461 = vmatmul.mubr.bf16.vlgmr.msra.gmra.mrb[0].mxu1 %v805_v19 }
  0x28   : > { %452 = vmatprep.mubr.bf16.mxu0 %v808_v20  ;;  %468 = vmatprep.mubr.bf16.mxu1 %v810_v21 }
  0x2f   : > { %453 = vmatmul.mubr.bf16.gmra.mrb[4].mxu0 %v812_v22  ;;  %469 = vmatmul.mubr.bf16.gmra.mrb[4].mxu1 %v813_v23 }
  0xfa   : > { %v722_v24 = vpop.f32.mrb[0].mxu0  ;;  %v734_v25 = vpop.f32.mrb[0].mxu1 }
  0xfb   : > { %v723_v27 = vpop.f32.mrb[1].mxu0  ;;  %v735_v28 = vpop.f32.mrb[1].mxu1 }
  0xfc   : > { %v724_v29 = vadd.f32 %v723_v27, %v722_v24  ;;  %v736_v30 = vadd.f32 %v735_v28, %v734_v25  ;;  %v725_v31 = vpop.f32.mrb[2].mxu0  ;;  %v737_v32 = vpop.f32.mrb[2].mxu1 }
  0xfd   : > { %v726_v33 = vpop.f32.mrb[3].mxu0  ;;  %v738_v34 = vpop.f32.mrb[3].mxu1 }
  0xfe   : > { %v447_v35 = vadd.f32 %v724_v29, %v639_v26  ;;  %v463_v36 = vadd.f32 %v736_v30, %v639_v26  ;;  %v727_v37 = vadd.f32 %v726_v33, %v725_v31  ;;  %v739_v38 = vadd.f32 %v738_v34, %v737_v32 }
 0x100   : > { %v450_v39 = vadd.f32 %v727_v37, %v639_v26  ;;  %v466_v40 = vadd.f32 %v739_v38, %v639_v26  ;;  %v477_v41 = vmax.f32 %v447_v35, 0.0  ;;  %v481_v42 = vmax.f32 %v463_v36, 0.0 }
 0x102   : > { %v478_v43 = vmax.f32 %v450_v39, 0.0  ;;  %v482_v44 = vmax.f32 %v466_v40, 0.0  ;;  %v728_v45 = vpop.f32.mrb[4].mxu0  ;;  %v740_v46 = vpop.f32.mrb[4].mxu1 }
 0x103   : > { %v729_v47 = vpop.f32.mrb[5].mxu0  ;;  %v741_v48 = vpop.f32.mrb[5].mxu1 }
 0x104   : > { %v686_v49 = vpack.c.bf16 %v478_v43, %v477_v41  ;;  %v696_v50 = vpack.c.bf16 %v482_v44, %v481_v42  ;;  %v730_v51 = vadd.f32 %v729_v47, %v728_v45  ;;  %v742_v52 = vadd.f32 %v741_v48, %v740_v46  ;;  %v731_v53 = vpop.f32.mrb[6].mxu0  ;;  %v743_v54 = vpop.f32.mrb[6].mxu1 }
 0x105   : > { %v732_v55 = vpop.f32.mrb[7].mxu0  ;;  %v744_v56 = vpop.f32.mrb[7].mxu1 }
 0x106   : > { %687 = vst [vmem:[%s226_s8] sm:$0xff] %v686_v49   ;;  %704 = vst [vmem:[%s226_s8 + $0x10] sm:$0xff] %v696_v50   ;;  %v455_v57 = vadd.f32 %v730_v51, %v639_v26  ;;  %v471_v58 = vadd.f32 %v742_v52, %v639_v26  ;;  %v733_v59 = vadd.f32 %v732_v55, %v731_v53 }
 0x107   : > { %v745_v60 = vadd.f32 %v744_v56, %v743_v54 }
 0x108   : > { %v458_v61 = vadd.f32 %v733_v59, %v639_v26  ;;  %v479_v63 = vmax.f32 %v455_v57, 0.0  ;;  %v483_v0 = vmax.f32 %v471_v58, 0.0 }
 0x109   : > { %v474_v62 = vadd.f32 %v745_v60, %v639_v26 }
 0x10a   : > { %v480_v1 = vmax.f32 %v458_v61, 0.0 }
 0x10b   : > { %v484_v2 = vmax.f32 %v474_v62, 0.0 }
 0x10c   : > { %v691_v3 = vpack.c.bf16 %v480_v1, %v479_v63 }
 0x10d   : > { %v701_v4 = vpack.c.bf16 %v484_v2, %v483_v0 }
 0x10e   : > { %703 = vst [vmem:[%s226_s8 + $0x8] sm:$0xff] %v691_v3  }
 0x10f   : > { %705 = vst [vmem:[%s226_s8 + $0x18] sm:$0xff] %v701_v4  }
 0x110 PF: > { %s13_s14 = sadd.s32 1, %s836_s14   ;;  %s960_s12 = smov %s832_s13 }
 0x111   : > { %p10_p5 = scmp.ge.s32.totalorder %s13_s14, 4   ;;  %s961_s13 = smov %s963_s15 }
 0x113   :  { %12 = sbr.rel (!%p10_p5) target bundleno = 2 (0x2), region = 68 }

// kernel: _lambda_.24
= control target key start
LH: loop header
LB: loop body
LE: loop exit
PB: predicated region body
PF: predicated region fallthrough
CT: control target
= control target key end

     0   :  { %s422_s1 = inlined_call_operand.vmem [shape: bf16[128,128], index: 1, kind: input, shape index: {}]   ;;  %s423_s0 = inlined_call_operand.vmem [shape: bf16[64,128], index: 0, kind: input, shape index: {}]   ;;  %s424_s2 = inlined_call_operand.vmem [shape: f32[1,128], index: 2, kind: input, shape index: {}]   ;;  %s425_s3 = inlined_call_operand.vmem [shape: bf16[64,128], index: 3, kind: output, shape index: {}]  }
   0x1   :  { %v339_v0 = vld [vmem:[%s422_s1] sm:$0xff]   ;;  %v340_v1 = vld [vmem:[%s422_s1 + $0x8] sm:$0xff]   ;;  %v341_v2 = vld [vmem:[%s422_s1 + $0x10] sm:$0xff]  }
   0x2   :  { %299 = vmatprep.subr.bf16.mxu0 %v339_v0  ;;  %323 = vmatprep.subr.bf16.mxu1 %v339_v0  ;;  %v342_v3 = vld [vmem:[%s422_s1 + $0x18] sm:$0xff]   ;;  %v347_v4 = vld [vmem:[%s423_s0] sm:$0xff]   ;;  %v348_v5 = vld [vmem:[%s423_s0 + $0x10] sm:$0xff]  }
   0x3   :  { %300 = vmatpush3.bf16.msra.mxu0 %v339_v0  ;;  %331 = vmatpush3.bf16.msra.mxu1 %v339_v0  ;;  %v343_v6 = vld [vmem:[%s422_s1 + $0x20] sm:$0xff]   ;;  %v344_v7 = vld [vmem:[%s422_s1 + $0x28] sm:$0xff]   ;;  %v345_v8 = vld [vmem:[%s422_s1 + $0x30] sm:$0xff]  }
   0x4   :  { %301 = vmatprep.subr.bf16.mxu0 %v340_v1  ;;  %324 = vmatprep.subr.bf16.mxu1 %v340_v1  ;;  %v346_v9 = vld [vmem:[%s422_s1 + $0x38] sm:$0xff]   ;;  %v349_v10 = vld [vmem:[%s423_s0 + $0x8] sm:$0xff]   ;;  %v235_v12 = vld [vmem:[%s424_s2] ss:$0 sm:$0xff] }
   0x5   :  { %315 = vmatprep.mubr.bf16.mxu0 %v347_v4  ;;  %319 = vmatprep.mubr.bf16.mxu1 %v348_v5  ;;  %v350_v11 = vld [vmem:[%s423_s0 + $0x18] sm:$0xff]  }
   0x7   :  { %302 = vmatpush3.bf16.msra.mxu0 %v340_v1  ;;  %332 = vmatpush3.bf16.msra.mxu1 %v340_v1 }
   0x8   :  { %303 = vmatprep.subr.bf16.mxu0 %v341_v2  ;;  %325 = vmatprep.subr.bf16.mxu1 %v341_v2 }
   0xb   :  { %304 = vmatpush3.bf16.msra.mxu0 %v341_v2  ;;  %333 = vmatpush3.bf16.msra.mxu1 %v341_v2 }
   0xc   :  { %305 = vmatprep.subr.bf16.mxu0 %v342_v3  ;;  %326 = vmatprep.subr.bf16.mxu1 %v342_v3 }
   0xf   :  { %306 = vmatpush3.bf16.msra.mxu0 %v342_v3  ;;  %334 = vmatpush3.bf16.msra.mxu1 %v342_v3 }
  0x10   :  { %307 = vmatprep.subr.bf16.mxu0 %v343_v6  ;;  %327 = vmatprep.subr.bf16.mxu1 %v343_v6 }
  0x13   :  { %308 = vmatpush3.bf16.msra.mxu0 %v343_v6  ;;  %335 = vmatpush3.bf16.msra.mxu1 %v343_v6 }
  0x14   :  { %309 = vmatprep.subr.bf16.mxu0 %v344_v7  ;;  %328 = vmatprep.subr.bf16.mxu1 %v344_v7 }
  0x17   :  { %310 = vmatpush3.bf16.msra.mxu0 %v344_v7  ;;  %336 = vmatpush3.bf16.msra.mxu1 %v344_v7 }
  0x18   :  { %311 = vmatprep.subr.bf16.mxu0 %v345_v8  ;;  %329 = vmatprep.subr.bf16.mxu1 %v345_v8 }
  0x1b   :  { %312 = vmatpush3.bf16.msra.mxu0 %v345_v8  ;;  %337 = vmatpush3.bf16.msra.mxu1 %v345_v8 }
  0x1c   :  { %313 = vmatprep.subr.bf16.mxu0 %v346_v9  ;;  %330 = vmatprep.subr.bf16.mxu1 %v346_v9 }
  0x1f   :  { %314 = vmatpush3.bf16.msra.mxu0 %v346_v9  ;;  %338 = vmatpush3.bf16.msra.mxu1 %v346_v9 }
  0x22   :  { %316 = vmatmul.mubr.bf16.vlgmr.msra.gmra.mrb[0].mxu0 %v349_v10  ;;  %320 = vmatmul.mubr.bf16.vlgmr.msra.gmra.mrb[0].mxu1 %v350_v11 }
  0xf5   :  { %v317_v13 = vpop.f32.mrb[0].mxu0  ;;  %v321_v14 = vpop.f32.mrb[0].mxu1 }
  0xf6   :  { %v161_v15 = vadd.f32 %v317_v13, %v235_v12  ;;  %v177_v16 = vadd.f32 %v321_v14, %v235_v12  ;;  %v152_v17 = vpop.f32.mrb[1].mxu0  ;;  %v168_v18 = vpop.f32.mrb[1].mxu1 }
  0xf7   :  { %v153_v19 = vadd.f32 %v235_v12, %v152_v17  ;;  %v169_v20 = vadd.f32 %v235_v12, %v168_v18  ;;  %v318_v21 = vpop.f32.mrb[2].mxu0  ;;  %v322_v22 = vpop.f32.mrb[2].mxu1 }
  0xf8   :  { %v164_v23 = vadd.f32 %v318_v21, %v235_v12  ;;  %v180_v24 = vadd.f32 %v322_v22, %v235_v12  ;;  %v155_v25 = vpop.f32.mrb[3].mxu0  ;;  %v171_v26 = vpop.f32.mrb[3].mxu1  ;;  %v185_v29 = vmax.f32 %v161_v15, 0.0  ;;  %v189_v30 = vmax.f32 %v177_v16, 0.0 }
  0xf9   :  { %v156_v27 = vadd.f32 %v235_v12, %v155_v25  ;;  %v172_v28 = vadd.f32 %v235_v12, %v171_v26  ;;  %v183_v33 = vmax.f32 %v153_v19, 0.0  ;;  %v187_v34 = vmax.f32 %v169_v20, 0.0 }
  0xfa   :  { %v186_v31 = vmax.f32 %v164_v23, 0.0  ;;  %v190_v32 = vmax.f32 %v180_v24, 0.0 }
  0xfb   :  { %v184_v35 = vmax.f32 %v156_v27, 0.0  ;;  %v188_v36 = vmax.f32 %v172_v28, 0.0 }
  0xfc   :  { %v272_v37 = vpack.c.bf16 %v186_v31, %v185_v29  ;;  %v282_v38 = vpack.c.bf16 %v190_v32, %v189_v30 }
  0xfd   :  { %v267_v39 = vpack.c.bf16 %v184_v35, %v183_v33  ;;  %v277_v40 = vpack.c.bf16 %v188_v36, %v187_v34 }
  0xfe   :  { %284 = vst [vmem:[%s425_s3 + $0x8] sm:$0xff] %v272_v37   ;;  %286 = vst [vmem:[%s425_s3 + $0x18] sm:$0xff] %v282_v38  }
  0xff   :  { %268 = vst [vmem:[%s425_s3] sm:$0xff] %v267_v39   ;;  %285 = vst [vmem:[%s425_s3 + $0x10] sm:$0xff] %v277_v40  }

// kernel: _lambda_.25
= control target key start
LH: loop header
LB: loop body
LE: loop exit
PB: predicated region body
PF: predicated region fallthrough
CT: control target
= control target key end

     0   :  { %s485_s1 = inlined_call_operand.vmem [shape: bf16[128,128], index: 1, kind: input, shape index: {}]   ;;  %s486_s0 = inlined_call_operand.vmem [shape: bf16[64,128], index: 0, kind: input, shape index: {}]   ;;  %s487_s3 = inlined_call_operand.vmem [shape: bf16[64,128], index: 3, kind: input, shape index: {}]   ;;  %s488_s2 = inlined_call_operand.vmem [shape: f32[1,128], index: 2, kind: input, shape index: {}]   ;;  %s489_s4 = inlined_call_operand.vmem [shape: bf16[64,128], index: 4, kind: output, shape index: {}]  }
   0x1   :  { %v385_v0 = vld [vmem:[%s485_s1] sm:$0xff]   ;;  %v386_v1 = vld [vmem:[%s485_s1 + $0x8] sm:$0xff]   ;;  %v387_v2 = vld [vmem:[%s485_s1 + $0x10] sm:$0xff]  }
   0x2   :  { %345 = vmatprep.subr.bf16.mxu0 %v385_v0  ;;  %369 = vmatprep.subr.bf16.mxu1 %v385_v0  ;;  %v388_v3 = vld [vmem:[%s485_s1 + $0x18] sm:$0xff]   ;;  %v393_v4 = vld [vmem:[%s486_s0] sm:$0xff]   ;;  %v394_v5 = vld [vmem:[%s486_s0 + $0x10] sm:$0xff]  }
   0x3   :  { %346 = vmatpush3.bf16.msra.mxu0 %v385_v0  ;;  %377 = vmatpush3.bf16.msra.mxu1 %v385_v0  ;;  %v389_v6 = vld [vmem:[%s485_s1 + $0x20] sm:$0xff]   ;;  %v390_v7 = vld [vmem:[%s485_s1 + $0x28] sm:$0xff]   ;;  %v391_v8 = vld [vmem:[%s485_s1 + $0x30] sm:$0xff]  }
   0x4   :  { %347 = vmatprep.subr.bf16.mxu0 %v386_v1  ;;  %370 = vmatprep.subr.bf16.mxu1 %v386_v1  ;;  %v392_v9 = vld [vmem:[%s485_s1 + $0x38] sm:$0xff]   ;;  %v395_v10 = vld [vmem:[%s486_s0 + $0x8] sm:$0xff]   ;;  %v292_v14 = vld [vmem:[%s487_s3] sm:$0xff]  }
   0x5   :  { %361 = vmatprep.mubr.bf16.mxu0 %v393_v4  ;;  %365 = vmatprep.mubr.bf16.mxu1 %v394_v5  ;;  %v396_v11 = vld [vmem:[%s486_s0 + $0x18] sm:$0xff]   ;;  %v327_v12 = vld [vmem:[%s487_s3 + $0x8] sm:$0xff]   ;;  %v328_v15 = vld [vmem:[%s487_s3 + $0x10] sm:$0xff]   ;;  %v293_v21 = vunpack.c.l.bf16 %v292_v14  ;;  %v294_v33 = vunpack.c.h.bf16 %v292_v14 }
   0x6   :  { %v329_v13 = vld [vmem:[%s487_s3 + $0x18] sm:$0xff]   ;;  %v262_v16 = vld [vmem:[%s488_s2] ss:$0 sm:$0xff]  ;;  %v297_v17 = vunpack.c.l.bf16 %v327_v12  ;;  %v301_v22 = vunpack.c.l.bf16 %v328_v15  ;;  %v298_v27 = vunpack.c.h.bf16 %v327_v12  ;;  %v302_v34 = vunpack.c.h.bf16 %v328_v15 }
   0x7   :  { %348 = vmatpush3.bf16.msra.mxu0 %v386_v1  ;;  %378 = vmatpush3.bf16.msra.mxu1 %v386_v1  ;;  %v305_v18 = vunpack.c.l.bf16 %v329_v13  ;;  %v306_v28 = vunpack.c.h.bf16 %v329_v13 }
   0x8   :  { %349 = vmatprep.subr.bf16.mxu0 %v387_v2  ;;  %371 = vmatprep.subr.bf16.mxu1 %v387_v2 }
   0xb   :  { %350 = vmatpush3.bf16.msra.mxu0 %v387_v2  ;;  %379 = vmatpush3.bf16.msra.mxu1 %v387_v2 }
   0xc   :  { %351 = vmatprep.subr.bf16.mxu0 %v388_v3  ;;  %372 = vmatprep.subr.bf16.mxu1 %v388_v3 }
   0xf   :  { %352 = vmatpush3.bf16.msra.mxu0 %v388_v3  ;;  %380 = vmatpush3.bf16.msra.mxu1 %v388_v3 }
  0x10   :  { %353 = vmatprep.subr.bf16.mxu0 %v389_v6  ;;  %373 = vmatprep.subr.bf16.mxu1 %v389_v6 }
  0x13   :  { %354 = vmatpush3.bf16.msra.mxu0 %v389_v6  ;;  %381 = vmatpush3.bf16.msra.mxu1 %v389_v6 }
  0x14   :  { %355 = vmatprep.subr.bf16.mxu0 %v390_v7  ;;  %374 = vmatprep.subr.bf16.mxu1 %v390_v7 }
  0x17   :  { %356 = vmatpush3.bf16.msra.mxu0 %v390_v7  ;;  %382 = vmatpush3.bf16.msra.mxu1 %v390_v7 }
  0x18   :  { %357 = vmatprep.subr.bf16.mxu0 %v391_v8  ;;  %375 = vmatprep.subr.bf16.mxu1 %v391_v8 }
  0x1b   :  { %358 = vmatpush3.bf16.msra.mxu0 %v391_v8  ;;  %383 = vmatpush3.bf16.msra.mxu1 %v391_v8 }
  0x1c   :  { %359 = vmatprep.subr.bf16.mxu0 %v392_v9  ;;  %376 = vmatprep.subr.bf16.mxu1 %v392_v9 }
  0x1f   :  { %360 = vmatpush3.bf16.msra.mxu0 %v392_v9  ;;  %384 = vmatpush3.bf16.msra.mxu1 %v392_v9 }
  0x22   :  { %362 = vmatmul.mubr.bf16.vlgmr.msra.gmra.mrb[0].mxu0 %v395_v10  ;;  %366 = vmatmul.mubr.bf16.vlgmr.msra.gmra.mrb[0].mxu1 %v396_v11 }
  0xf5   :  { %v363_v19 = vpop.f32.mrb[0].mxu0  ;;  %v367_v20 = vpop.f32.mrb[0].mxu1 }
  0xf6   :  { %v164_v23 = vadd.f32 %v363_v19, %v262_v16  ;;  %v180_v24 = vadd.f32 %v367_v20, %v262_v16  ;;  %v155_v25 = vpop.f32.mrb[1].mxu0  ;;  %v171_v26 = vpop.f32.mrb[1].mxu1 }
  0xf7   :  { %v156_v29 = vadd.f32 %v262_v16, %v155_v25  ;;  %v172_v30 = vadd.f32 %v262_v16, %v171_v26  ;;  %v364_v31 = vpop.f32.mrb[2].mxu0  ;;  %v368_v32 = vpop.f32.mrb[2].mxu1 }
  0xf8   :  { %v204_v35 = vadd.f32 %v297_v17, %v164_v23  ;;  %v208_v36 = vadd.f32 %v305_v18, %v180_v24  ;;  %v167_v37 = vadd.f32 %v364_v31, %v262_v16  ;;  %v183_v38 = vadd.f32 %v368_v32, %v262_v16  ;;  %v158_v39 = vpop.f32.mrb[3].mxu0  ;;  %v174_v40 = vpop.f32.mrb[3].mxu1 }
  0xf9   :  { %v202_v41 = vadd.f32 %v293_v21, %v156_v29  ;;  %v206_v42 = vadd.f32 %v301_v22, %v172_v30  ;;  %v159_v43 = vadd.f32 %v262_v16, %v158_v39  ;;  %v175_v44 = vadd.f32 %v262_v16, %v174_v40 }
  0xfa   :  { %v205_v45 = vadd.f32 %v298_v27, %v167_v37  ;;  %v209_v46 = vadd.f32 %v306_v28, %v183_v38  ;;  %v212_v49 = vmax.f32 %v204_v35, 0.0  ;;  %v216_v50 = vmax.f32 %v208_v36, 0.0 }
  0xfb   :  { %v203_v47 = vadd.f32 %v294_v33, %v159_v43  ;;  %v207_v48 = vadd.f32 %v302_v34, %v175_v44  ;;  %v210_v53 = vmax.f32 %v202_v41, 0.0  ;;  %v214_v54 = vmax.f32 %v206_v42, 0.0 }
  0xfc   :  { %v213_v51 = vmax.f32 %v205_v45, 0.0  ;;  %v217_v52 = vmax.f32 %v209_v46, 0.0 }
  0xfd   :  { %v211_v55 = vmax.f32 %v203_v47, 0.0  ;;  %v215_v56 = vmax.f32 %v207_v48, 0.0 }
  0xfe   :  { %v315_v57 = vpack.c.bf16 %v213_v51, %v212_v49  ;;  %v325_v58 = vpack.c.bf16 %v217_v52, %v216_v50 }
  0xff   :  { %v310_v59 = vpack.c.bf16 %v211_v55, %v210_v53  ;;  %v320_v60 = vpack.c.bf16 %v215_v56, %v214_v54 }
 0x100   :  { %330 = vst [vmem:[%s489_s4 + $0x8] sm:$0xff] %v315_v57   ;;  %332 = vst [vmem:[%s489_s4 + $0x18] sm:$0xff] %v325_v58  }
 0x101   :  { %311 = vst [vmem:[%s489_s4] sm:$0xff] %v310_v59   ;;  %331 = vst [vmem:[%s489_s4 + $0x10] sm:$0xff] %v320_v60  }

// kernel: _lambda_.29
= control target key start
LH: loop header
LB: loop body
LE: loop exit
PB: predicated region body
PF: predicated region fallthrough
CT: control target
= control target key end

     0   :  { %s414_s1 = inlined_call_operand.vmem [shape: bf16[128,128], index: 1, kind: input, shape index: {}]   ;;  %s415_s0 = inlined_call_operand.vmem [shape: bf16[64,128], index: 0, kind: input, shape index: {}]   ;;  %s416_s2 = inlined_call_operand.vmem [shape: f32[1,128], index: 2, kind: input, shape index: {}]   ;;  %s417_s3 = inlined_call_operand.vmem [shape: bf16[64,128], index: 3, kind: output, shape index: {}]  }
   0x1   :  { %v331_v0 = vld [vmem:[%s414_s1] sm:$0xff]   ;;  %v332_v1 = vld [vmem:[%s414_s1 + $0x8] sm:$0xff]   ;;  %v333_v2 = vld [vmem:[%s414_s1 + $0x10] sm:$0xff]  }
   0x2   :  { %291 = vmatprep.subr.bf16.mxu0 %v331_v0  ;;  %315 = vmatprep.subr.bf16.mxu1 %v331_v0  ;;  %v334_v3 = vld [vmem:[%s414_s1 + $0x18] sm:$0xff]   ;;  %v339_v4 = vld [vmem:[%s415_s0] sm:$0xff]   ;;  %v340_v5 = vld [vmem:[%s415_s0 + $0x10] sm:$0xff]  }
   0x3   :  { %292 = vmatpush3.bf16.msra.mxu0 %v331_v0  ;;  %323 = vmatpush3.bf16.msra.mxu1 %v331_v0  ;;  %v335_v6 = vld [vmem:[%s414_s1 + $0x20] sm:$0xff]   ;;  %v336_v7 = vld [vmem:[%s414_s1 + $0x28] sm:$0xff]   ;;  %v337_v8 = vld [vmem:[%s414_s1 + $0x30] sm:$0xff]  }
   0x4   :  { %293 = vmatprep.subr.bf16.mxu0 %v332_v1  ;;  %316 = vmatprep.subr.bf16.mxu1 %v332_v1  ;;  %v338_v9 = vld [vmem:[%s414_s1 + $0x38] sm:$0xff]   ;;  %v341_v10 = vld [vmem:[%s415_s0 + $0x8] sm:$0xff]   ;;  %v227_v13 = vld [vmem:[%s416_s2] ss:$0 sm:$0xff] }
   0x5   :  { %307 = vmatprep.mubr.bf16.mxu0 %v339_v4  ;;  %311 = vmatprep.mubr.bf16.mxu1 %v340_v5  ;;  %v342_v11 = vld [vmem:[%s415_s0 + $0x18] sm:$0xff]  }
   0x7   :  { %294 = vmatpush3.bf16.msra.mxu0 %v332_v1  ;;  %324 = vmatpush3.bf16.msra.mxu1 %v332_v1 }
   0x8   :  { %295 = vmatprep.subr.bf16.mxu0 %v333_v2  ;;  %317 = vmatprep.subr.bf16.mxu1 %v333_v2 }
   0xb   :  { %296 = vmatpush3.bf16.msra.mxu0 %v333_v2  ;;  %325 = vmatpush3.bf16.msra.mxu1 %v333_v2 }
   0xc   :  { %297 = vmatprep.subr.bf16.mxu0 %v334_v3  ;;  %318 = vmatprep.subr.bf16.mxu1 %v334_v3 }
   0xf   :  { %298 = vmatpush3.bf16.msra.mxu0 %v334_v3  ;;  %326 = vmatpush3.bf16.msra.mxu1 %v334_v3 }
  0x10   :  { %299 = vmatprep.subr.bf16.mxu0 %v335_v6  ;;  %319 = vmatprep.subr.bf16.mxu1 %v335_v6 }
  0x13   :  { %300 = vmatpush3.bf16.msra.mxu0 %v335_v6  ;;  %327 = vmatpush3.bf16.msra.mxu1 %v335_v6 }
  0x14   :  { %301 = vmatprep.subr.bf16.mxu0 %v336_v7  ;;  %320 = vmatprep.subr.bf16.mxu1 %v336_v7 }
  0x17   :  { %302 = vmatpush3.bf16.msra.mxu0 %v336_v7  ;;  %328 = vmatpush3.bf16.msra.mxu1 %v336_v7 }
  0x18   :  { %303 = vmatprep.subr.bf16.mxu0 %v337_v8  ;;  %321 = vmatprep.subr.bf16.mxu1 %v337_v8 }
  0x1b   :  { %304 = vmatpush3.bf16.msra.mxu0 %v337_v8  ;;  %329 = vmatpush3.bf16.msra.mxu1 %v337_v8 }
  0x1c   :  { %305 = vmatprep.subr.bf16.mxu0 %v338_v9  ;;  %322 = vmatprep.subr.bf16.mxu1 %v338_v9 }
  0x1f   :  { %306 = vmatpush3.bf16.msra.mxu0 %v338_v9  ;;  %330 = vmatpush3.bf16.msra.mxu1 %v338_v9 }
  0x22   :  { %308 = vmatmul.mubr.bf16.vlgmr.msra.gmra.mrb[0].mxu0 %v341_v10  ;;  %312 = vmatmul.mubr.bf16.vlgmr.msra.gmra.mrb[0].mxu1 %v342_v11 }
  0xf5   :  { %v309_v12 = vpop.f32.mrb[0].mxu0  ;;  %v313_v14 = vpop.f32.mrb[0].mxu1 }
  0xf6   :  { %v152_v15 = vpop.f32.mrb[1].mxu0  ;;  %v168_v16 = vpop.f32.mrb[1].mxu1  ;;  %v161_v19 = vadd.f32 %v309_v12, %v227_v13  ;;  %v177_v20 = vadd.f32 %v313_v14, %v227_v13 }
  0xf7   :  { %v310_v17 = vpop.f32.mrb[2].mxu0  ;;  %v314_v18 = vpop.f32.mrb[2].mxu1  ;;  %v153_v25 = vadd.f32 %v227_v13, %v152_v15  ;;  %v169_v26 = vadd.f32 %v227_v13, %v168_v16 }
  0xf8   :  { %v164_v21 = vadd.f32 %v310_v17, %v227_v13  ;;  %v180_v22 = vadd.f32 %v314_v18, %v227_v13  ;;  %v155_v23 = vpop.f32.mrb[3].mxu0  ;;  %v171_v24 = vpop.f32.mrb[3].mxu1 }
  0xf9   :  { %v156_v27 = vadd.f32 %v227_v13, %v155_v23  ;;  %v172_v28 = vadd.f32 %v227_v13, %v171_v24 }
  0xfa   :  { %v264_v29 = vpack.c.bf16 %v164_v21, %v161_v19  ;;  %v274_v30 = vpack.c.bf16 %v180_v22, %v177_v20 }
  0xfb   :  { %v259_v31 = vpack.c.bf16 %v156_v27, %v153_v25  ;;  %v269_v32 = vpack.c.bf16 %v172_v28, %v169_v26 }
  0xfc   :  { %276 = vst [vmem:[%s417_s3 + $0x8] sm:$0xff] %v264_v29   ;;  %278 = vst [vmem:[%s417_s3 + $0x18] sm:$0xff] %v274_v30  }
  0xfd   :  { %260 = vst [vmem:[%s417_s3] sm:$0xff] %v259_v31   ;;  %277 = vst [vmem:[%s417_s3 + $0x10] sm:$0xff] %v269_v32  }

// kernel: _lambda_.31
= control target key start
LH: loop header
LB: loop body
LE: loop exit
PB: predicated region body
PF: predicated region fallthrough
CT: control target
= control target key end

     0   :  { %s570_s1 = inlined_call_operand.vmem [shape: bf16[256,128], index: 1, kind: input, shape index: {}]   ;;  %s571_s0 = inlined_call_operand.vmem [shape: bf16[64,256], index: 0, kind: input, shape index: {}]   ;;  %s572_s2 = inlined_call_operand.vmem [shape: f32[1,128], index: 2, kind: input, shape index: {}]   ;;  %s573_s3 = inlined_call_operand.vmem [shape: bf16[64,128], index: 3, kind: output, shape index: {}]  }
   0x1   :  { %v435_v0 = vld [vmem:[%s570_s1 + $0x40] sm:$0xff]   ;;  %v437_v2 = vld [vmem:[%s570_s1 + $0x48] sm:$0xff]   ;;  %v439_v4 = vld [vmem:[%s570_s1 + $0x50] sm:$0xff]  }
   0x2   :  { %v436_v1 = vld [vmem:[%s570_s1] sm:$0xff]   ;;  %379 = vmatprep.subr.bf16.mxu0 %v435_v0  ;;  %419 = vmatprep.subr.bf16.mxu1 %v435_v0  ;;  %v438_v3 = vld [vmem:[%s570_s1 + $0x8] sm:$0xff]   ;;  %v440_v5 = vld [vmem:[%s570_s1 + $0x10] sm:$0xff]  }
   0x3   :  { %380 = vmatpush3.bf16.msra.mxu0 %v436_v1  ;;  %427 = vmatpush3.bf16.msra.mxu1 %v436_v1  ;;  %v441_v6 = vld [vmem:[%s570_s1 + $0x58] sm:$0xff]   ;;  %v443_v8 = vld [vmem:[%s570_s1 + $0x60] sm:$0xff]   ;;  %v445_v10 = vld [vmem:[%s570_s1 + $0x68] sm:$0xff]  }
   0x4   :  { %381 = vmatprep.subr.bf16.mxu0 %v437_v2  ;;  %420 = vmatprep.subr.bf16.mxu1 %v437_v2  ;;  %v442_v7 = vld [vmem:[%s570_s1 + $0x18] sm:$0xff]   ;;  %v444_v9 = vld [vmem:[%s570_s1 + $0x20] sm:$0xff]   ;;  %v446_v13 = vld [vmem:[%s570_s1 + $0x28] sm:$0xff]  }
   0x5   :  { %v453_v11 = vld [vmem:[%s571_s0 + $0x4] ss:$8 sps:$4 sm:$0xff]   ;;  %v447_v14 = vld [vmem:[%s570_s1 + $0x70] sm:$0xff]   ;;  %v449_v16 = vld [vmem:[%s570_s1 + $0x78] sm:$0xff]  }
   0x6   :  { %v456_v12 = vld [vmem:[%s571_s0 + $0x24] ss:$8 sps:$4 sm:$0xff]   ;;  %230 = vmatprep.mubr.bf16.mxu0 %v453_v11  ;;  %v448_v15 = vld [vmem:[%s570_s1 + $0x30] sm:$0xff]   ;;  %v450_v17 = vld [vmem:[%s570_s1 + $0x38] sm:$0xff]  }
   0x7   :  { %382 = vmatpush3.bf16.msra.mxu0 %v438_v3  ;;  %428 = vmatpush3.bf16.msra.mxu1 %v438_v3  ;;  %v451_v18 = vld [vmem:[%s571_s0] ss:$8 sps:$4 sm:$0xff]   ;;  %v457_v20 = vld [vmem:[%s571_s0 + $0x14] ss:$8 sps:$4 sm:$0xff]   ;;  %v461_v22 = vld [vmem:[%s571_s0 + $0x10] ss:$8 sps:$4 sm:$0xff]  }
   0x8   :  { %383 = vmatprep.subr.bf16.mxu0 %v439_v4  ;;  %421 = vmatprep.subr.bf16.mxu1 %v439_v4  ;;  %v454_v19 = vld [vmem:[%s571_s0 + $0x20] ss:$8 sps:$4 sm:$0xff]   ;;  %v459_v21 = vld [vmem:[%s571_s0 + $0x34] ss:$8 sps:$4 sm:$0xff]   ;;  %v462_v23 = vld [vmem:[%s571_s0 + $0x30] ss:$8 sps:$4 sm:$0xff]  }
   0x9   :  { %246 = vmatprep.mubr.bf16.mxu1 %v456_v12  ;;  %v315_v26 = vld [vmem:[%s572_s2] ss:$0 sm:$0xff] }
   0xb   :  { %384 = vmatpush3.bf16.msra.mxu0 %v440_v5  ;;  %429 = vmatpush3.bf16.msra.mxu1 %v440_v5 }
   0xc   :  { %385 = vmatprep.subr.bf16.mxu0 %v441_v6  ;;  %422 = vmatprep.subr.bf16.mxu1 %v441_v6 }
   0xf   :  { %386 = vmatpush3.bf16.msra.mxu0 %v442_v7  ;;  %430 = vmatpush3.bf16.msra.mxu1 %v442_v7 }
  0x10   :  { %387 = vmatprep.subr.bf16.mxu0 %v443_v8  ;;  %423 = vmatprep.subr.bf16.mxu1 %v443_v8 }
  0x13   :  { %388 = vmatpush3.bf16.msra.mxu0 %v444_v9  ;;  %431 = vmatpush3.bf16.msra.mxu1 %v444_v9 }
  0x14   :  { %389 = vmatprep.subr.bf16.mxu0 %v445_v10  ;;  %424 = vmatprep.subr.bf16.mxu1 %v445_v10 }
  0x17   :  { %390 = vmatpush3.bf16.msra.mxu0 %v446_v13  ;;  %432 = vmatpush3.bf16.msra.mxu1 %v446_v13 }
  0x18   :  { %391 = vmatprep.subr.bf16.mxu0 %v447_v14  ;;  %425 = vmatprep.subr.bf16.mxu1 %v447_v14 }
  0x1b   :  { %392 = vmatpush3.bf16.msra.mxu0 %v448_v15  ;;  %433 = vmatpush3.bf16.msra.mxu1 %v448_v15 }
  0x1c   :  { %393 = vmatprep.subr.bf16.mxu0 %v449_v16  ;;  %426 = vmatprep.subr.bf16.mxu1 %v449_v16 }
  0x1f   :  { %394 = vmatpush3.bf16.msra.mxu0 %v450_v17  ;;  %434 = vmatpush3.bf16.msra.mxu1 %v450_v17 }
  0x22   :  { %231 = vmatmul.mubr.bf16.vlgmr.msra.gmra.mrb[0].mxu0 %v451_v18  ;;  %247 = vmatmul.mubr.bf16.vlgmr.msra.gmra.mrb[0].mxu1 %v454_v19 }
  0x23   :  { %238 = vmatprep.mubr.bf16.mxu0 %v457_v20  ;;  %254 = vmatprep.mubr.bf16.mxu1 %v459_v21 }
  0x2a   :  { %239 = vmatmul.mubr.bf16.gmra.mrb[4].mxu0 %v461_v22  ;;  %255 = vmatmul.mubr.bf16.gmra.mrb[4].mxu1 %v462_v23 }
  0xf5   :  { %v395_v24 = vpop.f32.mrb[0].mxu0  ;;  %v407_v25 = vpop.f32.mrb[0].mxu1 }
  0xf6   :  { %v396_v27 = vpop.f32.mrb[1].mxu0  ;;  %v408_v28 = vpop.f32.mrb[1].mxu1 }
  0xf7   :  { %v397_v29 = vadd.f32 %v396_v27, %v395_v24  ;;  %v409_v30 = vadd.f32 %v408_v28, %v407_v25  ;;  %v398_v31 = vpop.f32.mrb[2].mxu0  ;;  %v410_v32 = vpop.f32.mrb[2].mxu1 }
  0xf8   :  { %v399_v33 = vpop.f32.mrb[3].mxu0  ;;  %v411_v34 = vpop.f32.mrb[3].mxu1 }
  0xf9   :  { %v233_v35 = vadd.f32 %v397_v29, %v315_v26  ;;  %v249_v36 = vadd.f32 %v409_v30, %v315_v26  ;;  %v400_v37 = vadd.f32 %v399_v33, %v398_v31  ;;  %v412_v38 = vadd.f32 %v411_v34, %v410_v32 }
  0xfb   :  { %v236_v39 = vadd.f32 %v400_v37, %v315_v26  ;;  %v252_v40 = vadd.f32 %v412_v38, %v315_v26  ;;  %v263_v41 = vmax.f32 %v233_v35, 0.0  ;;  %v267_v42 = vmax.f32 %v249_v36, 0.0 }
  0xfd   :  { %v264_v43 = vmax.f32 %v236_v39, 0.0  ;;  %v268_v44 = vmax.f32 %v252_v40, 0.0  ;;  %v401_v45 = vpop.f32.mrb[4].mxu0  ;;  %v413_v46 = vpop.f32.mrb[4].mxu1 }
  0xfe   :  { %v402_v47 = vpop.f32.mrb[5].mxu0  ;;  %v414_v48 = vpop.f32.mrb[5].mxu1 }
  0xff   :  { %v359_v49 = vpack.c.bf16 %v264_v43, %v263_v41  ;;  %v369_v50 = vpack.c.bf16 %v268_v44, %v267_v42  ;;  %v403_v51 = vadd.f32 %v402_v47, %v401_v45  ;;  %v415_v52 = vadd.f32 %v414_v48, %v413_v46  ;;  %v404_v53 = vpop.f32.mrb[6].mxu0  ;;  %v416_v54 = vpop.f32.mrb[6].mxu1 }
 0x100   :  { %v405_v55 = vpop.f32.mrb[7].mxu0  ;;  %v417_v56 = vpop.f32.mrb[7].mxu1 }
 0x101   :  { %360 = vst [vmem:[%s573_s3] sm:$0xff] %v359_v49   ;;  %377 = vst [vmem:[%s573_s3 + $0x10] sm:$0xff] %v369_v50   ;;  %v241_v57 = vadd.f32 %v403_v51, %v315_v26  ;;  %v257_v58 = vadd.f32 %v415_v52, %v315_v26  ;;  %v406_v59 = vadd.f32 %v405_v55, %v404_v53 }
 0x102   :  { %v418_v60 = vadd.f32 %v417_v56, %v416_v54 }
 0x103   :  { %v244_v61 = vadd.f32 %v406_v59, %v315_v26  ;;  %v265_v63 = vmax.f32 %v241_v57, 0.0  ;;  %v269_v0 = vmax.f32 %v257_v58, 0.0 }
 0x104   :  { %v260_v62 = vadd.f32 %v418_v60, %v315_v26 }
 0x105   :  { %v266_v1 = vmax.f32 %v244_v61, 0.0 }
 0x106   :  { %v270_v2 = vmax.f32 %v260_v62, 0.0 }
 0x107   :  { %v364_v3 = vpack.c.bf16 %v266_v1, %v265_v63 }
 0x108   :  { %v374_v4 = vpack.c.bf16 %v270_v2, %v269_v0 }
 0x109   :  { %376 = vst [vmem:[%s573_s3 + $0x8] sm:$0xff] %v364_v3  }
 0x10a   :  { %378 = vst [vmem:[%s573_s3 + $0x18] sm:$0xff] %v374_v4  }

// kernel: _lambda_.30
= control target key start
LH: loop header
LB: loop body
LE: loop exit
PB: predicated region body
PF: predicated region fallthrough
CT: control target
= control target key end

     0   :  { %s633_s1 = inlined_call_operand.vmem [shape: bf16[256,128], index: 1, kind: input, shape index: {}]   ;;  %s634_s0 = inlined_call_operand.vmem [shape: bf16[64,256], index: 0, kind: input, shape index: {}]   ;;  %s635_s3 = inlined_call_operand.vmem [shape: bf16[64,128], index: 3, kind: input, shape index: {}]   ;;  %s636_s2 = inlined_call_operand.vmem [shape: f32[1,128], index: 2, kind: input, shape index: {}]   ;;  %s637_s4 = inlined_call_operand.vmem [shape: bf16[64,128], index: 4, kind: output, shape index: {}]  }
   0x1   :  { %v481_v0 = vld [vmem:[%s633_s1 + $0x40] sm:$0xff]   ;;  %v483_v2 = vld [vmem:[%s633_s1 + $0x48] sm:$0xff]   ;;  %v485_v4 = vld [vmem:[%s633_s1 + $0x50] sm:$0xff]  }
   0x2   :  { %v482_v1 = vld [vmem:[%s633_s1] sm:$0xff]   ;;  %425 = vmatprep.subr.bf16.mxu0 %v481_v0  ;;  %465 = vmatprep.subr.bf16.mxu1 %v481_v0  ;;  %v484_v3 = vld [vmem:[%s633_s1 + $0x8] sm:$0xff]   ;;  %v486_v5 = vld [vmem:[%s633_s1 + $0x10] sm:$0xff]  }
   0x3   :  { %426 = vmatpush3.bf16.msra.mxu0 %v482_v1  ;;  %473 = vmatpush3.bf16.msra.mxu1 %v482_v1  ;;  %v487_v6 = vld [vmem:[%s633_s1 + $0x58] sm:$0xff]   ;;  %v489_v8 = vld [vmem:[%s633_s1 + $0x60] sm:$0xff]   ;;  %v491_v10 = vld [vmem:[%s633_s1 + $0x68] sm:$0xff]  }
   0x4   :  { %427 = vmatprep.subr.bf16.mxu0 %v483_v2  ;;  %466 = vmatprep.subr.bf16.mxu1 %v483_v2  ;;  %v488_v7 = vld [vmem:[%s633_s1 + $0x18] sm:$0xff]   ;;  %v490_v9 = vld [vmem:[%s633_s1 + $0x20] sm:$0xff]   ;;  %v492_v13 = vld [vmem:[%s633_s1 + $0x28] sm:$0xff]  }
   0x5   :  { %v499_v11 = vld [vmem:[%s634_s0 + $0x4] ss:$8 sps:$4 sm:$0xff]   ;;  %v493_v14 = vld [vmem:[%s633_s1 + $0x70] sm:$0xff]   ;;  %v495_v16 = vld [vmem:[%s633_s1 + $0x78] sm:$0xff]  }
   0x6   :  { %v502_v12 = vld [vmem:[%s634_s0 + $0x24] ss:$8 sps:$4 sm:$0xff]   ;;  %233 = vmatprep.mubr.bf16.mxu0 %v499_v11  ;;  %v494_v15 = vld [vmem:[%s633_s1 + $0x30] sm:$0xff]   ;;  %v496_v17 = vld [vmem:[%s633_s1 + $0x38] sm:$0xff]  }
   0x7   :  { %428 = vmatpush3.bf16.msra.mxu0 %v484_v3  ;;  %474 = vmatpush3.bf16.msra.mxu1 %v484_v3  ;;  %v497_v18 = vld [vmem:[%s634_s0] ss:$8 sps:$4 sm:$0xff]   ;;  %v503_v20 = vld [vmem:[%s634_s0 + $0x14] ss:$8 sps:$4 sm:$0xff]   ;;  %v507_v22 = vld [vmem:[%s634_s0 + $0x10] ss:$8 sps:$4 sm:$0xff]  }
   0x8   :  { %429 = vmatprep.subr.bf16.mxu0 %v485_v4  ;;  %467 = vmatprep.subr.bf16.mxu1 %v485_v4  ;;  %v500_v19 = vld [vmem:[%s634_s0 + $0x20] ss:$8 sps:$4 sm:$0xff]   ;;  %v505_v21 = vld [vmem:[%s634_s0 + $0x34] ss:$8 sps:$4 sm:$0xff]   ;;  %v508_v23 = vld [vmem:[%s634_s0 + $0x30] ss:$8 sps:$4 sm:$0xff]  }
   0x9   :  { %249 = vmatprep.mubr.bf16.mxu1 %v502_v12  ;;  %v384_v24 = vld [vmem:[%s635_s3] sm:$0xff]   ;;  %v420_v25 = vld [vmem:[%s635_s3 + $0x10] sm:$0xff]   ;;  %v419_v53 = vld [vmem:[%s635_s3 + $0x8] sm:$0xff]  }
   0xa   :  { %v342_v28 = vld [vmem:[%s636_s2] ss:$0 sm:$0xff]  ;;  %v385_v32 = vunpack.c.l.bf16 %v384_v24  ;;  %v393_v34 = vunpack.c.l.bf16 %v420_v25  ;;  %v386_v38 = vunpack.c.h.bf16 %v384_v24  ;;  %v394_v40 = vunpack.c.h.bf16 %v420_v25  ;;  %v421_v54 = vld [vmem:[%s635_s3 + $0x18] sm:$0xff]  }
   0xb   :  { %430 = vmatpush3.bf16.msra.mxu0 %v486_v5  ;;  %475 = vmatpush3.bf16.msra.mxu1 %v486_v5  ;;  %v389_v1 = vunpack.c.l.bf16 %v419_v53  ;;  %v397_v2 = vunpack.c.l.bf16 %v421_v54  ;;  %v398_v12 = vunpack.c.h.bf16 %v421_v54 }
   0xc   :  { %431 = vmatprep.subr.bf16.mxu0 %v487_v6  ;;  %468 = vmatprep.subr.bf16.mxu1 %v487_v6 }
   0xf   :  { %432 = vmatpush3.bf16.msra.mxu0 %v488_v7  ;;  %476 = vmatpush3.bf16.msra.mxu1 %v488_v7 }
  0x10   :  { %433 = vmatprep.subr.bf16.mxu0 %v489_v8  ;;  %469 = vmatprep.subr.bf16.mxu1 %v489_v8 }
  0x13   :  { %434 = vmatpush3.bf16.msra.mxu0 %v490_v9  ;;  %477 = vmatpush3.bf16.msra.mxu1 %v490_v9 }
  0x14   :  { %435 = vmatprep.subr.bf16.mxu0 %v491_v10  ;;  %470 = vmatprep.subr.bf16.mxu1 %v491_v10  ;;  %v390_v10 = vunpack.c.h.bf16 %v419_v53 }
  0x17   :  { %436 = vmatpush3.bf16.msra.mxu0 %v492_v13  ;;  %478 = vmatpush3.bf16.msra.mxu1 %v492_v13 }
  0x18   :  { %437 = vmatprep.subr.bf16.mxu0 %v493_v14  ;;  %471 = vmatprep.subr.bf16.mxu1 %v493_v14 }
  0x1b   :  { %438 = vmatpush3.bf16.msra.mxu0 %v494_v15  ;;  %479 = vmatpush3.bf16.msra.mxu1 %v494_v15 }
  0x1c   :  { %439 = vmatprep.subr.bf16.mxu0 %v495_v16  ;;  %472 = vmatprep.subr.bf16.mxu1 %v495_v16 }
  0x1f   :  { %440 = vmatpush3.bf16.msra.mxu0 %v496_v17  ;;  %480 = vmatpush3.bf16.msra.mxu1 %v496_v17 }
  0x22   :  { %234 = vmatmul.mubr.bf16.vlgmr.msra.gmra.mrb[0].mxu0 %v497_v18  ;;  %250 = vmatmul.mubr.bf16.vlgmr.msra.gmra.mrb[0].mxu1 %v500_v19 }
  0x23   :  { %241 = vmatprep.mubr.bf16.mxu0 %v503_v20  ;;  %257 = vmatprep.mubr.bf16.mxu1 %v505_v21 }
  0x2a   :  { %242 = vmatmul.mubr.bf16.gmra.mrb[4].mxu0 %v507_v22  ;;  %258 = vmatmul.mubr.bf16.gmra.mrb[4].mxu1 %v508_v23 }
  0xf5   :  { %v441_v26 = vpop.f32.mrb[0].mxu0  ;;  %v453_v27 = vpop.f32.mrb[0].mxu1 }
  0xf6   :  { %v442_v29 = vpop.f32.mrb[1].mxu0  ;;  %v454_v30 = vpop.f32.mrb[1].mxu1 }
  0xf7   :  { %v443_v31 = vadd.f32 %v442_v29, %v441_v26  ;;  %v455_v33 = vadd.f32 %v454_v30, %v453_v27  ;;  %v444_v35 = vpop.f32.mrb[2].mxu0  ;;  %v456_v36 = vpop.f32.mrb[2].mxu1 }
  0xf8   :  { %v445_v37 = vpop.f32.mrb[3].mxu0  ;;  %v457_v39 = vpop.f32.mrb[3].mxu1 }
  0xf9   :  { %v236_v41 = vadd.f32 %v443_v31, %v342_v28  ;;  %v252_v42 = vadd.f32 %v455_v33, %v342_v28  ;;  %v446_v43 = vadd.f32 %v445_v37, %v444_v35  ;;  %v458_v44 = vadd.f32 %v457_v39, %v456_v36 }
  0xfb   :  { %v282_v45 = vadd.f32 %v385_v32, %v236_v41  ;;  %v286_v46 = vadd.f32 %v393_v34, %v252_v42  ;;  %v239_v47 = vadd.f32 %v446_v43, %v342_v28  ;;  %v255_v48 = vadd.f32 %v458_v44, %v342_v28 }
  0xfd   :  { %v283_v49 = vadd.f32 %v386_v38, %v239_v47  ;;  %v287_v50 = vadd.f32 %v394_v40, %v255_v48  ;;  %v447_v51 = vpop.f32.mrb[4].mxu0  ;;  %v459_v52 = vpop.f32.mrb[4].mxu1  ;;  %v290_v55 = vmax.f32 %v282_v45, 0.0  ;;  %v294_v56 = vmax.f32 %v286_v46, 0.0 }
  0xfe   :  { %v448_v57 = vpop.f32.mrb[5].mxu0  ;;  %v460_v58 = vpop.f32.mrb[5].mxu1 }
  0xff   :  { %v291_v59 = vmax.f32 %v283_v49, 0.0  ;;  %v295_v60 = vmax.f32 %v287_v50, 0.0  ;;  %v449_v61 = vadd.f32 %v448_v57, %v447_v51  ;;  %v461_v62 = vadd.f32 %v460_v58, %v459_v52  ;;  %v450_v63 = vpop.f32.mrb[6].mxu0  ;;  %v462_v0 = vpop.f32.mrb[6].mxu1 }
 0x100   :  { %v451_v3 = vpop.f32.mrb[7].mxu0  ;;  %v463_v4 = vpop.f32.mrb[7].mxu1 }
 0x101   :  { %v402_v5 = vpack.c.bf16 %v291_v59, %v290_v55  ;;  %v412_v6 = vpack.c.bf16 %v295_v60, %v294_v56  ;;  %v244_v7 = vadd.f32 %v449_v61, %v342_v28  ;;  %v260_v8 = vadd.f32 %v461_v62, %v342_v28 }
 0x102   :  { %v452_v9 = vadd.f32 %v451_v3, %v450_v63  ;;  %v464_v11 = vadd.f32 %v463_v4, %v462_v0 }
 0x103   :  { %403 = vst [vmem:[%s637_s4] sm:$0xff] %v402_v5   ;;  %423 = vst [vmem:[%s637_s4 + $0x10] sm:$0xff] %v412_v6   ;;  %v284_v13 = vadd.f32 %v389_v1, %v244_v7  ;;  %v288_v14 = vadd.f32 %v397_v2, %v260_v8 }
 0x104   :  { %v247_v15 = vadd.f32 %v452_v9, %v342_v28  ;;  %v263_v16 = vadd.f32 %v464_v11, %v342_v28 }
 0x105   :  { %v292_v19 = vmax.f32 %v284_v13, 0.0  ;;  %v296_v20 = vmax.f32 %v288_v14, 0.0 }
 0x106   :  { %v285_v17 = vadd.f32 %v390_v10, %v247_v15  ;;  %v289_v18 = vadd.f32 %v398_v12, %v263_v16 }
 0x108   :  { %v293_v21 = vmax.f32 %v285_v17, 0.0  ;;  %v297_v22 = vmax.f32 %v289_v18, 0.0 }
 0x10a   :  { %v407_v23 = vpack.c.bf16 %v293_v21, %v292_v19  ;;  %v417_v24 = vpack.c.bf16 %v297_v22, %v296_v20 }
 0x10c   :  { %422 = vst [vmem:[%s637_s4 + $0x8] sm:$0xff] %v407_v23   ;;  %424 = vst [vmem:[%s637_s4 + $0x18] sm:$0xff] %v417_v24  }

// kernel: _lambda_.36
= control target key start
LH: loop header
LB: loop body
LE: loop exit
PB: predicated region body
PF: predicated region fallthrough
CT: control target
= control target key end

     0   :  { %s811_s1 = inlined_call_operand.vmem [shape: bf16[384,128], index: 1, kind: input, shape index: {}]   ;;  %s812_s0 = inlined_call_operand.vmem [shape: bf16[64,384], index: 0, kind: input, shape index: {}]   ;;  %s813_s2 = inlined_call_operand.vmem [shape: f32[1,128], index: 2, kind: input, shape index: {}]   ;;  %s814_s3 = inlined_call_operand.vmem [shape: bf16[64,128], index: 3, kind: output, shape index: {}]  }
   0x1   :  { %v628_v0 = vld [vmem:[%s811_s1 + $0x40] sm:$0xff]   ;;  %v630_v2 = vld [vmem:[%s811_s1 + $0x48] sm:$0xff]   ;;  %v633_v5 = vld [vmem:[%s811_s1 + $0x50] sm:$0xff]  }
   0x2   :  { %v629_v1 = vld [vmem:[%s811_s1] sm:$0xff]   ;;  %552 = vmatprep.subr.bf16.mxu0 %v628_v0  ;;  %v632_v4 = vld [vmem:[%s811_s1 + $0x8] sm:$0xff]   ;;  %v635_v7 = vld [vmem:[%s811_s1 + $0x10] sm:$0xff]  }
   0x3   :  { %553 = vmatpush3.bf16.msra.mxu0 %v629_v1  ;;  %v631_v3 = vld [vmem:[%s811_s1 + $0x80] sm:$0xff]   ;;  %v634_v6 = vld [vmem:[%s811_s1 + $0x88] sm:$0xff]   ;;  %v636_v8 = vld [vmem:[%s811_s1 + $0x58] sm:$0xff]  }
   0x4   :  { %554 = vmatprep.subr.bf16.mxu0 %v630_v2  ;;  %604 = vmatprep.subr.bf16.mxu1 %v631_v3  ;;  %v637_v9 = vld [vmem:[%s811_s1 + $0x90] sm:$0xff]   ;;  %v638_v10 = vld [vmem:[%s811_s1 + $0x18] sm:$0xff]   ;;  %v639_v11 = vld [vmem:[%s811_s1 + $0x60] sm:$0xff]  }
   0x5   :  { %605 = vmatpush3.bf16.msra.mxu1 %v631_v3  ;;  %v640_v12 = vld [vmem:[%s811_s1 + $0x98] sm:$0xff]   ;;  %v641_v13 = vld [vmem:[%s811_s1 + $0x20] sm:$0xff]   ;;  %v642_v15 = vld [vmem:[%s811_s1 + $0x68] sm:$0xff]  }
   0x6   :  { %606 = vmatprep.subr.bf16.mxu1 %v634_v6  ;;  %v643_v14 = vld [vmem:[%s811_s1 + $0xa0] sm:$0xff]   ;;  %v644_v16 = vld [vmem:[%s811_s1 + $0x28] sm:$0xff]   ;;  %v645_v18 = vld [vmem:[%s811_s1 + $0x70] sm:$0xff]  }
   0x7   :  { %555 = vmatpush3.bf16.msra.mxu0 %v632_v4  ;;  %v646_v17 = vld [vmem:[%s811_s1 + $0xa8] sm:$0xff]   ;;  %v647_v19 = vld [vmem:[%s811_s1 + $0x30] sm:$0xff]   ;;  %v648_v20 = vld [vmem:[%s811_s1 + $0x78] sm:$0xff]  }
   0x8   :  { %556 = vmatprep.subr.bf16.mxu0 %v633_v5  ;;  %v649_v21 = vld [vmem:[%s811_s1 + $0xb0] sm:$0xff]   ;;  %v650_v23 = vld [vmem:[%s811_s1 + $0x38] sm:$0xff]   ;;  %v651_v26 = vld [vmem:[%s812_s0] ss:$12 sps:$4 sm:$0xff]  }
   0x9   :  { %607 = vmatpush3.bf16.msra.mxu1 %v634_v6  ;;  %v653_v22 = vld [vmem:[%s812_s0 + $0x4] ss:$12 sps:$4 sm:$0xff]   ;;  %v655_v24 = vld [vmem:[%s812_s0 + $0x8] ss:$12 sps:$4 sm:$0xff]   ;;  %v654_v25 = vld [vmem:[%s811_s1 + $0xb8] sm:$0xff]  }
   0xa   :  { %608 = vmatprep.subr.bf16.mxu1 %v637_v9  ;;  %326 = vmatprep.mubr.bf16.mxu0 %v653_v22  ;;  %v657_v27 = vld [vmem:[%s812_s0 + $0x1c] ss:$12 sps:$4 sm:$0xff]   ;;  %v656_v28 = vld [vmem:[%s812_s0 + $0x20] ss:$12 sps:$4 sm:$0xff]   ;;  %v663_v29 = vld [vmem:[%s812_s0 + $0x38] ss:$12 sps:$4 sm:$0xff]  }
   0xb   :  { %557 = vmatpush3.bf16.msra.mxu0 %v635_v7  ;;  %620 = vmatprep.mubr.bf16.mxu1 %v655_v24  ;;  %v659_v30 = vld [vmem:[%s812_s0 + $0x18] ss:$12 sps:$4 sm:$0xff]   ;;  %v660_v31 = vld [vmem:[%s812_s0 + $0x34] ss:$12 sps:$4 sm:$0xff]   ;;  %v664_v32 = vld [vmem:[%s812_s0 + $0x50] ss:$12 sps:$4 sm:$0xff]  }
   0xc   :  { %558 = vmatprep.subr.bf16.mxu0 %v636_v8  ;;  %v662_v33 = vld [vmem:[%s812_s0 + $0x30] ss:$12 sps:$4 sm:$0xff]   ;;  %v665_v34 = vld [vmem:[%s812_s0 + $0x4c] ss:$12 sps:$4 sm:$0xff]   ;;  %v667_v35 = vld [vmem:[%s812_s0 + $0x48] ss:$12 sps:$4 sm:$0xff]  }
   0xd   :  { %609 = vmatpush3.bf16.msra.mxu1 %v637_v9  ;;  %v476_v38 = vld [vmem:[%s813_s2] ss:$0 sm:$0xff] }
   0xe   :  { %610 = vmatprep.subr.bf16.mxu1 %v640_v12 }
   0xf   :  { %559 = vmatpush3.bf16.msra.mxu0 %v638_v10 }
  0x10   :  { %560 = vmatprep.subr.bf16.mxu0 %v639_v11 }
  0x11   :  { %611 = vmatpush3.bf16.msra.mxu1 %v640_v12 }
  0x12   :  { %612 = vmatprep.subr.bf16.mxu1 %v643_v14 }
  0x13   :  { %561 = vmatpush3.bf16.msra.mxu0 %v641_v13 }
  0x14   :  { %562 = vmatprep.subr.bf16.mxu0 %v642_v15 }
  0x15   :  { %613 = vmatpush3.bf16.msra.mxu1 %v643_v14 }
  0x16   :  { %614 = vmatprep.subr.bf16.mxu1 %v646_v17 }
  0x17   :  { %563 = vmatpush3.bf16.msra.mxu0 %v644_v16 }
  0x18   :  { %564 = vmatprep.subr.bf16.mxu0 %v645_v18 }
  0x19   :  { %615 = vmatpush3.bf16.msra.mxu1 %v646_v17 }
  0x1a   :  { %616 = vmatprep.subr.bf16.mxu1 %v649_v21 }
  0x1b   :  { %565 = vmatpush3.bf16.msra.mxu0 %v647_v19 }
  0x1c   :  { %566 = vmatprep.subr.bf16.mxu0 %v648_v20 }
  0x1d   :  { %617 = vmatpush3.bf16.msra.mxu1 %v649_v21 }
  0x1e   :  { %618 = vmatprep.subr.bf16.mxu1 %v654_v25 }
  0x1f   :  { %567 = vmatpush3.bf16.msra.mxu0 %v650_v23 }
  0x21   :  { %619 = vmatpush3.bf16.msra.mxu1 %v654_v25 }
  0x22   :  { %327 = vmatmul.mubr.bf16.vlgmr.msra.gmra.mrb[0].mxu0 %v651_v26 }
  0x23   :  { %334 = vmatprep.mubr.bf16.mxu0 %v657_v27 }
  0x24   :  { %621 = vmatmul.mubr.bf16.vlgmr.msra.gmra.mrb[0].mxu1 %v656_v28 }
  0x25   :  { %624 = vmatprep.mubr.bf16.mxu1 %v663_v29 }
  0x2a   :  { %335 = vmatmul.mubr.bf16.gmra.mrb[4].mxu0 %v659_v30 }
  0x2b   :  { %342 = vmatprep.mubr.bf16.mxu0 %v660_v31 }
  0x2c   :  { %625 = vmatmul.mubr.bf16.gmra.mrb[4].mxu1 %v664_v32 }
  0x32   :  { %343 = vmatmul.mubr.bf16.gmra.mrb[8].mxu0 %v662_v33 }
  0x33   :  { %350 = vmatprep.mubr.bf16.mxu0 %v665_v34 }
  0x3a   :  { %351 = vmatmul.mubr.bf16.gmra.mrb[12].mxu0 %v667_v35 }
  0xf5   :  { %v568_v36 = vpop.f32.mrb[0].mxu0 }
  0xf6   :  { %v569_v37 = vpop.f32.mrb[1].mxu0 }
  0xf7   :  { %v570_v39 = vadd.f32 %v569_v37, %v568_v36  ;;  %v571_v40 = vpop.f32.mrb[2].mxu0  ;;  %v622_v42 = vpop.f32.mrb[0].mxu1 }
  0xf8   :  { %v572_v41 = vpop.f32.mrb[3].mxu0  ;;  %v393_v45 = vpop.f32.mrb[1].mxu1 }
  0xf9   :  { %v573_v43 = vadd.f32 %v572_v41, %v571_v40  ;;  %v329_v44 = vadd.f32 %v570_v39, %v476_v38  ;;  %v623_v46 = vpop.f32.mrb[2].mxu1 }
  0xfa   :  { %v396_v49 = vpop.f32.mrb[3].mxu1 }
  0xfb   :  { %v394_v47 = vadd.f32 %v393_v45, %v329_v44  ;;  %v332_v48 = vadd.f32 %v573_v43, %v476_v38 }
  0xfd   :  { %v397_v50 = vadd.f32 %v396_v49, %v332_v48  ;;  %v574_v51 = vpop.f32.mrb[4].mxu0  ;;  %v424_v53 = vmax.f32 %v394_v47, 0.0 }
  0xfe   :  { %v575_v52 = vpop.f32.mrb[5].mxu0 }
  0xff   :  { %v425_v54 = vmax.f32 %v397_v50, 0.0  ;;  %v576_v55 = vadd.f32 %v575_v52, %v574_v51  ;;  %v577_v56 = vpop.f32.mrb[6].mxu0  ;;  %v626_v58 = vpop.f32.mrb[4].mxu1 }
 0x100   :  { %v578_v57 = vpop.f32.mrb[7].mxu0  ;;  %v409_v62 = vpop.f32.mrb[5].mxu1 }
 0x101   :  { %v532_v59 = vpack.c.bf16 %v425_v54, %v424_v53  ;;  %v337_v60 = vadd.f32 %v576_v55, %v476_v38  ;;  %v579_v61 = vadd.f32 %v578_v57, %v577_v56  ;;  %v627_v63 = vpop.f32.mrb[6].mxu1 }
 0x102   :  { %v412_v2 = vpop.f32.mrb[7].mxu1 }
 0x103   :  { %533 = vst [vmem:[%s814_s3] sm:$0xff] %v532_v59   ;;  %v402_v0 = vadd.f32 %v622_v42, %v337_v60  ;;  %v340_v1 = vadd.f32 %v579_v61, %v476_v38 }
 0x105   :  { %v405_v3 = vadd.f32 %v623_v46, %v340_v1  ;;  %v580_v4 = vpop.f32.mrb[8].mxu0  ;;  %v426_v6 = vmax.f32 %v402_v0, 0.0 }
 0x106   :  { %v581_v5 = vpop.f32.mrb[9].mxu0 }
 0x107   :  { %v427_v7 = vmax.f32 %v405_v3, 0.0  ;;  %v582_v8 = vadd.f32 %v581_v5, %v580_v4  ;;  %v583_v9 = vpop.f32.mrb[10].mxu0 }
 0x108   :  { %v584_v10 = vpop.f32.mrb[11].mxu0 }
 0x109   :  { %v537_v11 = vpack.c.bf16 %v427_v7, %v426_v6  ;;  %v585_v12 = vadd.f32 %v584_v10, %v583_v9  ;;  %v345_v13 = vadd.f32 %v582_v8, %v476_v38 }
 0x10b   :  { %549 = vst [vmem:[%s814_s3 + $0x8] sm:$0xff] %v537_v11   ;;  %v410_v14 = vadd.f32 %v409_v62, %v345_v13  ;;  %v348_v15 = vadd.f32 %v585_v12, %v476_v38 }
 0x10d   :  { %v413_v16 = vadd.f32 %v412_v2, %v348_v15  ;;  %v586_v17 = vpop.f32.mrb[12].mxu0  ;;  %v428_v19 = vmax.f32 %v410_v14, 0.0 }
 0x10e   :  { %v587_v18 = vpop.f32.mrb[13].mxu0 }
 0x10f   :  { %v429_v20 = vmax.f32 %v413_v16, 0.0  ;;  %v588_v21 = vadd.f32 %v587_v18, %v586_v17  ;;  %v589_v22 = vpop.f32.mrb[14].mxu0 }
 0x110   :  { %v590_v23 = vpop.f32.mrb[15].mxu0 }
 0x111   :  { %v542_v24 = vpack.c.bf16 %v429_v20, %v428_v19  ;;  %v353_v25 = vadd.f32 %v588_v21, %v476_v38  ;;  %v591_v26 = vadd.f32 %v590_v23, %v589_v22 }
 0x113   :  { %550 = vst [vmem:[%s814_s3 + $0x10] sm:$0xff] %v542_v24   ;;  %v418_v27 = vadd.f32 %v626_v58, %v353_v25  ;;  %v356_v28 = vadd.f32 %v591_v26, %v476_v38 }
 0x115   :  { %v421_v29 = vadd.f32 %v627_v63, %v356_v28  ;;  %v430_v30 = vmax.f32 %v418_v27, 0.0 }
 0x117   :  { %v431_v31 = vmax.f32 %v421_v29, 0.0 }
 0x119   :  { %v547_v32 = vpack.c.bf16 %v431_v31, %v430_v30 }
 0x11b   :  { %551 = vst [vmem:[%s814_s3 + $0x18] sm:$0xff] %v547_v32  }

// kernel: _lambda_.35
= control target key start
LH: loop header
LB: loop body
LE: loop exit
PB: predicated region body
PF: predicated region fallthrough
CT: control target
= control target key end

     0   :  { %s884_s1 = inlined_call_operand.vmem [shape: bf16[384,128], index: 1, kind: input, shape index: {}]   ;;  %s885_s0 = inlined_call_operand.vmem [shape: bf16[64,384], index: 0, kind: input, shape index: {}]   ;;  %s886_s2 = inlined_call_operand.vmem [shape: f32[1,128], index: 2, kind: input, shape index: {}]   ;;  %s887_s3 = inlined_call_operand.vmem [shape: bf16[64,128], index: 3, kind: input, shape index: {}]   ;;  %s888_s4 = inlined_call_operand.vmem [shape: bf16[64,128], index: 4, kind: output, shape index: {}]  }
   0x1   :  { %v674_v0 = vld [vmem:[%s884_s1 + $0x40] sm:$0xff]   ;;  %v676_v2 = vld [vmem:[%s884_s1 + $0x48] sm:$0xff]   ;;  %v679_v5 = vld [vmem:[%s884_s1 + $0x50] sm:$0xff]  }
   0x2   :  { %v675_v1 = vld [vmem:[%s884_s1] sm:$0xff]   ;;  %598 = vmatprep.subr.bf16.mxu0 %v674_v0  ;;  %v678_v4 = vld [vmem:[%s884_s1 + $0x8] sm:$0xff]   ;;  %v681_v7 = vld [vmem:[%s884_s1 + $0x10] sm:$0xff]  }
   0x3   :  { %599 = vmatpush3.bf16.msra.mxu0 %v675_v1  ;;  %v677_v3 = vld [vmem:[%s884_s1 + $0x80] sm:$0xff]   ;;  %v680_v6 = vld [vmem:[%s884_s1 + $0x88] sm:$0xff]   ;;  %v682_v8 = vld [vmem:[%s884_s1 + $0x58] sm:$0xff]  }
   0x4   :  { %600 = vmatprep.subr.bf16.mxu0 %v676_v2  ;;  %650 = vmatprep.subr.bf16.mxu1 %v677_v3  ;;  %v683_v9 = vld [vmem:[%s884_s1 + $0x90] sm:$0xff]   ;;  %v684_v10 = vld [vmem:[%s884_s1 + $0x18] sm:$0xff]   ;;  %v685_v11 = vld [vmem:[%s884_s1 + $0x60] sm:$0xff]  }
   0x5   :  { %651 = vmatpush3.bf16.msra.mxu1 %v677_v3  ;;  %v686_v12 = vld [vmem:[%s884_s1 + $0x98] sm:$0xff]   ;;  %v687_v13 = vld [vmem:[%s884_s1 + $0x20] sm:$0xff]   ;;  %v688_v15 = vld [vmem:[%s884_s1 + $0x68] sm:$0xff]  }
   0x6   :  { %652 = vmatprep.subr.bf16.mxu1 %v680_v6  ;;  %v689_v14 = vld [vmem:[%s884_s1 + $0xa0] sm:$0xff]   ;;  %v690_v16 = vld [vmem:[%s884_s1 + $0x28] sm:$0xff]   ;;  %v691_v18 = vld [vmem:[%s884_s1 + $0x70] sm:$0xff]  }
   0x7   :  { %601 = vmatpush3.bf16.msra.mxu0 %v678_v4  ;;  %v692_v17 = vld [vmem:[%s884_s1 + $0xa8] sm:$0xff]   ;;  %v693_v19 = vld [vmem:[%s884_s1 + $0x30] sm:$0xff]   ;;  %v694_v20 = vld [vmem:[%s884_s1 + $0x78] sm:$0xff]  }
   0x8   :  { %602 = vmatprep.subr.bf16.mxu0 %v679_v5  ;;  %v695_v21 = vld [vmem:[%s884_s1 + $0xb0] sm:$0xff]   ;;  %v696_v23 = vld [vmem:[%s884_s1 + $0x38] sm:$0xff]   ;;  %v697_v26 = vld [vmem:[%s885_s0] ss:$12 sps:$4 sm:$0xff]  }
   0x9   :  { %653 = vmatpush3.bf16.msra.mxu1 %v680_v6  ;;  %v699_v22 = vld [vmem:[%s885_s0 + $0x4] ss:$12 sps:$4 sm:$0xff]   ;;  %v701_v24 = vld [vmem:[%s885_s0 + $0x8] ss:$12 sps:$4 sm:$0xff]   ;;  %v700_v25 = vld [vmem:[%s884_s1 + $0xb8] sm:$0xff]  }
   0xa   :  { %654 = vmatprep.subr.bf16.mxu1 %v683_v9  ;;  %329 = vmatprep.mubr.bf16.mxu0 %v699_v22  ;;  %v703_v27 = vld [vmem:[%s885_s0 + $0x1c] ss:$12 sps:$4 sm:$0xff]   ;;  %v702_v28 = vld [vmem:[%s885_s0 + $0x20] ss:$12 sps:$4 sm:$0xff]   ;;  %v709_v29 = vld [vmem:[%s885_s0 + $0x38] ss:$12 sps:$4 sm:$0xff]  }
   0xb   :  { %603 = vmatpush3.bf16.msra.mxu0 %v681_v7  ;;  %666 = vmatprep.mubr.bf16.mxu1 %v701_v24  ;;  %v705_v30 = vld [vmem:[%s885_s0 + $0x18] ss:$12 sps:$4 sm:$0xff]   ;;  %v706_v31 = vld [vmem:[%s885_s0 + $0x34] ss:$12 sps:$4 sm:$0xff]   ;;  %v710_v32 = vld [vmem:[%s885_s0 + $0x50] ss:$12 sps:$4 sm:$0xff]  }
   0xc   :  { %604 = vmatprep.subr.bf16.mxu0 %v682_v8  ;;  %v708_v33 = vld [vmem:[%s885_s0 + $0x30] ss:$12 sps:$4 sm:$0xff]   ;;  %v711_v34 = vld [vmem:[%s885_s0 + $0x4c] ss:$12 sps:$4 sm:$0xff]   ;;  %v713_v35 = vld [vmem:[%s885_s0 + $0x48] ss:$12 sps:$4 sm:$0xff]  }
   0xd   :  { %655 = vmatpush3.bf16.msra.mxu1 %v683_v9  ;;  %v850_v38 = vld [vmem:[%s886_s2] ss:$0 sm:$0xff]  ;;  %v592_v56 = vld [vmem:[%s887_s3 + $0x8] sm:$0xff]  }
   0xe   :  { %656 = vmatprep.subr.bf16.mxu1 %v686_v12  ;;  %v557_v39 = vld [vmem:[%s887_s3] sm:$0xff]   ;;  %v562_v61 = vunpack.c.l.bf16 %v592_v56  ;;  %v563_v9 = vunpack.c.h.bf16 %v592_v56 }
   0xf   :  { %605 = vmatpush3.bf16.msra.mxu0 %v684_v10  ;;  %v558_v47 = vunpack.c.l.bf16 %v557_v39  ;;  %v559_v52 = vunpack.c.h.bf16 %v557_v39 }
  0x10   :  { %606 = vmatprep.subr.bf16.mxu0 %v685_v11 }
  0x11   :  { %657 = vmatpush3.bf16.msra.mxu1 %v686_v12 }
  0x12   :  { %658 = vmatprep.subr.bf16.mxu1 %v689_v14 }
  0x13   :  { %607 = vmatpush3.bf16.msra.mxu0 %v687_v13 }
  0x14   :  { %608 = vmatprep.subr.bf16.mxu0 %v688_v15 }
  0x15   :  { %659 = vmatpush3.bf16.msra.mxu1 %v689_v14  ;;  %v593_v14 = vld [vmem:[%s887_s3 + $0x10] sm:$0xff]  }
  0x16   :  { %660 = vmatprep.subr.bf16.mxu1 %v692_v17 }
  0x17   :  { %609 = vmatpush3.bf16.msra.mxu0 %v690_v16 }
  0x18   :  { %610 = vmatprep.subr.bf16.mxu0 %v691_v18 }
  0x19   :  { %661 = vmatpush3.bf16.msra.mxu1 %v692_v17 }
  0x1a   :  { %662 = vmatprep.subr.bf16.mxu1 %v695_v21 }
  0x1b   :  { %611 = vmatpush3.bf16.msra.mxu0 %v693_v19 }
  0x1c   :  { %612 = vmatprep.subr.bf16.mxu0 %v694_v20  ;;  %v566_v20 = vunpack.c.l.bf16 %v593_v14 }
  0x1d   :  { %663 = vmatpush3.bf16.msra.mxu1 %v695_v21 }
  0x1e   :  { %664 = vmatprep.subr.bf16.mxu1 %v700_v25 }
  0x1f   :  { %613 = vmatpush3.bf16.msra.mxu0 %v696_v23 }
  0x21   :  { %665 = vmatpush3.bf16.msra.mxu1 %v700_v25 }
  0x22   :  { %330 = vmatmul.mubr.bf16.vlgmr.msra.gmra.mrb[0].mxu0 %v697_v26 }
  0x23   :  { %337 = vmatprep.mubr.bf16.mxu0 %v703_v27 }
  0x24   :  { %667 = vmatmul.mubr.bf16.vlgmr.msra.gmra.mrb[0].mxu1 %v702_v28  ;;  %v567_v28 = vunpack.c.h.bf16 %v593_v14 }
  0x25   :  { %670 = vmatprep.mubr.bf16.mxu1 %v709_v29 }
  0x2a   :  { %338 = vmatmul.mubr.bf16.gmra.mrb[4].mxu0 %v705_v30 }
  0x2b   :  { %345 = vmatprep.mubr.bf16.mxu0 %v706_v31 }
  0x2c   :  { %671 = vmatmul.mubr.bf16.gmra.mrb[4].mxu1 %v710_v32  ;;  %v594_v32 = vld [vmem:[%s887_s3 + $0x18] sm:$0xff]  }
  0x32   :  { %346 = vmatmul.mubr.bf16.gmra.mrb[8].mxu0 %v708_v33 }
  0x33   :  { %353 = vmatprep.mubr.bf16.mxu0 %v711_v34 }
  0x3a   :  { %354 = vmatmul.mubr.bf16.gmra.mrb[12].mxu0 %v713_v35 }
  0xf5   :  { %v614_v36 = vpop.f32.mrb[0].mxu0 }
  0xf6   :  { %v615_v37 = vpop.f32.mrb[1].mxu0 }
  0xf7   :  { %v616_v40 = vadd.f32 %v615_v37, %v614_v36  ;;  %v617_v41 = vpop.f32.mrb[2].mxu0  ;;  %v668_v43 = vpop.f32.mrb[0].mxu1  ;;  %v570_v37 = vunpack.c.l.bf16 %v594_v32 }
  0xf8   :  { %v618_v42 = vpop.f32.mrb[3].mxu0  ;;  %v396_v46 = vpop.f32.mrb[1].mxu1 }
  0xf9   :  { %v619_v44 = vadd.f32 %v618_v42, %v617_v41  ;;  %v332_v45 = vadd.f32 %v616_v40, %v850_v38  ;;  %v669_v48 = vpop.f32.mrb[2].mxu1 }
  0xfa   :  { %v399_v51 = vpop.f32.mrb[3].mxu1 }
  0xfb   :  { %v397_v49 = vadd.f32 %v396_v46, %v332_v45  ;;  %v335_v50 = vadd.f32 %v619_v44, %v850_v38 }
  0xfd   :  { %v443_v53 = vadd.f32 %v558_v47, %v397_v49  ;;  %v400_v54 = vadd.f32 %v399_v51, %v335_v50  ;;  %v620_v55 = vpop.f32.mrb[4].mxu0  ;;  %v571_v47 = vunpack.c.h.bf16 %v594_v32 }
  0xfe   :  { %v621_v57 = vpop.f32.mrb[5].mxu0 }
  0xff   :  { %v444_v58 = vadd.f32 %v559_v52, %v400_v54  ;;  %v622_v59 = vadd.f32 %v621_v57, %v620_v55  ;;  %v623_v60 = vpop.f32.mrb[6].mxu0  ;;  %v672_v63 = vpop.f32.mrb[4].mxu1  ;;  %v451_v0 = vmax.f32 %v443_v53, 0.0 }
 0x100   :  { %v624_v62 = vpop.f32.mrb[7].mxu0  ;;  %v412_v4 = vpop.f32.mrb[5].mxu1 }
 0x101   :  { %v452_v1 = vmax.f32 %v444_v58, 0.0  ;;  %v340_v2 = vadd.f32 %v622_v59, %v850_v38  ;;  %v625_v3 = vadd.f32 %v624_v62, %v623_v60  ;;  %v673_v5 = vpop.f32.mrb[6].mxu1 }
 0x102   :  { %v415_v10 = vpop.f32.mrb[7].mxu1 }
 0x103   :  { %v575_v6 = vpack.c.bf16 %v452_v1, %v451_v0  ;;  %v405_v7 = vadd.f32 %v668_v43, %v340_v2  ;;  %v343_v8 = vadd.f32 %v625_v3, %v850_v38 }
 0x105   :  { %576 = vst [vmem:[%s888_s4] sm:$0xff] %v575_v6   ;;  %v445_v11 = vadd.f32 %v562_v61, %v405_v7  ;;  %v408_v12 = vadd.f32 %v669_v48, %v343_v8  ;;  %v626_v13 = vpop.f32.mrb[8].mxu0 }
 0x106   :  { %v627_v15 = vpop.f32.mrb[9].mxu0 }
 0x107   :  { %v446_v16 = vadd.f32 %v563_v9, %v408_v12  ;;  %v628_v17 = vadd.f32 %v627_v15, %v626_v13  ;;  %v629_v18 = vpop.f32.mrb[10].mxu0  ;;  %v453_v21 = vmax.f32 %v445_v11, 0.0 }
 0x108   :  { %v630_v19 = vpop.f32.mrb[11].mxu0 }
 0x109   :  { %v454_v22 = vmax.f32 %v446_v16, 0.0  ;;  %v631_v23 = vadd.f32 %v630_v19, %v629_v18  ;;  %v348_v24 = vadd.f32 %v628_v17, %v850_v38 }
 0x10b   :  { %v580_v25 = vpack.c.bf16 %v454_v22, %v453_v21  ;;  %v413_v26 = vadd.f32 %v412_v4, %v348_v24  ;;  %v351_v27 = vadd.f32 %v631_v23, %v850_v38 }
 0x10d   :  { %595 = vst [vmem:[%s888_s4 + $0x8] sm:$0xff] %v580_v25   ;;  %v447_v29 = vadd.f32 %v566_v20, %v413_v26  ;;  %v416_v30 = vadd.f32 %v415_v10, %v351_v27  ;;  %v632_v31 = vpop.f32.mrb[12].mxu0 }
 0x10e   :  { %v633_v33 = vpop.f32.mrb[13].mxu0 }
 0x10f   :  { %v448_v34 = vadd.f32 %v567_v28, %v416_v30  ;;  %v634_v35 = vadd.f32 %v633_v33, %v632_v31  ;;  %v635_v36 = vpop.f32.mrb[14].mxu0  ;;  %v455_v40 = vmax.f32 %v447_v29, 0.0 }
 0x110   :  { %v636_v39 = vpop.f32.mrb[15].mxu0 }
 0x111   :  { %v456_v41 = vmax.f32 %v448_v34, 0.0  ;;  %v356_v42 = vadd.f32 %v634_v35, %v850_v38  ;;  %v637_v43 = vadd.f32 %v636_v39, %v635_v36 }
 0x113   :  { %v585_v44 = vpack.c.bf16 %v456_v41, %v455_v40  ;;  %v421_v45 = vadd.f32 %v672_v63, %v356_v42  ;;  %v359_v46 = vadd.f32 %v637_v43, %v850_v38 }
 0x115   :  { %596 = vst [vmem:[%s888_s4 + $0x10] sm:$0xff] %v585_v44   ;;  %v449_v48 = vadd.f32 %v570_v37, %v421_v45  ;;  %v424_v49 = vadd.f32 %v673_v5, %v359_v46 }
 0x117   :  { %v450_v50 = vadd.f32 %v571_v47, %v424_v49  ;;  %v457_v51 = vmax.f32 %v449_v48, 0.0 }
 0x119   :  { %v458_v52 = vmax.f32 %v450_v50, 0.0 }
 0x11b   :  { %v590_v53 = vpack.c.bf16 %v458_v52, %v457_v51 }
 0x11d   :  { %597 = vst [vmem:[%s888_s4 + $0x18] sm:$0xff] %v590_v53  }

// kernel: _lambda_.41
= control target key start
LH: loop header
LB: loop body
LE: loop exit
PB: predicated region body
PF: predicated region fallthrough
CT: control target
= control target key end

     0   :  { %s1232_s1 = inlined_call_operand.vmem [shape: bf16[640,128], index: 1, kind: input, shape index: {}]   ;;  %s1233_s0 = inlined_call_operand.vmem [shape: bf16[64,640], index: 0, kind: input, shape index: {}]   ;;  %s1234_s2 = inlined_call_operand.vmem [shape: f32[1,128], index: 2, kind: input, shape index: {}]   ;;  %s1235_s3 = inlined_call_operand.vmem [shape: bf16[64,128], index: 3, kind: output, shape index: {}]  }
   0x1   :  { %v949_v0 = vld [vmem:[%s1232_s1 + $0x40] sm:$0xff]   ;;  %v953_v4 = vld [vmem:[%s1232_s1 + $0x48] sm:$0xff]   ;;  %v957_v8 = vld [vmem:[%s1232_s1 + $0x50] sm:$0xff]  }
   0x2   :  { %v950_v1 = vld [vmem:[%s1232_s1 + $0xc0] sm:$0xff]   ;;  %817 = vmatprep.subr.bf16.mxu0 %v949_v0  ;;  %v954_v5 = vld [vmem:[%s1232_s1 + $0xc8] sm:$0xff]   ;;  %v958_v9 = vld [vmem:[%s1232_s1 + $0xd0] sm:$0xff]  }
   0x3   :  { %v951_v2 = vld [vmem:[%s1232_s1] sm:$0xff]   ;;  %857 = vmatprep.subr.bf16.mxu1 %v950_v1  ;;  %v955_v6 = vld [vmem:[%s1232_s1 + $0x8] sm:$0xff]   ;;  %v959_v10 = vld [vmem:[%s1232_s1 + $0x10] sm:$0xff]  }
   0x4   :  { %v952_v3 = vld [vmem:[%s1232_s1 + $0x80] sm:$0xff]   ;;  %818 = vmatpush3.bf16.msra.mxu0 %v951_v2  ;;  %v956_v7 = vld [vmem:[%s1232_s1 + $0x88] sm:$0xff]   ;;  %v960_v11 = vld [vmem:[%s1232_s1 + $0x90] sm:$0xff]  }
   0x5   :  { %858 = vmatpush3.bf16.msra.mxu1 %v952_v3  ;;  %819 = vmatprep.subr.bf16.mxu0 %v953_v4  ;;  %v961_v12 = vld [vmem:[%s1232_s1 + $0x58] sm:$0xff]   ;;  %v965_v16 = vld [vmem:[%s1232_s1 + $0x60] sm:$0xff]   ;;  %v969_v20 = vld [vmem:[%s1232_s1 + $0x68] sm:$0xff]  }
   0x6   :  { %859 = vmatprep.subr.bf16.mxu1 %v954_v5  ;;  %v962_v13 = vld [vmem:[%s1232_s1 + $0xd8] sm:$0xff]   ;;  %v966_v17 = vld [vmem:[%s1232_s1 + $0xe0] sm:$0xff]   ;;  %v970_v21 = vld [vmem:[%s1232_s1 + $0xe8] sm:$0xff]  }
   0x7   :  { %v963_v14 = vld [vmem:[%s1232_s1 + $0x18] sm:$0xff]   ;;  %v967_v18 = vld [vmem:[%s1232_s1 + $0x20] sm:$0xff]   ;;  %v971_v22 = vld [vmem:[%s1232_s1 + $0x28] sm:$0xff]  }
   0x8   :  { %820 = vmatpush3.bf16.msra.mxu0 %v955_v6  ;;  %v964_v15 = vld [vmem:[%s1232_s1 + $0x98] sm:$0xff]   ;;  %v968_v19 = vld [vmem:[%s1232_s1 + $0xa0] sm:$0xff]   ;;  %v972_v23 = vld [vmem:[%s1232_s1 + $0xa8] sm:$0xff]  }
   0x9   :  { %860 = vmatpush3.bf16.msra.mxu1 %v956_v7  ;;  %821 = vmatprep.subr.bf16.mxu0 %v957_v8  ;;  %v973_v24 = vld [vmem:[%s1232_s1 + $0x70] sm:$0xff]   ;;  %v977_v28 = vld [vmem:[%s1232_s1 + $0x78] sm:$0xff]   ;;  %v986_v35 = vld [vmem:[%s1233_s0 + $0xc] ss:$20 sps:$4 sm:$0xff]  }
   0xa   :  { %861 = vmatprep.subr.bf16.mxu1 %v958_v9  ;;  %v974_v25 = vld [vmem:[%s1232_s1 + $0xf0] sm:$0xff]   ;;  %v978_v29 = vld [vmem:[%s1232_s1 + $0xf8] sm:$0xff]   ;;  %v987_v36 = vld [vmem:[%s1232_s1 + $0x100] sm:$0xff]   ;;  %567 = vmatprep.mubr.bf16.mxu1 %v986_v35 }
   0xb   :  { %v975_v26 = vld [vmem:[%s1232_s1 + $0x30] sm:$0xff]   ;;  %v979_v30 = vld [vmem:[%s1232_s1 + $0x38] sm:$0xff]   ;;  %v988_v37 = vld [vmem:[%s1232_s1 + $0x108] sm:$0xff]  }
   0xc   :  { %822 = vmatpush3.bf16.msra.mxu0 %v959_v10  ;;  %v976_v27 = vld [vmem:[%s1232_s1 + $0xb0] sm:$0xff]   ;;  %v980_v31 = vld [vmem:[%s1232_s1 + $0xb8] sm:$0xff]   ;;  %v989_v38 = vld [vmem:[%s1233_s0 + $0x2c] ss:$20 sps:$4 sm:$0xff]  }
   0xd   :  { %862 = vmatpush3.bf16.msra.mxu1 %v960_v11  ;;  %823 = vmatprep.subr.bf16.mxu0 %v961_v12  ;;  %v981_v32 = vld [vmem:[%s1233_s0] ss:$20 sps:$4 sm:$0xff]   ;;  %v983_v33 = vld [vmem:[%s1233_s0 + $0x4] ss:$20 sps:$4 sm:$0xff]   ;;  %v984_v34 = vld [vmem:[%s1233_s0 + $0x8] ss:$20 sps:$4 sm:$0xff]  }
   0xe   :  { %863 = vmatprep.subr.bf16.mxu1 %v962_v13  ;;  %502 = vmatprep.mubr.bf16.mxu0 %v983_v33  ;;  %v991_v39 = vld [vmem:[%s1233_s0 + $0x34] ss:$20 sps:$4 sm:$0xff]   ;;  %v994_v42 = vld [vmem:[%s1233_s0 + $0x30] ss:$20 sps:$4 sm:$0xff]   ;;  %v996_v44 = vld [vmem:[%s1232_s1 + $0x118] sm:$0xff]  }
   0xf   :  { %v993_v40 = vld [vmem:[%s1233_s0 + $0x28] ss:$20 sps:$4 sm:$0xff]   ;;  %v995_v41 = vld [vmem:[%s1232_s1 + $0x110] sm:$0xff]   ;;  %v1003_v46 = vld [vmem:[%s1232_s1 + $0x120] sm:$0xff]  }
  0x10   :  { %824 = vmatpush3.bf16.msra.mxu0 %v963_v14  ;;  %v997_v43 = vld [vmem:[%s1233_s0 + $0x54] ss:$20 sps:$4 sm:$0xff]   ;;  %v999_v45 = vld [vmem:[%s1233_s0 + $0x5c] ss:$20 sps:$4 sm:$0xff]   ;;  %v1002_v48 = vld [vmem:[%s1233_s0 + $0x58] ss:$20 sps:$4 sm:$0xff]  }
  0x11   :  { %864 = vmatpush3.bf16.msra.mxu1 %v964_v15  ;;  %825 = vmatprep.subr.bf16.mxu0 %v965_v16  ;;  %v1001_v47 = vld [vmem:[%s1233_s0 + $0x50] ss:$20 sps:$4 sm:$0xff]   ;;  %v1004_v51 = vld [vmem:[%s1232_s1 + $0x128] sm:$0xff]   ;;  %v1010_v54 = vld [vmem:[%s1233_s0 + $0x80] ss:$20 sps:$4 sm:$0xff]  }
  0x12   :  { %865 = vmatprep.subr.bf16.mxu1 %v966_v17  ;;  %v1005_v49 = vld [vmem:[%s1233_s0 + $0x7c] ss:$20 sps:$4 sm:$0xff]   ;;  %v1007_v50 = vld [vmem:[%s1233_s0 + $0x84] ss:$20 sps:$4 sm:$0xff]   ;;  %v1014_v56 = vld [vmem:[%s1233_s0 + $0x60] ss:$20 sps:$4 sm:$0xff]  }
  0x13   :  { %v1011_v52 = vld [vmem:[%s1232_s1 + $0x130] sm:$0xff]   ;;  %v1009_v53 = vld [vmem:[%s1233_s0 + $0x78] ss:$20 sps:$4 sm:$0xff]   ;;  %v1016_v59 = vld [vmem:[%s1233_s0 + $0x88] ss:$20 sps:$4 sm:$0xff]  }
  0x14   :  { %826 = vmatpush3.bf16.msra.mxu0 %v967_v18  ;;  %v1013_v55 = vld [vmem:[%s1233_s0 + $0x10] ss:$20 sps:$4 sm:$0xff]   ;;  %v1012_v57 = vld [vmem:[%s1232_s1 + $0x138] sm:$0xff]   ;;  %v717_v62 = vld [vmem:[%s1234_s2] ss:$0 sm:$0xff] }
  0x15   :  { %866 = vmatpush3.bf16.msra.mxu1 %v968_v19  ;;  %827 = vmatprep.subr.bf16.mxu0 %v969_v20  ;;  %v1015_v58 = vld [vmem:[%s1233_s0 + $0x38] ss:$20 sps:$4 sm:$0xff]  }
  0x16   :  { %867 = vmatprep.subr.bf16.mxu1 %v970_v21 }
  0x18   :  { %828 = vmatpush3.bf16.msra.mxu0 %v971_v22 }
  0x19   :  { %868 = vmatpush3.bf16.msra.mxu1 %v972_v23  ;;  %829 = vmatprep.subr.bf16.mxu0 %v973_v24 }
  0x1a   :  { %869 = vmatprep.subr.bf16.mxu1 %v974_v25 }
  0x1c   :  { %830 = vmatpush3.bf16.msra.mxu0 %v975_v26 }
  0x1d   :  { %870 = vmatpush3.bf16.msra.mxu1 %v976_v27  ;;  %831 = vmatprep.subr.bf16.mxu0 %v977_v28 }
  0x1e   :  { %871 = vmatprep.subr.bf16.mxu1 %v978_v29 }
  0x20   :  { %832 = vmatpush3.bf16.msra.mxu0 %v979_v30 }
  0x21   :  { %872 = vmatpush3.bf16.msra.mxu1 %v980_v31  ;;  %909 = vmatprep.subr.bf16.mxu0 %v987_v36 }
  0x22   :  { %933 = vmatprep.subr.bf16.mxu1 %v987_v36 }
  0x23   :  { %503 = vmatmul.mubr.bf16.vlgmr.msra.gmra.mrb[0].mxu0 %v981_v32 }
  0x24   :  { %568 = vmatmul.mubr.bf16.vlgmr.msra.gmra.mrb[0].mxu1 %v984_v34  ;;  %910 = vmatpush3.bf16.msra.mxu0 %v987_v36 }
  0x25   :  { %941 = vmatpush3.bf16.msra.mxu1 %v987_v36  ;;  %911 = vmatprep.subr.bf16.mxu0 %v988_v37 }
  0x26   :  { %934 = vmatprep.subr.bf16.mxu1 %v988_v37  ;;  %510 = vmatprep.mubr.bf16.mxu0 %v989_v38 }
  0x27   :  { %575 = vmatprep.mubr.bf16.mxu1 %v991_v39 }
  0x28   :  { %912 = vmatpush3.bf16.msra.mxu0 %v988_v37 }
  0x29   :  { %942 = vmatpush3.bf16.msra.mxu1 %v988_v37  ;;  %913 = vmatprep.subr.bf16.mxu0 %v995_v41 }
  0x2a   :  { %935 = vmatprep.subr.bf16.mxu1 %v995_v41 }
  0x2b   :  { %511 = vmatmul.mubr.bf16.gmra.mrb[4].mxu0 %v993_v40 }
  0x2c   :  { %576 = vmatmul.mubr.bf16.gmra.mrb[4].mxu1 %v994_v42  ;;  %518 = vmatprep.mubr.bf16.mxu0 %v997_v43 }
  0x2d   :  { %914 = vmatpush3.bf16.msra.mxu0 %v995_v41  ;;  %583 = vmatprep.mubr.bf16.mxu1 %v999_v45 }
  0x2e   :  { %943 = vmatpush3.bf16.msra.mxu1 %v995_v41  ;;  %915 = vmatprep.subr.bf16.mxu0 %v996_v44 }
  0x2f   :  { %936 = vmatprep.subr.bf16.mxu1 %v996_v44 }
  0x31   :  { %916 = vmatpush3.bf16.msra.mxu0 %v996_v44 }
  0x32   :  { %944 = vmatpush3.bf16.msra.mxu1 %v996_v44  ;;  %917 = vmatprep.subr.bf16.mxu0 %v1003_v46 }
  0x33   :  { %519 = vmatmul.mubr.bf16.gmra.mrb[8].mxu0 %v1001_v47  ;;  %937 = vmatprep.subr.bf16.mxu1 %v1003_v46 }
  0x34   :  { %584 = vmatmul.mubr.bf16.gmra.mrb[8].mxu1 %v1002_v48  ;;  %526 = vmatprep.mubr.bf16.mxu0 %v1005_v49 }
  0x35   :  { %918 = vmatpush3.bf16.msra.mxu0 %v1003_v46  ;;  %591 = vmatprep.mubr.bf16.mxu1 %v1007_v50 }
  0x36   :  { %945 = vmatpush3.bf16.msra.mxu1 %v1003_v46  ;;  %919 = vmatprep.subr.bf16.mxu0 %v1004_v51 }
  0x37   :  { %938 = vmatprep.subr.bf16.mxu1 %v1004_v51 }
  0x39   :  { %920 = vmatpush3.bf16.msra.mxu0 %v1004_v51 }
  0x3a   :  { %946 = vmatpush3.bf16.msra.mxu1 %v1004_v51  ;;  %921 = vmatprep.subr.bf16.mxu0 %v1011_v52 }
  0x3b   :  { %527 = vmatmul.mubr.bf16.gmra.mrb[12].mxu0 %v1009_v53  ;;  %939 = vmatprep.subr.bf16.mxu1 %v1011_v52 }
  0x3c   :  { %592 = vmatmul.mubr.bf16.gmra.mrb[12].mxu1 %v1010_v54  ;;  %925 = vmatprep.mubr.bf16.mxu0 %v1013_v55 }
  0x3d   :  { %922 = vmatpush3.bf16.msra.mxu0 %v1011_v52  ;;  %929 = vmatprep.mubr.bf16.mxu1 %v1014_v56 }
  0x3e   :  { %947 = vmatpush3.bf16.msra.mxu1 %v1011_v52  ;;  %923 = vmatprep.subr.bf16.mxu0 %v1012_v57 }
  0x3f   :  { %940 = vmatprep.subr.bf16.mxu1 %v1012_v57 }
  0x41   :  { %924 = vmatpush3.bf16.msra.mxu0 %v1012_v57 }
  0x42   :  { %948 = vmatpush3.bf16.msra.mxu1 %v1012_v57 }
  0x44   :  { %926 = vmatmul.mubr.bf16.vlgmr.msra.gmra.mrb[16].mxu0 %v1015_v58 }
  0x45   :  { %930 = vmatmul.mubr.bf16.vlgmr.msra.gmra.mrb[16].mxu1 %v1016_v59 }
  0xf6   :  { %v833_v60 = vpop.f32.mrb[0].mxu0 }
  0xf7   :  { %v873_v61 = vpop.f32.mrb[0].mxu1  ;;  %v834_v63 = vpop.f32.mrb[1].mxu0 }
  0xf8   :  { %v835_v0 = vadd.f32 %v834_v63, %v833_v60  ;;  %v874_v1 = vpop.f32.mrb[1].mxu1  ;;  %v836_v2 = vpop.f32.mrb[2].mxu0 }
  0xf9   :  { %v875_v3 = vadd.f32 %v874_v1, %v873_v61  ;;  %v876_v4 = vpop.f32.mrb[2].mxu1  ;;  %v837_v5 = vpop.f32.mrb[3].mxu0 }
  0xfa   :  { %v505_v6 = vadd.f32 %v835_v0, %v717_v62  ;;  %v838_v7 = vadd.f32 %v837_v5, %v836_v2  ;;  %v877_v8 = vpop.f32.mrb[3].mxu1 }
  0xfb   :  { %v878_v9 = vadd.f32 %v877_v8, %v876_v4 }
  0xfc   :  { %v508_v10 = vadd.f32 %v838_v7, %v717_v62  ;;  %v570_v11 = vadd.f32 %v875_v3, %v505_v6 }
  0xfe   :  { %v839_v12 = vpop.f32.mrb[4].mxu0  ;;  %v573_v13 = vadd.f32 %v878_v9, %v508_v10 }
  0xff   :  { %v879_v14 = vpop.f32.mrb[4].mxu1  ;;  %v840_v15 = vpop.f32.mrb[5].mxu0 }
 0x100   :  { %v841_v16 = vadd.f32 %v840_v15, %v839_v12  ;;  %v880_v17 = vpop.f32.mrb[5].mxu1  ;;  %v842_v18 = vpop.f32.mrb[6].mxu0 }
 0x101   :  { %v881_v19 = vadd.f32 %v880_v17, %v879_v14  ;;  %v882_v20 = vpop.f32.mrb[6].mxu1  ;;  %v843_v21 = vpop.f32.mrb[7].mxu0 }
 0x102   :  { %v513_v22 = vadd.f32 %v841_v16, %v717_v62  ;;  %v844_v23 = vadd.f32 %v843_v21, %v842_v18  ;;  %v883_v24 = vpop.f32.mrb[7].mxu1 }
 0x103   :  { %v884_v25 = vadd.f32 %v883_v24, %v882_v20 }
 0x104   :  { %v516_v26 = vadd.f32 %v844_v23, %v717_v62  ;;  %v578_v27 = vadd.f32 %v881_v19, %v513_v22 }
 0x106   :  { %v845_v28 = vpop.f32.mrb[8].mxu0  ;;  %v581_v29 = vadd.f32 %v884_v25, %v516_v26 }
 0x107   :  { %v885_v30 = vpop.f32.mrb[8].mxu1  ;;  %v846_v31 = vpop.f32.mrb[9].mxu0 }
 0x108   :  { %v847_v32 = vadd.f32 %v846_v31, %v845_v28  ;;  %v886_v33 = vpop.f32.mrb[9].mxu1  ;;  %v848_v34 = vpop.f32.mrb[10].mxu0 }
 0x109   :  { %v887_v35 = vadd.f32 %v886_v33, %v885_v30  ;;  %v888_v36 = vpop.f32.mrb[10].mxu1  ;;  %v849_v37 = vpop.f32.mrb[11].mxu0 }
 0x10a   :  { %v521_v38 = vadd.f32 %v847_v32, %v717_v62  ;;  %v850_v39 = vadd.f32 %v849_v37, %v848_v34  ;;  %v889_v40 = vpop.f32.mrb[11].mxu1 }
 0x10b   :  { %v890_v41 = vadd.f32 %v889_v40, %v888_v36 }
 0x10c   :  { %v524_v42 = vadd.f32 %v850_v39, %v717_v62  ;;  %v586_v43 = vadd.f32 %v887_v35, %v521_v38 }
 0x10e   :  { %v851_v44 = vpop.f32.mrb[12].mxu0  ;;  %v589_v45 = vadd.f32 %v890_v41, %v524_v42 }
 0x10f   :  { %v891_v46 = vpop.f32.mrb[12].mxu1  ;;  %v852_v47 = vpop.f32.mrb[13].mxu0 }
 0x110   :  { %v853_v48 = vadd.f32 %v852_v47, %v851_v44  ;;  %v892_v49 = vpop.f32.mrb[13].mxu1  ;;  %v854_v50 = vpop.f32.mrb[14].mxu0 }
 0x111   :  { %v893_v51 = vadd.f32 %v892_v49, %v891_v46  ;;  %v894_v52 = vpop.f32.mrb[14].mxu1  ;;  %v855_v53 = vpop.f32.mrb[15].mxu0 }
 0x112   :  { %v529_v54 = vadd.f32 %v853_v48, %v717_v62  ;;  %v856_v55 = vadd.f32 %v855_v53, %v854_v50  ;;  %v895_v56 = vpop.f32.mrb[15].mxu1 }
 0x113   :  { %v896_v57 = vadd.f32 %v895_v56, %v894_v52 }
 0x114   :  { %v532_v58 = vadd.f32 %v856_v55, %v717_v62  ;;  %v594_v59 = vadd.f32 %v893_v51, %v529_v54 }
 0x116   :  { %v597_v60 = vadd.f32 %v896_v57, %v532_v58 }
 0x117   :  { %v927_v61 = vpop.f32.mrb[16].mxu0 }
 0x118   :  { %v643_v63 = vadd.f32 %v927_v61, %v578_v27  ;;  %v931_v0 = vpop.f32.mrb[16].mxu1  ;;  %v634_v1 = vpop.f32.mrb[17].mxu0 }
 0x119   :  { %v659_v2 = vadd.f32 %v931_v0, %v594_v59  ;;  %v635_v3 = vadd.f32 %v634_v1, %v570_v11  ;;  %v650_v4 = vpop.f32.mrb[17].mxu1  ;;  %v928_v5 = vpop.f32.mrb[18].mxu0 }
 0x11a   :  { %v651_v6 = vadd.f32 %v650_v4, %v586_v43  ;;  %v646_v7 = vadd.f32 %v928_v5, %v581_v29  ;;  %v932_v8 = vpop.f32.mrb[18].mxu1  ;;  %v637_v9 = vpop.f32.mrb[19].mxu0  ;;  %v667_v15 = vmax.f32 %v643_v63, 0.0 }
 0x11b   :  { %v662_v10 = vadd.f32 %v932_v8, %v597_v60  ;;  %v638_v12 = vadd.f32 %v637_v9, %v573_v13  ;;  %v653_v14 = vpop.f32.mrb[19].mxu1  ;;  %v671_v17 = vmax.f32 %v659_v2, 0.0  ;;  %v665_v18 = vmax.f32 %v635_v3, 0.0 }
 0x11c   :  { %v668_v16 = vmax.f32 %v646_v7, 0.0  ;;  %v654_v62 = vadd.f32 %v653_v14, %v589_v45  ;;  %v669_v21 = vmax.f32 %v651_v6, 0.0 }
 0x11d   :  { %v672_v19 = vmax.f32 %v662_v10, 0.0  ;;  %v666_v20 = vmax.f32 %v638_v12, 0.0 }
 0x11e   :  { %v802_v22 = vpack.c.bf16 %v668_v16, %v667_v15  ;;  %v670_v23 = vmax.f32 %v654_v62, 0.0 }
 0x11f   :  { %v812_v11 = vpack.c.bf16 %v672_v19, %v671_v17  ;;  %v797_v24 = vpack.c.bf16 %v666_v20, %v665_v18 }
 0x120   :  { %814 = vst [vmem:[%s1235_s3 + $0x8] sm:$0xff] %v802_v22   ;;  %v807_v25 = vpack.c.bf16 %v670_v23, %v669_v21 }
 0x121   :  { %816 = vst [vmem:[%s1235_s3 + $0x18] sm:$0xff] %v812_v11   ;;  %798 = vst [vmem:[%s1235_s3] sm:$0xff] %v797_v24  }
 0x122   :  { %815 = vst [vmem:[%s1235_s3 + $0x10] sm:$0xff] %v807_v25  }

// kernel: _lambda_.40
= control target key start
LH: loop header
LB: loop body
LE: loop exit
PB: predicated region body
PF: predicated region fallthrough
CT: control target
= control target key end

     0   :  { %s1301_s1 = inlined_call_operand.vmem [shape: bf16[640,128], index: 1, kind: input, shape index: {}]   ;;  %s1302_s0 = inlined_call_operand.vmem [shape: bf16[64,640], index: 0, kind: input, shape index: {}]   ;;  %s1303_s2 = inlined_call_operand.vmem [shape: f32[1,128], index: 2, kind: input, shape index: {}]   ;;  %s1304_s3 = inlined_call_operand.vmem [shape: bf16[64,128], index: 3, kind: input, shape index: {}]   ;;  %s1305_s4 = inlined_call_operand.vmem [shape: bf16[64,128], index: 4, kind: output, shape index: {}]  }
   0x1   :  { %v995_v0 = vld [vmem:[%s1301_s1 + $0x40] sm:$0xff]   ;;  %v999_v4 = vld [vmem:[%s1301_s1 + $0x48] sm:$0xff]   ;;  %v1003_v8 = vld [vmem:[%s1301_s1 + $0x50] sm:$0xff]  }
   0x2   :  { %v996_v1 = vld [vmem:[%s1301_s1 + $0xc0] sm:$0xff]   ;;  %863 = vmatprep.subr.bf16.mxu0 %v995_v0  ;;  %v1000_v5 = vld [vmem:[%s1301_s1 + $0xc8] sm:$0xff]   ;;  %v1004_v9 = vld [vmem:[%s1301_s1 + $0xd0] sm:$0xff]  }
   0x3   :  { %v997_v2 = vld [vmem:[%s1301_s1] sm:$0xff]   ;;  %903 = vmatprep.subr.bf16.mxu1 %v996_v1  ;;  %v1001_v6 = vld [vmem:[%s1301_s1 + $0x8] sm:$0xff]   ;;  %v1005_v10 = vld [vmem:[%s1301_s1 + $0x10] sm:$0xff]  }
   0x4   :  { %v998_v3 = vld [vmem:[%s1301_s1 + $0x80] sm:$0xff]   ;;  %864 = vmatpush3.bf16.msra.mxu0 %v997_v2  ;;  %v1002_v7 = vld [vmem:[%s1301_s1 + $0x88] sm:$0xff]   ;;  %v1006_v11 = vld [vmem:[%s1301_s1 + $0x90] sm:$0xff]  }
   0x5   :  { %904 = vmatpush3.bf16.msra.mxu1 %v998_v3  ;;  %865 = vmatprep.subr.bf16.mxu0 %v999_v4  ;;  %v1007_v12 = vld [vmem:[%s1301_s1 + $0x58] sm:$0xff]   ;;  %v1011_v16 = vld [vmem:[%s1301_s1 + $0x60] sm:$0xff]   ;;  %v1015_v20 = vld [vmem:[%s1301_s1 + $0x68] sm:$0xff]  }
   0x6   :  { %905 = vmatprep.subr.bf16.mxu1 %v1000_v5  ;;  %v1008_v13 = vld [vmem:[%s1301_s1 + $0xd8] sm:$0xff]   ;;  %v1012_v17 = vld [vmem:[%s1301_s1 + $0xe0] sm:$0xff]   ;;  %v1016_v21 = vld [vmem:[%s1301_s1 + $0xe8] sm:$0xff]  }
   0x7   :  { %v1009_v14 = vld [vmem:[%s1301_s1 + $0x18] sm:$0xff]   ;;  %v1013_v18 = vld [vmem:[%s1301_s1 + $0x20] sm:$0xff]   ;;  %v1017_v22 = vld [vmem:[%s1301_s1 + $0x28] sm:$0xff]  }
   0x8   :  { %866 = vmatpush3.bf16.msra.mxu0 %v1001_v6  ;;  %v1010_v15 = vld [vmem:[%s1301_s1 + $0x98] sm:$0xff]   ;;  %v1014_v19 = vld [vmem:[%s1301_s1 + $0xa0] sm:$0xff]   ;;  %v1018_v23 = vld [vmem:[%s1301_s1 + $0xa8] sm:$0xff]  }
   0x9   :  { %906 = vmatpush3.bf16.msra.mxu1 %v1002_v7  ;;  %867 = vmatprep.subr.bf16.mxu0 %v1003_v8  ;;  %v1019_v24 = vld [vmem:[%s1301_s1 + $0x70] sm:$0xff]   ;;  %v1023_v28 = vld [vmem:[%s1301_s1 + $0x78] sm:$0xff]   ;;  %v1032_v35 = vld [vmem:[%s1302_s0 + $0xc] ss:$20 sps:$4 sm:$0xff]  }
   0xa   :  { %907 = vmatprep.subr.bf16.mxu1 %v1004_v9  ;;  %v1020_v25 = vld [vmem:[%s1301_s1 + $0xf0] sm:$0xff]   ;;  %v1024_v29 = vld [vmem:[%s1301_s1 + $0xf8] sm:$0xff]   ;;  %v1033_v36 = vld [vmem:[%s1301_s1 + $0x100] sm:$0xff]   ;;  %570 = vmatprep.mubr.bf16.mxu1 %v1032_v35 }
   0xb   :  { %v1021_v26 = vld [vmem:[%s1301_s1 + $0x30] sm:$0xff]   ;;  %v1025_v30 = vld [vmem:[%s1301_s1 + $0x38] sm:$0xff]   ;;  %v1034_v37 = vld [vmem:[%s1301_s1 + $0x108] sm:$0xff]  }
   0xc   :  { %868 = vmatpush3.bf16.msra.mxu0 %v1005_v10  ;;  %v1022_v27 = vld [vmem:[%s1301_s1 + $0xb0] sm:$0xff]   ;;  %v1026_v31 = vld [vmem:[%s1301_s1 + $0xb8] sm:$0xff]   ;;  %v1035_v38 = vld [vmem:[%s1302_s0 + $0x2c] ss:$20 sps:$4 sm:$0xff]  }
   0xd   :  { %908 = vmatpush3.bf16.msra.mxu1 %v1006_v11  ;;  %869 = vmatprep.subr.bf16.mxu0 %v1007_v12  ;;  %v1027_v32 = vld [vmem:[%s1302_s0] ss:$20 sps:$4 sm:$0xff]   ;;  %v1029_v33 = vld [vmem:[%s1302_s0 + $0x4] ss:$20 sps:$4 sm:$0xff]   ;;  %v1030_v34 = vld [vmem:[%s1302_s0 + $0x8] ss:$20 sps:$4 sm:$0xff]  }
   0xe   :  { %909 = vmatprep.subr.bf16.mxu1 %v1008_v13  ;;  %505 = vmatprep.mubr.bf16.mxu0 %v1029_v33  ;;  %v1037_v39 = vld [vmem:[%s1302_s0 + $0x34] ss:$20 sps:$4 sm:$0xff]   ;;  %v1040_v42 = vld [vmem:[%s1302_s0 + $0x30] ss:$20 sps:$4 sm:$0xff]   ;;  %v1042_v44 = vld [vmem:[%s1301_s1 + $0x118] sm:$0xff]  }
   0xf   :  { %v1039_v40 = vld [vmem:[%s1302_s0 + $0x28] ss:$20 sps:$4 sm:$0xff]   ;;  %v1041_v41 = vld [vmem:[%s1301_s1 + $0x110] sm:$0xff]   ;;  %v1049_v46 = vld [vmem:[%s1301_s1 + $0x120] sm:$0xff]  }
  0x10   :  { %870 = vmatpush3.bf16.msra.mxu0 %v1009_v14  ;;  %v1043_v43 = vld [vmem:[%s1302_s0 + $0x54] ss:$20 sps:$4 sm:$0xff]   ;;  %v1045_v45 = vld [vmem:[%s1302_s0 + $0x5c] ss:$20 sps:$4 sm:$0xff]   ;;  %v1048_v48 = vld [vmem:[%s1302_s0 + $0x58] ss:$20 sps:$4 sm:$0xff]  }
  0x11   :  { %910 = vmatpush3.bf16.msra.mxu1 %v1010_v15  ;;  %871 = vmatprep.subr.bf16.mxu0 %v1011_v16  ;;  %v1047_v47 = vld [vmem:[%s1302_s0 + $0x50] ss:$20 sps:$4 sm:$0xff]   ;;  %v1050_v51 = vld [vmem:[%s1301_s1 + $0x128] sm:$0xff]   ;;  %v1056_v54 = vld [vmem:[%s1302_s0 + $0x80] ss:$20 sps:$4 sm:$0xff]  }
  0x12   :  { %911 = vmatprep.subr.bf16.mxu1 %v1012_v17  ;;  %v1051_v49 = vld [vmem:[%s1302_s0 + $0x7c] ss:$20 sps:$4 sm:$0xff]   ;;  %v1053_v50 = vld [vmem:[%s1302_s0 + $0x84] ss:$20 sps:$4 sm:$0xff]   ;;  %v1060_v56 = vld [vmem:[%s1302_s0 + $0x60] ss:$20 sps:$4 sm:$0xff]  }
  0x13   :  { %v1057_v52 = vld [vmem:[%s1301_s1 + $0x130] sm:$0xff]   ;;  %v1055_v53 = vld [vmem:[%s1302_s0 + $0x78] ss:$20 sps:$4 sm:$0xff]   ;;  %v1062_v59 = vld [vmem:[%s1302_s0 + $0x88] ss:$20 sps:$4 sm:$0xff]  }
  0x14   :  { %872 = vmatpush3.bf16.msra.mxu0 %v1013_v18  ;;  %v1059_v55 = vld [vmem:[%s1302_s0 + $0x10] ss:$20 sps:$4 sm:$0xff]   ;;  %v1058_v57 = vld [vmem:[%s1301_s1 + $0x138] sm:$0xff]   ;;  %v744_v62 = vld [vmem:[%s1303_s2] ss:$0 sm:$0xff] }
  0x15   :  { %912 = vmatpush3.bf16.msra.mxu1 %v1014_v19  ;;  %873 = vmatprep.subr.bf16.mxu0 %v1015_v20  ;;  %v1061_v58 = vld [vmem:[%s1302_s0 + $0x38] ss:$20 sps:$4 sm:$0xff]  }
  0x16   :  { %913 = vmatprep.subr.bf16.mxu1 %v1016_v21 }
  0x18   :  { %874 = vmatpush3.bf16.msra.mxu0 %v1017_v22 }
  0x19   :  { %914 = vmatpush3.bf16.msra.mxu1 %v1018_v23  ;;  %875 = vmatprep.subr.bf16.mxu0 %v1019_v24 }
  0x1a   :  { %915 = vmatprep.subr.bf16.mxu1 %v1020_v25 }
  0x1c   :  { %876 = vmatpush3.bf16.msra.mxu0 %v1021_v26 }
  0x1d   :  { %916 = vmatpush3.bf16.msra.mxu1 %v1022_v27  ;;  %877 = vmatprep.subr.bf16.mxu0 %v1023_v28 }
  0x1e   :  { %917 = vmatprep.subr.bf16.mxu1 %v1024_v29 }
  0x20   :  { %878 = vmatpush3.bf16.msra.mxu0 %v1025_v30 }
  0x21   :  { %918 = vmatpush3.bf16.msra.mxu1 %v1026_v31  ;;  %955 = vmatprep.subr.bf16.mxu0 %v1033_v36 }
  0x22   :  { %979 = vmatprep.subr.bf16.mxu1 %v1033_v36 }
  0x23   :  { %506 = vmatmul.mubr.bf16.vlgmr.msra.gmra.mrb[0].mxu0 %v1027_v32 }
  0x24   :  { %571 = vmatmul.mubr.bf16.vlgmr.msra.gmra.mrb[0].mxu1 %v1030_v34  ;;  %956 = vmatpush3.bf16.msra.mxu0 %v1033_v36 }
  0x25   :  { %987 = vmatpush3.bf16.msra.mxu1 %v1033_v36  ;;  %957 = vmatprep.subr.bf16.mxu0 %v1034_v37 }
  0x26   :  { %980 = vmatprep.subr.bf16.mxu1 %v1034_v37  ;;  %513 = vmatprep.mubr.bf16.mxu0 %v1035_v38 }
  0x27   :  { %578 = vmatprep.mubr.bf16.mxu1 %v1037_v39 }
  0x28   :  { %958 = vmatpush3.bf16.msra.mxu0 %v1034_v37 }
  0x29   :  { %988 = vmatpush3.bf16.msra.mxu1 %v1034_v37  ;;  %959 = vmatprep.subr.bf16.mxu0 %v1041_v41 }
  0x2a   :  { %981 = vmatprep.subr.bf16.mxu1 %v1041_v41 }
  0x2b   :  { %514 = vmatmul.mubr.bf16.gmra.mrb[4].mxu0 %v1039_v40 }
  0x2c   :  { %579 = vmatmul.mubr.bf16.gmra.mrb[4].mxu1 %v1040_v42  ;;  %521 = vmatprep.mubr.bf16.mxu0 %v1043_v43 }
  0x2d   :  { %960 = vmatpush3.bf16.msra.mxu0 %v1041_v41  ;;  %586 = vmatprep.mubr.bf16.mxu1 %v1045_v45 }
  0x2e   :  { %989 = vmatpush3.bf16.msra.mxu1 %v1041_v41  ;;  %961 = vmatprep.subr.bf16.mxu0 %v1042_v44 }
  0x2f   :  { %982 = vmatprep.subr.bf16.mxu1 %v1042_v44 }
  0x31   :  { %962 = vmatpush3.bf16.msra.mxu0 %v1042_v44 }
  0x32   :  { %990 = vmatpush3.bf16.msra.mxu1 %v1042_v44  ;;  %963 = vmatprep.subr.bf16.mxu0 %v1049_v46 }
  0x33   :  { %522 = vmatmul.mubr.bf16.gmra.mrb[8].mxu0 %v1047_v47  ;;  %983 = vmatprep.subr.bf16.mxu1 %v1049_v46 }
  0x34   :  { %587 = vmatmul.mubr.bf16.gmra.mrb[8].mxu1 %v1048_v48  ;;  %529 = vmatprep.mubr.bf16.mxu0 %v1051_v49 }
  0x35   :  { %964 = vmatpush3.bf16.msra.mxu0 %v1049_v46  ;;  %594 = vmatprep.mubr.bf16.mxu1 %v1053_v50 }
  0x36   :  { %991 = vmatpush3.bf16.msra.mxu1 %v1049_v46  ;;  %965 = vmatprep.subr.bf16.mxu0 %v1050_v51 }
  0x37   :  { %984 = vmatprep.subr.bf16.mxu1 %v1050_v51 }
  0x39   :  { %966 = vmatpush3.bf16.msra.mxu0 %v1050_v51 }
  0x3a   :  { %992 = vmatpush3.bf16.msra.mxu1 %v1050_v51  ;;  %967 = vmatprep.subr.bf16.mxu0 %v1057_v52 }
  0x3b   :  { %530 = vmatmul.mubr.bf16.gmra.mrb[12].mxu0 %v1055_v53  ;;  %985 = vmatprep.subr.bf16.mxu1 %v1057_v52 }
  0x3c   :  { %595 = vmatmul.mubr.bf16.gmra.mrb[12].mxu1 %v1056_v54  ;;  %971 = vmatprep.mubr.bf16.mxu0 %v1059_v55 }
  0x3d   :  { %968 = vmatpush3.bf16.msra.mxu0 %v1057_v52  ;;  %975 = vmatprep.mubr.bf16.mxu1 %v1060_v56 }
  0x3e   :  { %993 = vmatpush3.bf16.msra.mxu1 %v1057_v52  ;;  %969 = vmatprep.subr.bf16.mxu0 %v1058_v57 }
  0x3f   :  { %986 = vmatprep.subr.bf16.mxu1 %v1058_v57 }
  0x41   :  { %970 = vmatpush3.bf16.msra.mxu0 %v1058_v57 }
  0x42   :  { %994 = vmatpush3.bf16.msra.mxu1 %v1058_v57 }
  0x44   :  { %972 = vmatmul.mubr.bf16.vlgmr.msra.gmra.mrb[16].mxu0 %v1061_v58  ;;  %v857_v58 = vld [vmem:[%s1304_s3 + $0x8] sm:$0xff]  }
  0x45   :  { %976 = vmatmul.mubr.bf16.vlgmr.msra.gmra.mrb[16].mxu1 %v1062_v59 }
  0xf6   :  { %v879_v60 = vpop.f32.mrb[0].mxu0 }
  0xf7   :  { %v919_v61 = vpop.f32.mrb[0].mxu1  ;;  %v880_v63 = vpop.f32.mrb[1].mxu0 }
  0xf8   :  { %v881_v0 = vadd.f32 %v880_v63, %v879_v60  ;;  %v920_v1 = vpop.f32.mrb[1].mxu1  ;;  %v882_v2 = vpop.f32.mrb[2].mxu0  ;;  %v822_v63 = vld [vmem:[%s1304_s3] sm:$0xff]  }
  0xf9   :  { %v921_v3 = vadd.f32 %v920_v1, %v919_v61  ;;  %v922_v4 = vpop.f32.mrb[2].mxu1  ;;  %v883_v5 = vpop.f32.mrb[3].mxu0  ;;  %v859_v61 = vld [vmem:[%s1304_s3 + $0x18] sm:$0xff]   ;;  %v827_v1 = vunpack.c.l.bf16 %v857_v58 }
  0xfa   :  { %v508_v6 = vadd.f32 %v881_v0, %v744_v62  ;;  %v884_v7 = vadd.f32 %v883_v5, %v882_v2  ;;  %v923_v8 = vpop.f32.mrb[3].mxu1  ;;  %v858_v0 = vld [vmem:[%s1304_s3 + $0x10] sm:$0xff]   ;;  %v823_v5 = vunpack.c.l.bf16 %v822_v63 }
  0xfb   :  { %v924_v9 = vadd.f32 %v923_v8, %v922_v4  ;;  %v835_v4 = vunpack.c.l.bf16 %v859_v61  ;;  %v831_v8 = vunpack.c.l.bf16 %v858_v0 }
  0xfc   :  { %v511_v10 = vadd.f32 %v884_v7, %v744_v62  ;;  %v1271_v11 = vadd.f32 %v921_v3, %v508_v6 }
  0xfe   :  { %v885_v12 = vpop.f32.mrb[4].mxu0  ;;  %v1273_v13 = vadd.f32 %v924_v9, %v511_v10  ;;  %v828_v9 = vunpack.c.h.bf16 %v857_v58 }
  0xff   :  { %v925_v14 = vpop.f32.mrb[4].mxu1  ;;  %v886_v15 = vpop.f32.mrb[5].mxu0 }
 0x100   :  { %v887_v16 = vadd.f32 %v886_v15, %v885_v12  ;;  %v926_v17 = vpop.f32.mrb[5].mxu1  ;;  %v888_v18 = vpop.f32.mrb[6].mxu0 }
 0x101   :  { %v927_v19 = vadd.f32 %v926_v17, %v925_v14  ;;  %v928_v20 = vpop.f32.mrb[6].mxu1  ;;  %v889_v21 = vpop.f32.mrb[7].mxu0  ;;  %v824_v17 = vunpack.c.h.bf16 %v822_v63 }
 0x102   :  { %v516_v22 = vadd.f32 %v887_v16, %v744_v62  ;;  %v890_v23 = vadd.f32 %v889_v21, %v888_v18  ;;  %v929_v24 = vpop.f32.mrb[7].mxu1  ;;  %v836_v16 = vunpack.c.h.bf16 %v859_v61 }
 0x103   :  { %v930_v25 = vadd.f32 %v929_v24, %v928_v20 }
 0x104   :  { %v519_v26 = vadd.f32 %v890_v23, %v744_v62  ;;  %v581_v27 = vadd.f32 %v927_v19, %v516_v22  ;;  %v832_v23 = vunpack.c.h.bf16 %v858_v0 }
 0x106   :  { %v891_v28 = vpop.f32.mrb[8].mxu0  ;;  %v584_v29 = vadd.f32 %v930_v25, %v519_v26 }
 0x107   :  { %v931_v30 = vpop.f32.mrb[8].mxu1  ;;  %v892_v31 = vpop.f32.mrb[9].mxu0 }
 0x108   :  { %v893_v32 = vadd.f32 %v892_v31, %v891_v28  ;;  %v932_v33 = vpop.f32.mrb[9].mxu1  ;;  %v894_v34 = vpop.f32.mrb[10].mxu0 }
 0x109   :  { %v933_v35 = vadd.f32 %v932_v33, %v931_v30  ;;  %v934_v36 = vpop.f32.mrb[10].mxu1  ;;  %v895_v37 = vpop.f32.mrb[11].mxu0 }
 0x10a   :  { %v524_v38 = vadd.f32 %v893_v32, %v744_v62  ;;  %v896_v39 = vadd.f32 %v895_v37, %v894_v34  ;;  %v935_v40 = vpop.f32.mrb[11].mxu1 }
 0x10b   :  { %v936_v41 = vadd.f32 %v935_v40, %v934_v36 }
 0x10c   :  { %v527_v42 = vadd.f32 %v896_v39, %v744_v62  ;;  %v589_v43 = vadd.f32 %v933_v35, %v524_v38 }
 0x10e   :  { %v897_v44 = vpop.f32.mrb[12].mxu0  ;;  %v592_v45 = vadd.f32 %v936_v41, %v527_v42 }
 0x10f   :  { %v937_v46 = vpop.f32.mrb[12].mxu1  ;;  %v898_v47 = vpop.f32.mrb[13].mxu0 }
 0x110   :  { %v899_v48 = vadd.f32 %v898_v47, %v897_v44  ;;  %v938_v49 = vpop.f32.mrb[13].mxu1  ;;  %v900_v50 = vpop.f32.mrb[14].mxu0 }
 0x111   :  { %v939_v51 = vadd.f32 %v938_v49, %v937_v46  ;;  %v940_v52 = vpop.f32.mrb[14].mxu1  ;;  %v901_v53 = vpop.f32.mrb[15].mxu0 }
 0x112   :  { %v532_v54 = vadd.f32 %v899_v48, %v744_v62  ;;  %v902_v55 = vadd.f32 %v901_v53, %v900_v50  ;;  %v941_v56 = vpop.f32.mrb[15].mxu1 }
 0x113   :  { %v942_v57 = vadd.f32 %v941_v56, %v940_v52 }
 0x114   :  { %v535_v59 = vadd.f32 %v902_v55, %v744_v62  ;;  %v597_v60 = vadd.f32 %v939_v51, %v532_v54 }
 0x116   :  { %v600_v2 = vadd.f32 %v942_v57, %v535_v59 }
 0x117   :  { %v973_v3 = vpop.f32.mrb[16].mxu0 }
 0x118   :  { %v646_v6 = vadd.f32 %v973_v3, %v581_v27  ;;  %v977_v62 = vpop.f32.mrb[16].mxu1  ;;  %v637_v7 = vpop.f32.mrb[17].mxu0 }
 0x119   :  { %v662_v10 = vadd.f32 %v977_v62, %v597_v60  ;;  %v638_v12 = vadd.f32 %v637_v7, %v1271_v11  ;;  %v653_v14 = vpop.f32.mrb[17].mxu1  ;;  %v974_v15 = vpop.f32.mrb[18].mxu0 }
 0x11a   :  { %v686_v18 = vadd.f32 %v827_v1, %v646_v6  ;;  %v654_v19 = vadd.f32 %v653_v14, %v589_v43  ;;  %v649_v20 = vadd.f32 %v974_v15, %v584_v29  ;;  %v978_v21 = vpop.f32.mrb[18].mxu1  ;;  %v640_v22 = vpop.f32.mrb[19].mxu0 }
 0x11b   :  { %v690_v24 = vadd.f32 %v835_v4, %v662_v10  ;;  %v684_v25 = vadd.f32 %v823_v5, %v638_v12  ;;  %v665_v26 = vadd.f32 %v978_v21, %v600_v2  ;;  %v641_v27 = vadd.f32 %v640_v22, %v1273_v13  ;;  %v656_v28 = vpop.f32.mrb[19].mxu1 }
 0x11c   :  { %v688_v30 = vadd.f32 %v831_v8, %v654_v19  ;;  %v687_v31 = vadd.f32 %v828_v9, %v649_v20  ;;  %v657_v32 = vadd.f32 %v656_v28, %v592_v45  ;;  %v694_v34 = vmax.f32 %v686_v18, 0.0 }
 0x11d   :  { %v691_v11 = vadd.f32 %v836_v16, %v665_v26  ;;  %v685_v33 = vadd.f32 %v824_v17, %v641_v27  ;;  %v698_v37 = vmax.f32 %v690_v24, 0.0  ;;  %v692_v38 = vmax.f32 %v684_v25, 0.0 }
 0x11e   :  { %v695_v35 = vmax.f32 %v687_v31, 0.0  ;;  %v689_v36 = vadd.f32 %v832_v23, %v657_v32  ;;  %v696_v40 = vmax.f32 %v688_v30, 0.0 }
 0x11f   :  { %v699_v29 = vmax.f32 %v691_v11, 0.0  ;;  %v693_v39 = vmax.f32 %v685_v33, 0.0 }
 0x120   :  { %v845_v41 = vpack.c.bf16 %v695_v35, %v694_v34  ;;  %v697_v42 = vmax.f32 %v689_v36, 0.0 }
 0x121   :  { %v855_v43 = vpack.c.bf16 %v699_v29, %v698_v37  ;;  %v840_v44 = vpack.c.bf16 %v693_v39, %v692_v38 }
 0x122   :  { %860 = vst [vmem:[%s1305_s4 + $0x8] sm:$0xff] %v845_v41   ;;  %v850_v13 = vpack.c.bf16 %v697_v42, %v696_v40 }
 0x123   :  { %862 = vst [vmem:[%s1305_s4 + $0x18] sm:$0xff] %v855_v43   ;;  %841 = vst [vmem:[%s1305_s4] sm:$0xff] %v840_v44  }
 0x124   :  { %861 = vst [vmem:[%s1305_s4 + $0x10] sm:$0xff] %v850_v13  }

// kernel: _lambda_.43
= control target key start
LH: loop header
LB: loop body
LE: loop exit
PB: predicated region body
PF: predicated region fallthrough
CT: control target
= control target key end

     0   :  { %v22_v0 = vlaneseq  ;;  %v47_v1 = vmov 0.0   ;;  %vm30_vm0 = vcmask 1041409   ;;  %s67_s0 = inlined_call_operand.vmem [shape: bf16[2,1,128], index: 0, kind: input, shape index: {}]   ;;  %s68_s1 = inlined_call_operand.vmem [shape: bf16[2,128], index: 1, kind: output, shape index: {}]  }
   0x1   :  { %12 = vst [vmem:[#allocation2] sm:$0x3] %v47_v1  ;;  %v14_v2 = vld [vmem:[%s67_s0] sm:$0x1]  ;;  %v15_v3 = vld [vmem:[%s67_s0 + $0x1] sm:$0x1] }
   0x2   :  { %v16_v4 = vunpack.c.l.bf16 %v14_v2  ;;  %v17_v5 = vunpack.c.l.bf16 %v15_v3  ;;  %v23_v6 = vshrl.u32 %v22_v0, 7 }
   0x4   :  { %v24_v7 = vsub.s32 0, %v23_v6 }
   0x6   :  { %v25_v8 = vrot.slane %v16_v4, %v24_v7  ;;  %v29_v9 = vrot.slane %v17_v5, %v24_v7 }
   0x8   :  { %v13_v10 = vld [vmem:[#allocation2] sm:$0x3]  ;;  %v31_v11 = vsel %vm30_vm0, %v29_v9, %v25_v8 }
   0x9   :  { %v33_v12 = vadd.f32 %v31_v11, %v13_v10 }
   0xb   :  { %34 = vst [vmem:[#allocation2] sm:$0x3] %v33_v12 }
  0x12   :  { %v38_v13 = vld [vmem:[#allocation2] sm:$0x3] }
  0x13   :  { %v39_v14 = vmax.f32 %v38_v13, 0.0 }
  0x15   :  { %v40_v15 = vpack.c.bf16 %v39_v14, %v39_v14 }
  0x17   :  { %41 = vst [vmem:[%s68_s1] sm:$0x1] %v40_v15 }

// kernel: _lambda_.44
= control target key start
LH: loop header
LB: loop body
LE: loop exit
PB: predicated region body
PF: predicated region fallthrough
CT: control target
= control target key end

     0   :  { %s848_s12 = smov 0   ;;  %s850_s13 = smov 0   ;;  %s987_s0 = inlined_call_operand.vmem [shape: bf16[64,128], index: 0, kind: input, shape index: {}]   ;;  %s988_s1 = inlined_call_operand.vmem [shape: bf16[128,256], index: 1, kind: input, shape index: {}]   ;;  %s989_s2 = inlined_call_operand.vmem [shape: f32[1,256], index: 2, kind: input, shape index: {}]   ;;  %s990_s3 = inlined_call_operand.vmem [shape: f32[64,256], index: 3, kind: output, shape index: {}]  }
   0x1   :  { %s852_s14 = smov 0   ;;  %s854_s15 = smov 0  }
   0x2   :  { %s856_s16 = smov 0  }
   0x3 LB: > { %s22_s17 = sadd.s32 1, %s822_s15  ;;  %s657_s18 = sadd.s32 4294967295, %s826_s16   ;;  %s826_s16 = sphi %s856_s16, %s13_s16   ;;  %s822_s15 = sphi %s854_s15, %s995_s15   ;;  %s818_s14 = sphi %s852_s14, %s994_s14   ;;  %s814_s13 = sphi %s850_s13, %s993_s13   ;;  %s810_s12 = sphi %s848_s12, %s992_s12  }
   0x4   : > { %p23_p0 = scmp.ge.s32.totalorder %s22_s17, 2  ;;  %p65_p1 = scmp.ne.s32.totalorder %s814_s13, %s810_s12 }
   0x5   : > { %p66_p2 = scmp.eq.s32.totalorder %s826_s16, 0  ;;  %p123_p4 = scmp.eq.s32.totalorder %s657_s18, 1 }
   0x6   : > { %s997_s17 = smov (%p23_p0, %s22_s17), 0  ;;  %s58_s20 = sadd.s32 1, %s814_s13 }
   0x7   : > { %p67_p3 = por %p66_p2, %p65_p1  ;;  %s55_s19 = ssub.s32 %s822_s15, %s997_s17 }
   0x8   : > { %p56_p5 = scmp.eq.s32.totalorder %s55_s19, 0  ;;  %p883_p6 = por %p123_p4, %p65_p1 }
   0x9   : > { %p661_p7 = scmp.ge.s32.totalorder %s826_s16, 2 }
   0xa   : > { %s888_s22 = scalar_select %p56_p5, %s814_s13, %s58_s20  }
   0xb   : > { %154 = sbr.rel (%p661_p7) target bundleno = 32 (0x20), region = 20 }
  0x12   : > { %157 = sbr.rel (!%p67_p3) target bundleno = 32 (0x20), region = 24  ;;  %s159_s23 = sand.u32 (%p67_p3), 1, %s814_s13  }
  0x13   : > { %s663_s24 = sshll.u32 (%p67_p3), %s822_s15, 2  ;;  %s662_s25 = sshll.u32 (%p67_p3), %s159_s23, 6 }
  0x14   : > { %s896_s28 = scalar_lea.vmem (%p67_p3), %s988_s1, %s663_s24  ;;  %s161_s29 = scalar_lea.vmem (%p67_p3), [#allocation2], %s662_s25 }
  0x15   : > { %v179_v0 = vld [vmem:[%s896_s28] sm:$0xf] (%p67_p3)  ;;  %v181_v1 = vld [vmem:[%s896_s28 + $0x8] sm:$0xf] (%p67_p3)  ;;  %v183_v2 = vld [vmem:[%s896_s28 + $0x10] sm:$0xf] (%p67_p3) }
  0x16   : > { %180 = vst [vmem:[%s161_s29] sm:$0xf] (%p67_p3), %v179_v0  ;;  %182 = vst [vmem:[%s161_s29 + $0x4] sm:$0xf] (%p67_p3), %v181_v1  ;;  %v185_v3 = vld [vmem:[%s896_s28 + $0x18] sm:$0xf] (%p67_p3) }
  0x17   : > { %v187_v4 = vld [vmem:[%s896_s28 + $0x20] sm:$0xf] (%p67_p3)  ;;  %184 = vst [vmem:[%s161_s29 + $0x8] sm:$0xf] (%p67_p3), %v183_v2  ;;  %186 = vst [vmem:[%s161_s29 + $0xc] sm:$0xf] (%p67_p3), %v185_v3 }
  0x18   : > { %188 = vst [vmem:[%s161_s29 + $0x10] sm:$0xf] (%p67_p3), %v187_v4  ;;  %v189_v5 = vld [vmem:[%s896_s28 + $0x28] sm:$0xf] (%p67_p3)  ;;  %v191_v6 = vld [vmem:[%s896_s28 + $0x30] sm:$0xf] (%p67_p3) }
  0x19   : > { %v193_v7 = vld [vmem:[%s896_s28 + $0x38] sm:$0xf]  ;;  %190 = vst [vmem:[%s161_s29 + $0x14] sm:$0xf] %v189_v5  ;;  %192 = vst [vmem:[%s161_s29 + $0x18] sm:$0xf] %v191_v6 }
  0x1a   : > { %194 = vst [vmem:[%s161_s29 + $0x1c] sm:$0xf] %v193_v7  ;;  %v195_v8 = vld [vmem:[%s896_s28 + $0x40] sm:$0xf]  ;;  %v197_v9 = vld [vmem:[%s896_s28 + $0x48] sm:$0xf] }
  0x1b   : > { %v199_v10 = vld [vmem:[%s896_s28 + $0x50] sm:$0xf]  ;;  %196 = vst [vmem:[%s161_s29 + $0x20] sm:$0xf] %v195_v8  ;;  %198 = vst [vmem:[%s161_s29 + $0x24] sm:$0xf] %v197_v9 }
  0x1c   : > { %200 = vst [vmem:[%s161_s29 + $0x28] sm:$0xf] %v199_v10  ;;  %v201_v11 = vld [vmem:[%s896_s28 + $0x58] sm:$0xf]  ;;  %v203_v12 = vld [vmem:[%s896_s28 + $0x60] sm:$0xf] }
  0x1d   : > { %v205_v13 = vld [vmem:[%s896_s28 + $0x68] sm:$0xf]  ;;  %202 = vst [vmem:[%s161_s29 + $0x2c] sm:$0xf] %v201_v11  ;;  %204 = vst [vmem:[%s161_s29 + $0x30] sm:$0xf] %v203_v12 }
  0x1e   : > { %206 = vst [vmem:[%s161_s29 + $0x34] sm:$0xf] %v205_v13  ;;  %v207_v14 = vld [vmem:[%s896_s28 + $0x70] sm:$0xf]  ;;  %v209_v15 = vld [vmem:[%s896_s28 + $0x78] sm:$0xf] }
  0x1f   : > { %208 = vst [vmem:[%s161_s29 + $0x38] sm:$0xf] %v207_v14  ;;  %210 = vst [vmem:[%s161_s29 + $0x3c] sm:$0xf] %v209_v15 }
  0x20 PF: > { %p664_p8 = scmp.ge.s32.totalorder %s826_s16, 1  ;;  %p270_p9 = scmp.lt.s32.totalorder %s826_s16, 3 }
  0x22   : > { %p271_p10 = pnand %p664_p8, %p270_p9 }
  0x23   : > { %s277_s30 = sand.u32 (!%p271_p10), 1, %s810_s12   ;;  %v784_v16 = vld [vmem:[%s987_s0] sm:$0xff] (!%p271_p10)   ;;  %v785_v17 = vld [vmem:[%s987_s0 + $0x10] sm:$0xff] (!%p271_p10)   ;;  %v786_v26 = vld [vmem:[%s987_s0 + $0x8] sm:$0xff] (!%p271_p10)   ;;  %p313_p11 = scmp.lt.s32.totalorder (!%p271_p10), %s818_s14, 1 }
  0x24   : > { %274 = sbr.rel (%p271_p10) target bundleno = 298 (0x12a), region = 69  ;;  %s920_s6 = sshll.u32 (!%p271_p10), %s277_s30, 6  ;;  %712 = vmatprep.mubr.bf16.mxu0 (!%p271_p10), %v784_v16  ;;  %716 = vmatprep.mubr.bf16.mxu1 (!%p271_p10), %v785_v17  ;;  %v787_v27 = vld [vmem:[%s987_s0 + $0x18] sm:$0xff] (!%p271_p10)  }
  0x25   : > { %s926_s9 = scalar_lea.vmem (!%p271_p10), [#allocation2], %s920_s6  ;;  %s948_s25 = scalar_lea.vmem (!%p271_p10), [#allocation3], %s920_s6 }
  0x26   : > { %v776_v18 = vld [vmem:[%s926_s9] sm:$0xff] (!%p271_p10)   ;;  %v777_v19 = vld [vmem:[%s926_s9 + $0x8] sm:$0xff] (!%p271_p10)   ;;  %v778_v20 = vld [vmem:[%s926_s9 + $0x10] sm:$0xff] (!%p271_p10)  }
  0x27   : > { %696 = vmatprep.subr.bf16.mxu0 (!%p271_p10), %v776_v18  ;;  %720 = vmatprep.subr.bf16.mxu1 (!%p271_p10), %v776_v18  ;;  %v779_v21 = vld [vmem:[%s926_s9 + $0x18] sm:$0xff] (!%p271_p10)   ;;  %v780_v22 = vld [vmem:[%s926_s9 + $0x20] sm:$0xff] (!%p271_p10)   ;;  %v781_v23 = vld [vmem:[%s926_s9 + $0x28] sm:$0xff] (!%p271_p10)  }
  0x28   : > { %697 = vmatpush3.bf16.msra.mxu0 (!%p271_p10), %v776_v18  ;;  %728 = vmatpush3.bf16.msra.mxu1 (!%p271_p10), %v776_v18  ;;  %v782_v24 = vld [vmem:[%s926_s9 + $0x30] sm:$0xff] (!%p271_p10)   ;;  %v783_v25 = vld [vmem:[%s926_s9 + $0x38] sm:$0xff] (!%p271_p10)  }
  0x29   : > { %698 = vmatprep.subr.bf16.mxu0 (!%p271_p10), %v777_v19  ;;  %721 = vmatprep.subr.bf16.mxu1 (!%p271_p10), %v777_v19 }
  0x2b   : > { %s314_s19 = scalar_select %p313_p11, %s818_s14, 1 }
  0x2c   : > { %699 = vmatpush3.bf16.msra.mxu0 %v777_v19  ;;  %729 = vmatpush3.bf16.msra.mxu1 %v777_v19  ;;  %s681_s26 = sshll.u32 (%p883_p6), %s818_s14, 3 }
  0x2d   : > { %700 = vmatprep.subr.bf16.mxu0 %v778_v20  ;;  %722 = vmatprep.subr.bf16.mxu1 %v778_v20  ;;  %s315_s24 = scalar_lea.vmem %s989_s2, %s314_s19  ;;  %s505_s29 = scalar_lea.vmem (%p883_p6), %s990_s3, %s681_s26 }
  0x2e   : > { %v667_v28 = vld [vmem:[%s315_s24] ss:$0 sm:$0xff] }
  0x30   : > { %701 = vmatpush3.bf16.msra.mxu0 %v778_v20  ;;  %730 = vmatpush3.bf16.msra.mxu1 %v778_v20 }
  0x31   : > { %702 = vmatprep.subr.bf16.mxu0 %v779_v21  ;;  %723 = vmatprep.subr.bf16.mxu1 %v779_v21 }
  0x34   : > { %703 = vmatpush3.bf16.msra.mxu0 %v779_v21  ;;  %731 = vmatpush3.bf16.msra.mxu1 %v779_v21 }
  0x35   : > { %704 = vmatprep.subr.bf16.mxu0 %v780_v22  ;;  %724 = vmatprep.subr.bf16.mxu1 %v780_v22 }
  0x38   : > { %705 = vmatpush3.bf16.msra.mxu0 %v780_v22  ;;  %732 = vmatpush3.bf16.msra.mxu1 %v780_v22 }
  0x39   : > { %706 = vmatprep.subr.bf16.mxu0 %v781_v23  ;;  %725 = vmatprep.subr.bf16.mxu1 %v781_v23 }
  0x3c   : > { %707 = vmatpush3.bf16.msra.mxu0 %v781_v23  ;;  %733 = vmatpush3.bf16.msra.mxu1 %v781_v23 }
  0x3d   : > { %708 = vmatprep.subr.bf16.mxu0 %v782_v24  ;;  %726 = vmatprep.subr.bf16.mxu1 %v782_v24 }
  0x40   : > { %709 = vmatpush3.bf16.msra.mxu0 %v782_v24  ;;  %734 = vmatpush3.bf16.msra.mxu1 %v782_v24 }
  0x41   : > { %710 = vmatprep.subr.bf16.mxu0 %v783_v25  ;;  %727 = vmatprep.subr.bf16.mxu1 %v783_v25 }
  0x44   : > { %711 = vmatpush3.bf16.msra.mxu0 %v783_v25  ;;  %735 = vmatpush3.bf16.msra.mxu1 %v783_v25 }
  0x47   : > { %713 = vmatmul.mubr.bf16.vlgmr.msra.gmra.mrb[0].mxu0 %v786_v26  ;;  %717 = vmatmul.mubr.bf16.vlgmr.msra.gmra.mrb[0].mxu1 %v787_v27 }
 0x11a   : > { %v714_v29 = vpop.f32.mrb[0].mxu0  ;;  %v718_v30 = vpop.f32.mrb[0].mxu1  ;;  %500 = sbr.rel (!%p883_p6) target bundleno = 298 (0x12a), region = 77 }
 0x11b   : > { %v464_v31 = vadd.f32 %v714_v29, %v667_v28  ;;  %v480_v32 = vadd.f32 %v718_v30, %v667_v28  ;;  %v455_v33 = vpop.f32.mrb[1].mxu0  ;;  %v471_v34 = vpop.f32.mrb[1].mxu1 }
 0x11c   : > { %v456_v35 = vadd.f32 %v667_v28, %v455_v33  ;;  %v472_v36 = vadd.f32 %v667_v28, %v471_v34  ;;  %v715_v37 = vpop.f32.mrb[2].mxu0  ;;  %v719_v38 = vpop.f32.mrb[2].mxu1 }
 0x11d   : > { %488 = vst [vmem:[%s948_s25 + $0x10] sm:$0xff] %v464_v31  ;;  %492 = vst [vmem:[%s948_s25 + $0x30] sm:$0xff] %v480_v32  ;;  %v467_v39 = vadd.f32 %v715_v37, %v667_v28  ;;  %v483_v40 = vadd.f32 %v719_v38, %v667_v28  ;;  %v458_v41 = vpop.f32.mrb[3].mxu0  ;;  %v474_v42 = vpop.f32.mrb[3].mxu1 }
 0x11e   : > { %486 = vst [vmem:[%s948_s25] sm:$0xff] %v456_v35  ;;  %490 = vst [vmem:[%s948_s25 + $0x20] sm:$0xff] %v472_v36  ;;  %v459_v43 = vadd.f32 %v667_v28, %v458_v41  ;;  %v475_v44 = vadd.f32 %v667_v28, %v474_v42 }
 0x11f   : > { %489 = vst [vmem:[%s948_s25 + $0x18] sm:$0xff] %v467_v39  ;;  %493 = vst [vmem:[%s948_s25 + $0x38] sm:$0xff] %v483_v40 }
 0x120   : > { %487 = vst [vmem:[%s948_s25 + $0x8] sm:$0xff] %v459_v43  ;;  %491 = vst [vmem:[%s948_s25 + $0x28] sm:$0xff] %v475_v44 }
 0x124   : > { %v551_v47 = vld [vmem:[%s948_s25 + $0x10] sm:$0xff] }
 0x125   : > { %v547_v45 = vld [vmem:[%s948_s25] sm:$0xff]  ;;  %552 = vst [vmem:[%s505_s29 + $0x20] sm:$0xff] %v551_v47  ;;  %v559_v51 = vld [vmem:[%s948_s25 + $0x30] sm:$0xff] }
 0x126   : > { %v553_v48 = vld [vmem:[%s948_s25 + $0x18] sm:$0xff]  ;;  %v555_v49 = vld [vmem:[%s948_s25 + $0x20] sm:$0xff]  ;;  %548 = vst [vmem:[%s505_s29] sm:$0xff] %v547_v45  ;;  %560 = vst [vmem:[%s505_s29 + $0x60] sm:$0xff] %v559_v51 }
 0x127   : > { %v549_v46 = vld [vmem:[%s948_s25 + $0x8] sm:$0xff]  ;;  %554 = vst [vmem:[%s505_s29 + $0x30] sm:$0xff] %v553_v48  ;;  %556 = vst [vmem:[%s505_s29 + $0x40] sm:$0xff] %v555_v49  ;;  %v561_v52 = vld [vmem:[%s948_s25 + $0x38] sm:$0xff] }
 0x128   : > { %v557_v50 = vld [vmem:[%s948_s25 + $0x28] sm:$0xff]  ;;  %550 = vst [vmem:[%s505_s29 + $0x10] sm:$0xff] %v549_v46  ;;  %562 = vst [vmem:[%s505_s29 + $0x70] sm:$0xff] %v561_v52 }
 0x129   : > { %558 = vst [vmem:[%s505_s29 + $0x50] sm:$0xff] %v557_v50 }
 0x12a PF: > { %s13_s16 = sadd.s32 1, %s826_s16   ;;  %s992_s12 = smov %s814_s13 }
 0x12b   : > { %p10_p12 = scmp.ge.s32.totalorder %s13_s16, 4   ;;  %s993_s13 = smov %s888_s22 }
 0x12c   : > { %s994_s14 = smov %s822_s15  ;;  %s995_s15 = smov %s997_s17 }
 0x12d   :  { %12 = sbr.rel (!%p10_p12) target bundleno = 3 (0x3), region = 152 }

// kernel: _lambda_.45
= control target key start
LH: loop header
LB: loop body
LE: loop exit
PB: predicated region body
PF: predicated region fallthrough
CT: control target
= control target key end

     0   :  { %s355_s1 = inlined_call_operand.vmem [shape: bf16[128,128], index: 1, kind: input, shape index: {}]   ;;  %s356_s0 = inlined_call_operand.vmem [shape: bf16[64,128], index: 0, kind: input, shape index: {}]   ;;  %s357_s2 = inlined_call_operand.vmem [shape: f32[1,128], index: 2, kind: input, shape index: {}]   ;;  %s358_s3 = inlined_call_operand.vmem [shape: f32[64,128], index: 3, kind: output, shape index: {}]  }
   0x1   :  { %v260_v0 = vld [vmem:[%s355_s1] sm:$0xff]   ;;  %v261_v1 = vld [vmem:[%s355_s1 + $0x8] sm:$0xff]   ;;  %v262_v2 = vld [vmem:[%s355_s1 + $0x10] sm:$0xff]  }
   0x2   :  { %220 = vmatprep.subr.bf16.mxu0 %v260_v0  ;;  %244 = vmatprep.subr.bf16.mxu1 %v260_v0  ;;  %v263_v3 = vld [vmem:[%s355_s1 + $0x18] sm:$0xff]   ;;  %v268_v4 = vld [vmem:[%s356_s0] sm:$0xff]   ;;  %v269_v5 = vld [vmem:[%s356_s0 + $0x10] sm:$0xff]  }
   0x3   :  { %221 = vmatpush3.bf16.msra.mxu0 %v260_v0  ;;  %252 = vmatpush3.bf16.msra.mxu1 %v260_v0  ;;  %v264_v6 = vld [vmem:[%s355_s1 + $0x20] sm:$0xff]   ;;  %v265_v7 = vld [vmem:[%s355_s1 + $0x28] sm:$0xff]   ;;  %v266_v8 = vld [vmem:[%s355_s1 + $0x30] sm:$0xff]  }
   0x4   :  { %222 = vmatprep.subr.bf16.mxu0 %v261_v1  ;;  %245 = vmatprep.subr.bf16.mxu1 %v261_v1  ;;  %v267_v9 = vld [vmem:[%s355_s1 + $0x38] sm:$0xff]   ;;  %v270_v10 = vld [vmem:[%s356_s0 + $0x8] sm:$0xff]   ;;  %v195_v12 = vld [vmem:[%s357_s2] ss:$0 sm:$0xff] }
   0x5   :  { %236 = vmatprep.mubr.bf16.mxu0 %v268_v4  ;;  %240 = vmatprep.mubr.bf16.mxu1 %v269_v5  ;;  %v271_v11 = vld [vmem:[%s356_s0 + $0x18] sm:$0xff]  }
   0x7   :  { %223 = vmatpush3.bf16.msra.mxu0 %v261_v1  ;;  %253 = vmatpush3.bf16.msra.mxu1 %v261_v1 }
   0x8   :  { %224 = vmatprep.subr.bf16.mxu0 %v262_v2  ;;  %246 = vmatprep.subr.bf16.mxu1 %v262_v2 }
   0xb   :  { %225 = vmatpush3.bf16.msra.mxu0 %v262_v2  ;;  %254 = vmatpush3.bf16.msra.mxu1 %v262_v2 }
   0xc   :  { %226 = vmatprep.subr.bf16.mxu0 %v263_v3  ;;  %247 = vmatprep.subr.bf16.mxu1 %v263_v3 }
   0xf   :  { %227 = vmatpush3.bf16.msra.mxu0 %v263_v3  ;;  %255 = vmatpush3.bf16.msra.mxu1 %v263_v3 }
  0x10   :  { %228 = vmatprep.subr.bf16.mxu0 %v264_v6  ;;  %248 = vmatprep.subr.bf16.mxu1 %v264_v6 }
  0x13   :  { %229 = vmatpush3.bf16.msra.mxu0 %v264_v6  ;;  %256 = vmatpush3.bf16.msra.mxu1 %v264_v6 }
  0x14   :  { %230 = vmatprep.subr.bf16.mxu0 %v265_v7  ;;  %249 = vmatprep.subr.bf16.mxu1 %v265_v7 }
  0x17   :  { %231 = vmatpush3.bf16.msra.mxu0 %v265_v7  ;;  %257 = vmatpush3.bf16.msra.mxu1 %v265_v7 }
  0x18   :  { %232 = vmatprep.subr.bf16.mxu0 %v266_v8  ;;  %250 = vmatprep.subr.bf16.mxu1 %v266_v8 }
  0x1b   :  { %233 = vmatpush3.bf16.msra.mxu0 %v266_v8  ;;  %258 = vmatpush3.bf16.msra.mxu1 %v266_v8 }
  0x1c   :  { %234 = vmatprep.subr.bf16.mxu0 %v267_v9  ;;  %251 = vmatprep.subr.bf16.mxu1 %v267_v9 }
  0x1f   :  { %235 = vmatpush3.bf16.msra.mxu0 %v267_v9  ;;  %259 = vmatpush3.bf16.msra.mxu1 %v267_v9 }
  0x22   :  { %237 = vmatmul.mubr.bf16.vlgmr.msra.gmra.mrb[0].mxu0 %v270_v10  ;;  %241 = vmatmul.mubr.bf16.vlgmr.msra.gmra.mrb[0].mxu1 %v271_v11 }
  0xf5   :  { %v238_v13 = vpop.f32.mrb[0].mxu0  ;;  %v242_v14 = vpop.f32.mrb[0].mxu1 }
  0xf6   :  { %v161_v15 = vadd.f32 %v238_v13, %v195_v12  ;;  %v177_v16 = vadd.f32 %v242_v14, %v195_v12  ;;  %v152_v17 = vpop.f32.mrb[1].mxu0  ;;  %v168_v18 = vpop.f32.mrb[1].mxu1 }
  0xf7   :  { %v153_v19 = vadd.f32 %v195_v12, %v152_v17  ;;  %v169_v20 = vadd.f32 %v195_v12, %v168_v18  ;;  %v239_v21 = vpop.f32.mrb[2].mxu0  ;;  %v243_v22 = vpop.f32.mrb[2].mxu1 }
  0xf8   :  { %185 = vst [vmem:[%s358_s3 + $0x10] sm:$0xff] %v161_v15  ;;  %189 = vst [vmem:[%s358_s3 + $0x30] sm:$0xff] %v177_v16  ;;  %v164_v23 = vadd.f32 %v239_v21, %v195_v12  ;;  %v180_v24 = vadd.f32 %v243_v22, %v195_v12  ;;  %v155_v25 = vpop.f32.mrb[3].mxu0  ;;  %v171_v26 = vpop.f32.mrb[3].mxu1 }
  0xf9   :  { %183 = vst [vmem:[%s358_s3] sm:$0xff] %v153_v19  ;;  %187 = vst [vmem:[%s358_s3 + $0x20] sm:$0xff] %v169_v20  ;;  %v156_v27 = vadd.f32 %v195_v12, %v155_v25  ;;  %v172_v28 = vadd.f32 %v195_v12, %v171_v26 }
  0xfa   :  { %186 = vst [vmem:[%s358_s3 + $0x18] sm:$0xff] %v164_v23  ;;  %190 = vst [vmem:[%s358_s3 + $0x38] sm:$0xff] %v180_v24 }
  0xfb   :  { %184 = vst [vmem:[%s358_s3 + $0x8] sm:$0xff] %v156_v27  ;;  %188 = vst [vmem:[%s358_s3 + $0x28] sm:$0xff] %v172_v28 }

</bundles_post_ra>
